<compile_context>
chip_gen: v6e
topology: v6e:2x2x1
jax: 0.10.0
libtpu: 0.0.40
codegen_flags: <defaults>
</compile_context>

<pallas_src>
import functools

import jax
import jax.numpy as jnp
from jax.experimental import pallas as pl
from jax.experimental.pallas import tpu as pltpu


# ---------------------------------------------------------------------------
# helpers
# ---------------------------------------------------------------------------
def _round_up(x, m):
    return (x + m - 1) // m * m


def _pick_tile(dim, unit, max_tile):
    """Largest multiple of `unit` that divides `dim` and is <= max_tile."""
    best = unit
    t = unit
    limit = min(dim, max_tile)
    while t <= limit:
        if dim % t == 0:
            best = t
        t += unit
    return best


def _pad_to(a, rows, cols, dtype):
    r, c = a.shape
    if r == rows and c == cols:
        return a.astype(dtype)
    return jnp.zeros((rows, cols), dtype).at[:r, :c].set(a.astype(dtype))


def _choose_tiles(M, Kp, Np):
    """Pick (Mp, tm, tn, tk). bf16-friendly (mult of 16) M tiles; >=2 parallel blocks."""
    Mp = _round_up(M, 16)
    tm = _pick_tile(Mp, 16, 512)
    tn_cap = 512 if M <= 64 else 256          # tiny-M (FC) layers: bigger N tiles
    tn = _pick_tile(Np, 128, tn_cap)
    tk = _pick_tile(Kp, 128, 1024)
    # v7x megacore: expose >= 2 blocks across the ("parallel","parallel") axes.
    if (Mp // tm) * (Np // tn) < 2:
        if Np % 256 == 0:
            tn = _pick_tile(Np, 128, Np // 2)     # split N in two
        elif M > 16:
            Mp = _round_up(M, 32)                 # split M in two (tm stays mult of 16)
            tm = Mp // 2
    return Mp, tm, tn, tk


# ---------------------------------------------------------------------------
# Pallas kernel: tiled matmul, f32 scratch accumulator, fused per-column
# shift (+ReLU) epilogue and dtype cast on the last K step.
#
# NOTE: correctness relies on the K axis being LAST in the grid, marked
# "arbitrary", and the output index_map being constant in k (resident block).
# ---------------------------------------------------------------------------
def _fused_matmul_kernel(x_ref, w_ref, b_ref, o_ref, acc_ref, *, apply_relu):
    k = pl.program_id(2)

    @pl.when(k == 0)
    def _():
        acc_ref[...] = jnp.zeros_like(acc_ref)

    # bf16 x bf16 -> f32 accumulation.
    acc_ref[...] += jnp.dot(x_ref[...], w_ref[...],
                            preferred_element_type=jnp.float32)

    @pl.when(k == pl.num_programs(2) - 1)
    def _():
        y = acc_ref[...] + b_ref[...]
        if apply_relu:
            y = jnp.maximum(y, 0.0)
        o_ref[...] = y.astype(o_ref.dtype)


def fused_matmul(x, w_p, shift_p, n_out, apply_relu, out_dtype):
    """out = maybe_relu(x @ w + shift).

    x:        (M, K)   activations (cast to bf16 here if not already)
    w_p:      (Kp, Np) pre-padded bf16 weights (BN scale already folded in)
    shift_p:  (1, Np)  f32 per-column shift (bias / folded BN)
    returns   (M, n_out) in out_dtype
    """
    M, K = x.shape
    Kp, Np = w_p.shape

    Mp, tm, tn, tk = _choose_tiles(M, Kp, Np)

    xb = x.astype(jnp.bfloat16)
    if (Mp, Kp) != (M, K):
        xb = jnp.zeros((Mp, Kp), jnp.bfloat16).at[:M, :K].set(xb)

    grid = (Mp // tm, Np // tn, Kp // tk)

    out_bytes = jnp.dtype(out_dtype).itemsize
    cost = pl.CostEstimate(
        flops=int(2 * Mp * Kp * Np),
        transcendentals=0,
        bytes_accessed=int(Mp * Kp * 2 + Kp * Np * 2 + Np * 4 + Mp * Np * out_bytes),
    )

    # Per-step VMEM: 2*(tm*tk + tk*tn)*2B + (tm*tn)*(4B acc + out) <= ~2 MiB here.
    out = pl.pallas_call(
        functools.partial(_fused_matmul_kernel, apply_relu=apply_relu),
        out_shape=jax.ShapeDtypeStruct((Mp, Np), out_dtype),
        grid_spec=pltpu.PrefetchScalarGridSpec(
            num_scalar_prefetch=0,
            grid=grid,
            in_specs=[
                pl.BlockSpec((tm, tk), lambda i, j, k: (i, k)),
                pl.BlockSpec((tk, tn), lambda i, j, k: (k, j)),
                pl.BlockSpec((1, tn), lambda i, j, k: (0, j)),
            ],
            out_specs=pl.BlockSpec((tm, tn), lambda i, j, k: (i, j)),
            scratch_shapes=[pltpu.VMEM((tm, tn), jnp.float32)],
        ),
        compiler_params=pltpu.CompilerParams(
            dimension_semantics=("parallel", "parallel", "arbitrary")),
        cost_estimate=cost,
    )(xb, w_p, shift_p)
    return out[:M, :n_out]


# ---------------------------------------------------------------------------
# im2col on NHWC activations — patch ordering (kh, kw, C)
# ---------------------------------------------------------------------------
def im2col_nhwc(x, kh, kw, stride):
    B, H, W, C = x.shape
    Ho = (H - kh) // stride + 1
    Wo = (W - kw) // stride + 1
    patches = []
    for i in range(kh):
        for j in range(kw):
            patches.append(x[:, i:i + stride * Ho:stride,
                             j:j + stride * Wo:stride, :])
    cols = jnp.stack(patches, axis=3)                 # (B, Ho, Wo, kh*kw, C)
    cols = cols.reshape(B * Ho * Wo, kh * kw * C)     # K ordering: (kh, kw, C)
    return cols, Ho, Wo


# ---------------------------------------------------------------------------
# Parameter construction (PyTorch layout, deterministic)
# ---------------------------------------------------------------------------
def init_params(key, in_channels=4, num_actions=18):
    ks = jax.random.split(key, 16)
    p = {}

    def nrm(k, shape, scale=0.05):
        return scale * jax.random.normal(k, shape, jnp.float32)

    p["w1"] = nrm(ks[0], (64, in_channels, 8, 8))
    p["b1"] = nrm(ks[1], (64,))
    p["g1"], p["be1"] = nrm(ks[2], (64,)) + 1.0, nrm(ks[3], (64,))
    p["m1"], p["v1"] = jnp.zeros((64,)), jnp.ones((64,))

    p["w2"] = nrm(ks[4], (128, 64, 4, 4))
    p["b2"] = nrm(ks[5], (128,))
    p["g2"], p["be2"] = nrm(ks[6], (128,)) + 1.0, nrm(ks[7], (128,))
    p["m2"], p["v2"] = jnp.zeros((128,)), jnp.ones((128,))

    p["w3"] = nrm(ks[8], (128, 128, 3, 3))
    p["b3"] = nrm(ks[9], (128,))
    p["g3"], p["be3"] = nrm(ks[10], (128,)) + 1.0, nrm(ks[11], (128,))
    p["m3"], p["v3"] = jnp.zeros((128,)), jnp.ones((128,))

    p["fw1"] = nrm(ks[12], (1024, 7 * 7 * 128), 0.01)
    p["fb1"] = jnp.zeros((1024,))
    p["fw2"] = nrm(ks[13], (512, 1024), 0.01)
    p["fb2"] = jnp.zeros((512,))
    p["ow"] = nrm(ks[14], (num_actions, 512), 0.01)
    p["ob"] = nrm(ks[15], (num_actions,), 0.01)
    return p


# ---------------------------------------------------------------------------
# One-time weight preparation: BN scale fold INTO weights (f32, pre-cast),
# reshape/transpose, pad, bf16 cast.  Padded rows/cols are zero so padded
# activation rows / output cols stay exactly zero.
# ---------------------------------------------------------------------------
def prepare_params(p, eps=1e-5):
    q = {}

    def prep_conv(name, w, b, g, be, m, v):
        O, C, kh, kw = w.shape
        # OIHW -> (kh, kw, C, O) so flattened K ordering matches im2col_nhwc.
        w2d = jnp.transpose(w, (2, 3, 1, 0)).reshape(kh * kw * C, O)
        s = g / jnp.sqrt(v + eps)                     # BN scale
        sh = (b - m) * s + be                         # folded BN/bias shift
        w2d = w2d * s[None, :]                        # fold scale into weights (f32)
        Kp, Np = _round_up(kh * kw * C, 128), _round_up(O, 128)
        q[name + "_w"] = _pad_to(w2d, Kp, Np, jnp.bfloat16)
        q[name + "_b"] = _pad_to(sh.reshape(1, O), 1, Np, jnp.float32)

    prep_conv("c1", p["w1"], p["b1"], p["g1"], p["be1"], p["m1"], p["v1"])
    prep_conv("c2", p["w2"], p["b2"], p["g2"], p["be2"], p["m2"], p["v2"])
    prep_conv("c3", p["w3"], p["b3"], p["g3"], p["be3"], p["m3"], p["v3"])

    def prep_fc(name, w, b):
        O, K = w.shape
        Kp, Np = _round_up(K, 128), _round_up(O, 128)
        q[name + "_w"] = _pad_to(w.T, Kp, Np, jnp.bfloat16)
        q[name + "_b"] = _pad_to(b.reshape(1, O), 1, Np, jnp.float32)

    # FC1 weight columns are in PyTorch (C=128, H=7, W=7) flatten order;
    # permute to (H, W, C) so the NHWC flatten feeds it directly (no transpose).
    fw1 = p["fw1"].reshape(1024, 128, 7, 7).transpose(0, 2, 3, 1)
    fw1 = fw1.reshape(1024, 7 * 7 * 128)
    prep_fc("f1", fw1, p["fb1"])
    prep_fc("f2", p["fw2"], p["fb2"])
    prep_fc("fo", p["ow"], p["ob"])
    return q


# ---------------------------------------------------------------------------
# Forward pass (Pallas hot path; bf16 NHWC activations between layers)
# ---------------------------------------------------------------------------
def make_forward(num_actions=18):
    conv_cfg = ((8, 4, 64), (4, 2, 128), (3, 1, 128))   # (ksize, stride, out_ch)
    fc_cfg = (("f1", 1024, True), ("f2", 512, True), ("fo", num_actions, False))

    @jax.jit
    def forward(x, q):
        # x: (B, C, H, W) NCHW like PyTorch; transpose once to NHWC, cast to bf16.
        x = jnp.transpose(x, (0, 2, 3, 1)).astype(jnp.bfloat16)
        for idx, (ks, st, oc) in enumerate(conv_cfg, start=1):
            name = "c%d" % idx
            B = x.shape[0]
            cols, Ho, Wo = im2col_nhwc(x, ks, ks, st)
            y = fused_matmul(cols, q[name + "_w"], q[name + "_b"],
                             n_out=oc, apply_relu=True, out_dtype=jnp.bfloat16)
            x = y.reshape(B, Ho, Wo, oc)                # already NHWC, no transpose
        B = x.shape[0]
        x = x.reshape(B, -1)                            # (H, W, C) flatten (fc1 permuted)
        for name, oc, relu in fc_cfg:
            out_dt = jnp.float32 if name == "fo" else jnp.bfloat16
            x = fused_matmul(x, q[name + "_w"], q[name + "_b"],
                             n_out=oc, apply_relu=relu, out_dtype=out_dt)
            # dropout1 / dropout2: identity (eval mode)
        return x

    return forward


# ---------------------------------------------------------------------------
# Pure-JAX f32 reference (validation only)
# ---------------------------------------------------------------------------
def cnn_reference(x, p, eps=1e-5):
    def conv(x, w, b, stride):
        y = jax.lax.conv_general_dilated(
            x, w, (stride, stride), "VALID",
            dimension_numbers=("NCHW", "OIHW", "NCHW"))
        return y + b[None, :, None, None]

    def bn(y, g, be, m, v):
        return (y - m[None, :, None, None]) / jnp.sqrt(v[None, :, None, None] + eps) \
               * g[None, :, None, None] + be[None, :, None, None]

    r = jax.nn.relu
    x = r(bn(conv(x, p["w1"], p["b1"], 4), p["g1"], p["be1"], p["m1"], p["v1"]))
    x = r(bn(conv(x, p["w2"], p["b2"], 2), p["g2"], p["be2"], p["m2"], p["v2"]))
    x = r(bn(conv(x, p["w3"], p["b3"], 1), p["g3"], p["be3"], p["m3"], p["v3"]))
    x = x.reshape(x.shape[0], -1)
    x = r(x @ p["fw1"].T + p["fb1"])
    x = r(x @ p["fw2"].T + p["fb2"])
    return x @ p["ow"].T + p["ob"]


if __name__ == "__main__":
    key = jax.random.PRNGKey(0)
    kx, kp = jax.random.split(key)
    # Input must be 84x84 spatial for the 7*7*128 flatten to hold (Atari DQN net).
    x = jax.random.normal(kx, (2, 4, 84, 84), jnp.float32)
    params = init_params(kp)
    prepped = prepare_params(params)          # one-time: fold BN into W, pad, bf16
    forward = make_forward(num_actions=18)

    out = jax.block_until_ready(forward(x, prepped))
    ref = jax.block_until_ready(cnn_reference(x, params))

    assert out.shape == (2, 18), out.shape
    max_err = float(jnp.max(jnp.abs(out - ref)))
    # bf16 operands / activations, f32 accumulation: |err| ~ few e-4..e-3 on ~1e-2 outputs.
    assert jnp.allclose(out, ref, atol=5e-3, rtol=3e-2), max_err
    print("KERNEL_OK")
</pallas_src>

<mosaic_0001>
module attributes {stable_mosaic.version = 11 : i64} {
  func.func @_fused_matmul_kernel(%arg0: i32, %arg1: i32, %arg2: i32, %arg3: memref<400x256xbf16, #tpu.memory_space<vmem>>, %arg4: memref<256x128xbf16, #tpu.memory_space<vmem>>, %arg5: memref<1x128xf32, #tpu.memory_space<vmem>>, %arg6: memref<400x128xbf16, #tpu.memory_space<vmem>>, %arg7: memref<400x128xf32, #tpu.memory_space<vmem>>) attributes {dimension_semantics = [#tpu.dimension_semantics<parallel>, #tpu.dimension_semantics<parallel>, #tpu.dimension_semantics<arbitrary>], iteration_bounds = array<i64: 2, 1, 1>, scalar_prefetch = 0 : i64, scratch_operands = 1 : i64, tpu.core_type = #tpu.core_type<tc>, window_params = [{transform_indices = @transform_0, window_bounds = array<i64: 400, 256>}, {transform_indices = @transform_1, window_bounds = array<i64: 256, 128>}, {transform_indices = @transform_2, window_bounds = array<i64: 1, 128>}, {transform_indices = @transform_3, window_bounds = array<i64: 400, 128>}]} {
    %c0_i32 = arith.constant 0 : i32
    %0 = arith.cmpi eq, %arg2, %c0_i32 : i32
    %1 = arith.extui %0 : i1 to i32
    %c0_i32_0 = arith.constant 0 : i32
    %2 = arith.cmpi ne, %1, %c0_i32_0 : i32
    scf.if %2 {
      %cst_10 = arith.constant 0.000000e+00 : f32
      %12 = vector.broadcast %cst_10 : f32 to vector<400x128xf32>
      %c0_11 = arith.constant 0 : index
      %c0_12 = arith.constant 0 : index
      %13 = vector.load %arg7[%c0_11, %c0_12] : memref<400x128xf32, #tpu.memory_space<vmem>>, vector<400x128xf32>
      tpu.vector_store %arg7[%c0_11, %c0_12], %12 {strides = array<i32>} : memref<400x128xf32, #tpu.memory_space<vmem>>, vector<400x128xf32>,
    } else {
    }
    %c0 = arith.constant 0 : index
    %c0_1 = arith.constant 0 : index
    %3 = vector.load %arg7[%c0, %c0_1] : memref<400x128xf32, #tpu.memory_space<vmem>>, vector<400x128xf32>
    %c0_2 = arith.constant 0 : index
    %c0_3 = arith.constant 0 : index
    %4 = vector.load %arg3[%c0_2, %c0_3] : memref<400x256xbf16, #tpu.memory_space<vmem>>, vector<400x256xbf16>
    %c0_4 = arith.constant 0 : index
    %c0_5 = arith.constant 0 : index
    %5 = vector.load %arg4[%c0_4, %c0_5] : memref<256x128xbf16, #tpu.memory_space<vmem>>, vector<256x128xbf16>
    %cst = arith.constant dense<0.000000e+00> : vector<400x128xf32>
    %6 = tpu.matmul %4, %5, %cst {dimension_numbers = #tpu.dot_dimension_numbers<[1], [0], [0], [1], [0, 0, 1, 1], [], []>} : vector<400x256xbf16>, vector<256x128xbf16>, vector<400x128xf32> -> vector<400x128xf32>
    %7 = arith.addf %3, %6 : vector<400x128xf32>
    %c0_6 = arith.constant 0 : index
    %c0_7 = arith.constant 0 : index
    %8 = vector.load %arg7[%c0_6, %c0_7] : memref<400x128xf32, #tpu.memory_space<vmem>>, vector<400x128xf32>
    tpu.vector_store %arg7[%c0_6, %c0_7], %7 {strides = array<i32>} : memref<400x128xf32, #tpu.memory_space<vmem>>, vector<400x128xf32>,
    %c0_i32_8 = arith.constant 0 : i32
    %9 = arith.cmpi eq, %arg2, %c0_i32_8 : i32
    %10 = arith.extui %9 : i1 to i32
    %c0_i32_9 = arith.constant 0 : i32
    %11 = arith.cmpi ne, %10, %c0_i32_9 : i32
    scf.if %11 {
      %c0_10 = arith.constant 0 : index
      %c0_11 = arith.constant 0 : index
      %12 = vector.load %arg7[%c0_10, %c0_11] : memref<400x128xf32, #tpu.memory_space<vmem>>, vector<400x128xf32>
      %c0_12 = arith.constant 0 : index
      %c0_13 = arith.constant 0 : index
      %13 = vector.load %arg5[%c0_12, %c0_13] : memref<1x128xf32, #tpu.memory_space<vmem>>, vector<1x128xf32>
      %14 = vector.broadcast %13 : vector<1x128xf32> to vector<400x128xf32>
      %15 = arith.addf %12, %14 : vector<400x128xf32>
      %cst_14 = arith.constant 0.000000e+00 : f32
      %16 = vector.broadcast %cst_14 : f32 to vector<400x128xf32>
      %17 = arith.maximumf %15, %16 : vector<400x128xf32>
      %18 = arith.truncf %17 : vector<400x128xf32> to vector<400x128xbf16>
      %c0_15 = arith.constant 0 : index
      %c0_16 = arith.constant 0 : index
      %19 = vector.load %arg6[%c0_15, %c0_16] : memref<400x128xbf16, #tpu.memory_space<vmem>>, vector<400x128xbf16>
      tpu.vector_store %arg6[%c0_15, %c0_16], %18 {strides = array<i32>} : memref<400x128xbf16, #tpu.memory_space<vmem>>, vector<400x128xbf16>,
    } else {
    }
    return
  }
  func.func @transform_0(%arg0: i32, %arg1: i32, %arg2: i32) -> (i32, i32) {
    %c0_i32 = arith.constant 0 : i32
    return %arg0, %arg2 : i32, i32
  }
  func.func @transform_1(%arg0: i32, %arg1: i32, %arg2: i32) -> (i32, i32) {
    %c0_i32 = arith.constant 0 : i32
    return %arg2, %arg1 : i32, i32
  }
  func.func @transform_2(%arg0: i32, %arg1: i32, %arg2: i32) -> (i32, i32) {
    %c0_i32 = arith.constant 0 : i32
    %c0_i32_0 = arith.constant 0 : i32
    return %c0_i32, %arg1 : i32, i32
  }
  func.func @transform_3(%arg0: i32, %arg1: i32, %arg2: i32) -> (i32, i32) {
    %c0_i32 = arith.constant 0 : i32
    return %arg0, %arg1 : i32, i32
  }
}

module attributes {stable_mosaic.version = 11 : i64} {
  func.func @_fused_matmul_kernel(%arg0: i32, %arg1: i32, %arg2: i32, %arg3: memref<96x1024xbf16, #tpu.memory_space<vmem>>, %arg4: memref<1024x128xbf16, #tpu.memory_space<vmem>>, %arg5: memref<1x128xf32, #tpu.memory_space<vmem>>, %arg6: memref<96x128xbf16, #tpu.memory_space<vmem>>, %arg7: memref<96x128xf32, #tpu.memory_space<vmem>>) attributes {dimension_semantics = [#tpu.dimension_semantics<parallel>, #tpu.dimension_semantics<parallel>, #tpu.dimension_semantics<arbitrary>], iteration_bounds = array<i64: 2, 1, 1>, scalar_prefetch = 0 : i64, scratch_operands = 1 : i64, tpu.core_type = #tpu.core_type<tc>, window_params = [{transform_indices = @transform_0, window_bounds = array<i64: 96, 1024>}, {transform_indices = @transform_1, window_bounds = array<i64: 1024, 128>}, {transform_indices = @transform_2, window_bounds = array<i64: 1, 128>}, {transform_indices = @transform_3, window_bounds = array<i64: 96, 128>}]} {
    %c0_i32 = arith.constant 0 : i32
    %0 = arith.cmpi eq, %arg2, %c0_i32 : i32
    %1 = arith.extui %0 : i1 to i32
    %c0_i32_0 = arith.constant 0 : i32
    %2 = arith.cmpi ne, %1, %c0_i32_0 : i32
    scf.if %2 {
      %cst_10 = arith.constant 0.000000e+00 : f32
      %12 = vector.broadcast %cst_10 : f32 to vector<96x128xf32>
      %c0_11 = arith.constant 0 : index
      %c0_12 = arith.constant 0 : index
      %13 = vector.load %arg7[%c0_11, %c0_12] : memref<96x128xf32, #tpu.memory_space<vmem>>, vector<96x128xf32>
      tpu.vector_store %arg7[%c0_11, %c0_12], %12 {strides = array<i32>} : memref<96x128xf32, #tpu.memory_space<vmem>>, vector<96x128xf32>,
    } else {
    }
    %c0 = arith.constant 0 : index
    %c0_1 = arith.constant 0 : index
    %3 = vector.load %arg7[%c0, %c0_1] : memref<96x128xf32, #tpu.memory_space<vmem>>, vector<96x128xf32>
    %c0_2 = arith.constant 0 : index
    %c0_3 = arith.constant 0 : index
    %4 = vector.load %arg3[%c0_2, %c0_3] : memref<96x1024xbf16, #tpu.memory_space<vmem>>, vector<96x1024xbf16>
    %c0_4 = arith.constant 0 : index
    %c0_5 = arith.constant 0 : index
    %5 = vector.load %arg4[%c0_4, %c0_5] : memref<1024x128xbf16, #tpu.memory_space<vmem>>, vector<1024x128xbf16>
    %cst = arith.constant dense<0.000000e+00> : vector<96x128xf32>
    %6 = tpu.matmul %4, %5, %cst {dimension_numbers = #tpu.dot_dimension_numbers<[1], [0], [0], [1], [0, 0, 1, 1], [], []>} : vector<96x1024xbf16>, vector<1024x128xbf16>, vector<96x128xf32> -> vector<96x128xf32>
    %7 = arith.addf %3, %6 : vector<96x128xf32>
    %c0_6 = arith.constant 0 : index
    %c0_7 = arith.constant 0 : index
    %8 = vector.load %arg7[%c0_6, %c0_7] : memref<96x128xf32, #tpu.memory_space<vmem>>, vector<96x128xf32>
    tpu.vector_store %arg7[%c0_6, %c0_7], %7 {strides = array<i32>} : memref<96x128xf32, #tpu.memory_space<vmem>>, vector<96x128xf32>,
    %c0_i32_8 = arith.constant 0 : i32
    %9 = arith.cmpi eq, %arg2, %c0_i32_8 : i32
    %10 = arith.extui %9 : i1 to i32
    %c0_i32_9 = arith.constant 0 : i32
    %11 = arith.cmpi ne, %10, %c0_i32_9 : i32
    scf.if %11 {
      %c0_10 = arith.constant 0 : index
      %c0_11 = arith.constant 0 : index
      %12 = vector.load %arg7[%c0_10, %c0_11] : memref<96x128xf32, #tpu.memory_space<vmem>>, vector<96x128xf32>
      %c0_12 = arith.constant 0 : index
      %c0_13 = arith.constant 0 : index
      %13 = vector.load %arg5[%c0_12, %c0_13] : memref<1x128xf32, #tpu.memory_space<vmem>>, vector<1x128xf32>
      %14 = vector.broadcast %13 : vector<1x128xf32> to vector<96x128xf32>
      %15 = arith.addf %12, %14 : vector<96x128xf32>
      %cst_14 = arith.constant 0.000000e+00 : f32
      %16 = vector.broadcast %cst_14 : f32 to vector<96x128xf32>
      %17 = arith.maximumf %15, %16 : vector<96x128xf32>
      %18 = arith.truncf %17 : vector<96x128xf32> to vector<96x128xbf16>
      %c0_15 = arith.constant 0 : index
      %c0_16 = arith.constant 0 : index
      %19 = vector.load %arg6[%c0_15, %c0_16] : memref<96x128xbf16, #tpu.memory_space<vmem>>, vector<96x128xbf16>
      tpu.vector_store %arg6[%c0_15, %c0_16], %18 {strides = array<i32>} : memref<96x128xbf16, #tpu.memory_space<vmem>>, vector<96x128xbf16>,
    } else {
    }
    return
  }
  func.func @transform_0(%arg0: i32, %arg1: i32, %arg2: i32) -> (i32, i32) {
    %c0_i32 = arith.constant 0 : i32
    return %arg0, %arg2 : i32, i32
  }
  func.func @transform_1(%arg0: i32, %arg1: i32, %arg2: i32) -> (i32, i32) {
    %c0_i32 = arith.constant 0 : i32
    return %arg2, %arg1 : i32, i32
  }
  func.func @transform_2(%arg0: i32, %arg1: i32, %arg2: i32) -> (i32, i32) {
    %c0_i32 = arith.constant 0 : i32
    %c0_i32_0 = arith.constant 0 : i32
    return %c0_i32, %arg1 : i32, i32
  }
  func.func @transform_3(%arg0: i32, %arg1: i32, %arg2: i32) -> (i32, i32) {
    %c0_i32 = arith.constant 0 : i32
    return %arg0, %arg1 : i32, i32
  }
}

module attributes {stable_mosaic.version = 11 : i64} {
  func.func @_fused_matmul_kernel(%arg0: i32, %arg1: i32, %arg2: i32, %arg3: memref<64x384xbf16, #tpu.memory_space<vmem>>, %arg4: memref<384x128xbf16, #tpu.memory_space<vmem>>, %arg5: memref<1x128xf32, #tpu.memory_space<vmem>>, %arg6: memref<64x128xbf16, #tpu.memory_space<vmem>>, %arg7: memref<64x128xf32, #tpu.memory_space<vmem>>) attributes {dimension_semantics = [#tpu.dimension_semantics<parallel>, #tpu.dimension_semantics<parallel>, #tpu.dimension_semantics<arbitrary>], iteration_bounds = array<i64: 2, 1, 3>, scalar_prefetch = 0 : i64, scratch_operands = 1 : i64, tpu.core_type = #tpu.core_type<tc>, window_params = [{transform_indices = @transform_0, window_bounds = array<i64: 64, 384>}, {transform_indices = @transform_1, window_bounds = array<i64: 384, 128>}, {transform_indices = @transform_2, window_bounds = array<i64: 1, 128>}, {transform_indices = @transform_3, window_bounds = array<i64: 64, 128>}]} {
    %c0_i32 = arith.constant 0 : i32
    %0 = arith.cmpi eq, %arg2, %c0_i32 : i32
    %1 = arith.extui %0 : i1 to i32
    %c0_i32_0 = arith.constant 0 : i32
    %2 = arith.cmpi ne, %1, %c0_i32_0 : i32
    scf.if %2 {
      %cst_9 = arith.constant 0.000000e+00 : f32
      %12 = vector.broadcast %cst_9 : f32 to vector<64x128xf32>
      %c0_10 = arith.constant 0 : index
      %c0_11 = arith.constant 0 : index
      %13 = vector.load %arg7[%c0_10, %c0_11] : memref<64x128xf32, #tpu.memory_space<vmem>>, vector<64x128xf32>
      tpu.vector_store %arg7[%c0_10, %c0_11], %12 {strides = array<i32>} : memref<64x128xf32, #tpu.memory_space<vmem>>, vector<64x128xf32>,
    } else {
    }
    %c0 = arith.constant 0 : index
    %c0_1 = arith.constant 0 : index
    %3 = vector.load %arg7[%c0, %c0_1] : memref<64x128xf32, #tpu.memory_space<vmem>>, vector<64x128xf32>
    %c0_2 = arith.constant 0 : index
    %c0_3 = arith.constant 0 : index
    %4 = vector.load %arg3[%c0_2, %c0_3] : memref<64x384xbf16, #tpu.memory_space<vmem>>, vector<64x384xbf16>
    %c0_4 = arith.constant 0 : index
    %c0_5 = arith.constant 0 : index
    %5 = vector.load %arg4[%c0_4, %c0_5] : memref<384x128xbf16, #tpu.memory_space<vmem>>, vector<384x128xbf16>
    %cst = arith.constant dense<0.000000e+00> : vector<64x128xf32>
    %6 = tpu.matmul %4, %5, %cst {dimension_numbers = #tpu.dot_dimension_numbers<[1], [0], [0], [1], [0, 0, 1, 1], [], []>} : vector<64x384xbf16>, vector<384x128xbf16>, vector<64x128xf32> -> vector<64x128xf32>
    %7 = arith.addf %3, %6 : vector<64x128xf32>
    %c0_6 = arith.constant 0 : index
    %c0_7 = arith.constant 0 : index
    %8 = vector.load %arg7[%c0_6, %c0_7] : memref<64x128xf32, #tpu.memory_space<vmem>>, vector<64x128xf32>
    tpu.vector_store %arg7[%c0_6, %c0_7], %7 {strides = array<i32>} : memref<64x128xf32, #tpu.memory_space<vmem>>, vector<64x128xf32>,
    %c2_i32 = arith.constant 2 : i32
    %9 = arith.cmpi eq, %arg2, %c2_i32 : i32
    %10 = arith.extui %9 : i1 to i32
    %c0_i32_8 = arith.constant 0 : i32
    %11 = arith.cmpi ne, %10, %c0_i32_8 : i32
    scf.if %11 {
      %c0_9 = arith.constant 0 : index
      %c0_10 = arith.constant 0 : index
      %12 = vector.load %arg7[%c0_9, %c0_10] : memref<64x128xf32, #tpu.memory_space<vmem>>, vector<64x128xf32>
      %c0_11 = arith.constant 0 : index
      %c0_12 = arith.constant 0 : index
      %13 = vector.load %arg5[%c0_11, %c0_12] : memref<1x128xf32, #tpu.memory_space<vmem>>, vector<1x128xf32>
      %14 = vector.broadcast %13 : vector<1x128xf32> to vector<64x128xf32>
      %15 = arith.addf %12, %14 : vector<64x128xf32>
      %cst_13 = arith.constant 0.000000e+00 : f32
      %16 = vector.broadcast %cst_13 : f32 to vector<64x128xf32>
      %17 = arith.maximumf %15, %16 : vector<64x128xf32>
      %18 = arith.truncf %17 : vector<64x128xf32> to vector<64x128xbf16>
      %c0_14 = arith.constant 0 : index
      %c0_15 = arith.constant 0 : index
      %19 = vector.load %arg6[%c0_14, %c0_15] : memref<64x128xbf16, #tpu.memory_space<vmem>>, vector<64x128xbf16>
      tpu.vector_store %arg6[%c0_14, %c0_15], %18 {strides = array<i32>} : memref<64x128xbf16, #tpu.memory_space<vmem>>, vector<64x128xbf16>,
    } else {
    }
    return
  }
  func.func @transform_0(%arg0: i32, %arg1: i32, %arg2: i32) -> (i32, i32) {
    %c0_i32 = arith.constant 0 : i32
    return %arg0, %arg2 : i32, i32
  }
  func.func @transform_1(%arg0: i32, %arg1: i32, %arg2: i32) -> (i32, i32) {
    %c0_i32 = arith.constant 0 : i32
    return %arg2, %arg1 : i32, i32
  }
  func.func @transform_2(%arg0: i32, %arg1: i32, %arg2: i32) -> (i32, i32) {
    %c0_i32 = arith.constant 0 : i32
    %c0_i32_0 = arith.constant 0 : i32
    return %c0_i32, %arg1 : i32, i32
  }
  func.func @transform_3(%arg0: i32, %arg1: i32, %arg2: i32) -> (i32, i32) {
    %c0_i32 = arith.constant 0 : i32
    return %arg0, %arg1 : i32, i32
  }
}

module attributes {stable_mosaic.version = 11 : i64} {
  func.func @_fused_matmul_kernel(%arg0: i32, %arg1: i32, %arg2: i32, %arg3: memref<16x896xbf16, #tpu.memory_space<vmem>>, %arg4: memref<896x512xbf16, #tpu.memory_space<vmem>>, %arg5: memref<1x512xf32, #tpu.memory_space<vmem>>, %arg6: memref<16x512xbf16, #tpu.memory_space<vmem>>, %arg7: memref<16x512xf32, #tpu.memory_space<vmem>>) attributes {dimension_semantics = [#tpu.dimension_semantics<parallel>, #tpu.dimension_semantics<parallel>, #tpu.dimension_semantics<arbitrary>], iteration_bounds = array<i64: 1, 2, 7>, scalar_prefetch = 0 : i64, scratch_operands = 1 : i64, tpu.core_type = #tpu.core_type<tc>, window_params = [{transform_indices = @transform_0, window_bounds = array<i64: 16, 896>}, {transform_indices = @transform_1, window_bounds = array<i64: 896, 512>}, {transform_indices = @transform_2, window_bounds = array<i64: 1, 512>}, {transform_indices = @transform_3, window_bounds = array<i64: 16, 512>}]} {
    %c0_i32 = arith.constant 0 : i32
    %0 = arith.cmpi eq, %arg2, %c0_i32 : i32
    %1 = arith.extui %0 : i1 to i32
    %c0_i32_0 = arith.constant 0 : i32
    %2 = arith.cmpi ne, %1, %c0_i32_0 : i32
    scf.if %2 {
      %cst_9 = arith.constant 0.000000e+00 : f32
      %12 = vector.broadcast %cst_9 : f32 to vector<16x512xf32>
      %c0_10 = arith.constant 0 : index
      %c0_11 = arith.constant 0 : index
      %13 = vector.load %arg7[%c0_10, %c0_11] : memref<16x512xf32, #tpu.memory_space<vmem>>, vector<16x512xf32>
      tpu.vector_store %arg7[%c0_10, %c0_11], %12 {strides = array<i32>} : memref<16x512xf32, #tpu.memory_space<vmem>>, vector<16x512xf32>,
    } else {
    }
    %c0 = arith.constant 0 : index
    %c0_1 = arith.constant 0 : index
    %3 = vector.load %arg7[%c0, %c0_1] : memref<16x512xf32, #tpu.memory_space<vmem>>, vector<16x512xf32>
    %c0_2 = arith.constant 0 : index
    %c0_3 = arith.constant 0 : index
    %4 = vector.load %arg3[%c0_2, %c0_3] : memref<16x896xbf16, #tpu.memory_space<vmem>>, vector<16x896xbf16>
    %c0_4 = arith.constant 0 : index
    %c0_5 = arith.constant 0 : index
    %5 = vector.load %arg4[%c0_4, %c0_5] : memref<896x512xbf16, #tpu.memory_space<vmem>>, vector<896x512xbf16>
    %cst = arith.constant dense<0.000000e+00> : vector<16x512xf32>
    %6 = tpu.matmul %4, %5, %cst {dimension_numbers = #tpu.dot_dimension_numbers<[1], [0], [0], [1], [0, 0, 1, 1], [], []>} : vector<16x896xbf16>, vector<896x512xbf16>, vector<16x512xf32> -> vector<16x512xf32>
    %7 = arith.addf %3, %6 : vector<16x512xf32>
    %c0_6 = arith.constant 0 : index
    %c0_7 = arith.constant 0 : index
    %8 = vector.load %arg7[%c0_6, %c0_7] : memref<16x512xf32, #tpu.memory_space<vmem>>, vector<16x512xf32>
    tpu.vector_store %arg7[%c0_6, %c0_7], %7 {strides = array<i32>} : memref<16x512xf32, #tpu.memory_space<vmem>>, vector<16x512xf32>,
    %c6_i32 = arith.constant 6 : i32
    %9 = arith.cmpi eq, %arg2, %c6_i32 : i32
    %10 = arith.extui %9 : i1 to i32
    %c0_i32_8 = arith.constant 0 : i32
    %11 = arith.cmpi ne, %10, %c0_i32_8 : i32
    scf.if %11 {
      %c0_9 = arith.constant 0 : index
      %c0_10 = arith.constant 0 : index
      %12 = vector.load %arg7[%c0_9, %c0_10] : memref<16x512xf32, #tpu.memory_space<vmem>>, vector<16x512xf32>
      %c0_11 = arith.constant 0 : index
      %c0_12 = arith.constant 0 : index
      %13 = vector.load %arg5[%c0_11, %c0_12] : memref<1x512xf32, #tpu.memory_space<vmem>>, vector<1x512xf32>
      %14 = vector.broadcast %13 : vector<1x512xf32> to vector<16x512xf32>
      %15 = arith.addf %12, %14 : vector<16x512xf32>
      %cst_13 = arith.constant 0.000000e+00 : f32
      %16 = vector.broadcast %cst_13 : f32 to vector<16x512xf32>
      %17 = arith.maximumf %15, %16 : vector<16x512xf32>
      %18 = arith.truncf %17 : vector<16x512xf32> to vector<16x512xbf16>
      %c0_14 = arith.constant 0 : index
      %c0_15 = arith.constant 0 : index
      %19 = vector.load %arg6[%c0_14, %c0_15] : memref<16x512xbf16, #tpu.memory_space<vmem>>, vector<16x512xbf16>
      tpu.vector_store %arg6[%c0_14, %c0_15], %18 {strides = array<i32>} : memref<16x512xbf16, #tpu.memory_space<vmem>>, vector<16x512xbf16>,
    } else {
    }
    return
  }
  func.func @transform_0(%arg0: i32, %arg1: i32, %arg2: i32) -> (i32, i32) {
    %c0_i32 = arith.constant 0 : i32
    return %arg0, %arg2 : i32, i32
  }
  func.func @transform_1(%arg0: i32, %arg1: i32, %arg2: i32) -> (i32, i32) {
    %c0_i32 = arith.constant 0 : i32
    return %arg2, %arg1 : i32, i32
  }
  func.func @transform_2(%arg0: i32, %arg1: i32, %arg2: i32) -> (i32, i32) {
    %c0_i32 = arith.constant 0 : i32
    %c0_i32_0 = arith.constant 0 : i32
    return %c0_i32, %arg1 : i32, i32
  }
  func.func @transform_3(%arg0: i32, %arg1: i32, %arg2: i32) -> (i32, i32) {
    %c0_i32 = arith.constant 0 : i32
    return %arg0, %arg1 : i32, i32
  }
}

module attributes {stable_mosaic.version = 11 : i64} {
  func.func @_fused_matmul_kernel(%arg0: i32, %arg1: i32, %arg2: i32, %arg3: memref<16x1024xbf16, #tpu.memory_space<vmem>>, %arg4: memref<1024x256xbf16, #tpu.memory_space<vmem>>, %arg5: memref<1x256xf32, #tpu.memory_space<vmem>>, %arg6: memref<16x256xbf16, #tpu.memory_space<vmem>>, %arg7: memref<16x256xf32, #tpu.memory_space<vmem>>) attributes {dimension_semantics = [#tpu.dimension_semantics<parallel>, #tpu.dimension_semantics<parallel>, #tpu.dimension_semantics<arbitrary>], iteration_bounds = array<i64: 1, 2, 1>, scalar_prefetch = 0 : i64, scratch_operands = 1 : i64, tpu.core_type = #tpu.core_type<tc>, window_params = [{transform_indices = @transform_0, window_bounds = array<i64: 16, 1024>}, {transform_indices = @transform_1, window_bounds = array<i64: 1024, 256>}, {transform_indices = @transform_2, window_bounds = array<i64: 1, 256>}, {transform_indices = @transform_3, window_bounds = array<i64: 16, 256>}]} {
    %c0_i32 = arith.constant 0 : i32
    %0 = arith.cmpi eq, %arg2, %c0_i32 : i32
    %1 = arith.extui %0 : i1 to i32
    %c0_i32_0 = arith.constant 0 : i32
    %2 = arith.cmpi ne, %1, %c0_i32_0 : i32
    scf.if %2 {
      %cst_10 = arith.constant 0.000000e+00 : f32
      %12 = vector.broadcast %cst_10 : f32 to vector<16x256xf32>
      %c0_11 = arith.constant 0 : index
      %c0_12 = arith.constant 0 : index
      %13 = vector.load %arg7[%c0_11, %c0_12] : memref<16x256xf32, #tpu.memory_space<vmem>>, vector<16x256xf32>
      tpu.vector_store %arg7[%c0_11, %c0_12], %12 {strides = array<i32>} : memref<16x256xf32, #tpu.memory_space<vmem>>, vector<16x256xf32>,
    } else {
    }
    %c0 = arith.constant 0 : index
    %c0_1 = arith.constant 0 : index
    %3 = vector.load %arg7[%c0, %c0_1] : memref<16x256xf32, #tpu.memory_space<vmem>>, vector<16x256xf32>
    %c0_2 = arith.constant 0 : index
    %c0_3 = arith.constant 0 : index
    %4 = vector.load %arg3[%c0_2, %c0_3] : memref<16x1024xbf16, #tpu.memory_space<vmem>>, vector<16x1024xbf16>
    %c0_4 = arith.constant 0 : index
    %c0_5 = arith.constant 0 : index
    %5 = vector.load %arg4[%c0_4, %c0_5] : memref<1024x256xbf16, #tpu.memory_space<vmem>>, vector<1024x256xbf16>
    %cst = arith.constant dense<0.000000e+00> : vector<16x256xf32>
    %6 = tpu.matmul %4, %5, %cst {dimension_numbers = #tpu.dot_dimension_numbers<[1], [0], [0], [1], [0, 0, 1, 1], [], []>} : vector<16x1024xbf16>, vector<1024x256xbf16>, vector<16x256xf32> -> vector<16x256xf32>
    %7 = arith.addf %3, %6 : vector<16x256xf32>
    %c0_6 = arith.constant 0 : index
    %c0_7 = arith.constant 0 : index
    %8 = vector.load %arg7[%c0_6, %c0_7] : memref<16x256xf32, #tpu.memory_space<vmem>>, vector<16x256xf32>
    tpu.vector_store %arg7[%c0_6, %c0_7], %7 {strides = array<i32>} : memref<16x256xf32, #tpu.memory_space<vmem>>, vector<16x256xf32>,
    %c0_i32_8 = arith.constant 0 : i32
    %9 = arith.cmpi eq, %arg2, %c0_i32_8 : i32
    %10 = arith.extui %9 : i1 to i32
    %c0_i32_9 = arith.constant 0 : i32
    %11 = arith.cmpi ne, %10, %c0_i32_9 : i32
    scf.if %11 {
      %c0_10 = arith.constant 0 : index
      %c0_11 = arith.constant 0 : index
      %12 = vector.load %arg7[%c0_10, %c0_11] : memref<16x256xf32, #tpu.memory_space<vmem>>, vector<16x256xf32>
      %c0_12 = arith.constant 0 : index
      %c0_13 = arith.constant 0 : index
      %13 = vector.load %arg5[%c0_12, %c0_13] : memref<1x256xf32, #tpu.memory_space<vmem>>, vector<1x256xf32>
      %14 = vector.broadcast %13 : vector<1x256xf32> to vector<16x256xf32>
      %15 = arith.addf %12, %14 : vector<16x256xf32>
      %cst_14 = arith.constant 0.000000e+00 : f32
      %16 = vector.broadcast %cst_14 : f32 to vector<16x256xf32>
      %17 = arith.maximumf %15, %16 : vector<16x256xf32>
      %18 = arith.truncf %17 : vector<16x256xf32> to vector<16x256xbf16>
      %c0_15 = arith.constant 0 : index
      %c0_16 = arith.constant 0 : index
      %19 = vector.load %arg6[%c0_15, %c0_16] : memref<16x256xbf16, #tpu.memory_space<vmem>>, vector<16x256xbf16>
      tpu.vector_store %arg6[%c0_15, %c0_16], %18 {strides = array<i32>} : memref<16x256xbf16, #tpu.memory_space<vmem>>, vector<16x256xbf16>,
    } else {
    }
    return
  }
  func.func @transform_0(%arg0: i32, %arg1: i32, %arg2: i32) -> (i32, i32) {
    %c0_i32 = arith.constant 0 : i32
    return %arg0, %arg2 : i32, i32
  }
  func.func @transform_1(%arg0: i32, %arg1: i32, %arg2: i32) -> (i32, i32) {
    %c0_i32 = arith.constant 0 : i32
    return %arg2, %arg1 : i32, i32
  }
  func.func @transform_2(%arg0: i32, %arg1: i32, %arg2: i32) -> (i32, i32) {
    %c0_i32 = arith.constant 0 : i32
    %c0_i32_0 = arith.constant 0 : i32
    return %c0_i32, %arg1 : i32, i32
  }
  func.func @transform_3(%arg0: i32, %arg1: i32, %arg2: i32) -> (i32, i32) {
    %c0_i32 = arith.constant 0 : i32
    return %arg0, %arg1 : i32, i32
  }
}

module attributes {stable_mosaic.version = 11 : i64} {
  func.func @_fused_matmul_kernel(%arg0: i32, %arg1: i32, %arg2: i32, %arg3: memref<16x512xbf16, #tpu.memory_space<vmem>>, %arg4: memref<512x128xbf16, #tpu.memory_space<vmem>>, %arg5: memref<1x128xf32, #tpu.memory_space<vmem>>, %arg6: memref<16x128xf32, #tpu.memory_space<vmem>>, %arg7: memref<16x128xf32, #tpu.memory_space<vmem>>) attributes {dimension_semantics = [#tpu.dimension_semantics<parallel>, #tpu.dimension_semantics<parallel>, #tpu.dimension_semantics<arbitrary>], iteration_bounds = array<i64: 1, 1, 1>, scalar_prefetch = 0 : i64, scratch_operands = 1 : i64, tpu.core_type = #tpu.core_type<tc>, window_params = [{transform_indices = @transform_0, window_bounds = array<i64: 16, 512>}, {transform_indices = @transform_1, window_bounds = array<i64: 512, 128>}, {transform_indices = @transform_2, window_bounds = array<i64: 1, 128>}, {transform_indices = @transform_3, window_bounds = array<i64: 16, 128>}]} {
    %c0_i32 = arith.constant 0 : i32
    %0 = arith.cmpi eq, %arg2, %c0_i32 : i32
    %1 = arith.extui %0 : i1 to i32
    %c0_i32_0 = arith.constant 0 : i32
    %2 = arith.cmpi ne, %1, %c0_i32_0 : i32
    scf.if %2 {
      %cst_10 = arith.constant 0.000000e+00 : f32
      %12 = vector.broadcast %cst_10 : f32 to vector<16x128xf32>
      %c0_11 = arith.constant 0 : index
      %c0_12 = arith.constant 0 : index
      %13 = vector.load %arg7[%c0_11, %c0_12] : memref<16x128xf32, #tpu.memory_space<vmem>>, vector<16x128xf32>
      tpu.vector_store %arg7[%c0_11, %c0_12], %12 {strides = array<i32>} : memref<16x128xf32, #tpu.memory_space<vmem>>, vector<16x128xf32>,
    } else {
    }
    %c0 = arith.constant 0 : index
    %c0_1 = arith.constant 0 : index
    %3 = vector.load %arg7[%c0, %c0_1] : memref<16x128xf32, #tpu.memory_space<vmem>>, vector<16x128xf32>
    %c0_2 = arith.constant 0 : index
    %c0_3 = arith.constant 0 : index
    %4 = vector.load %arg3[%c0_2, %c0_3] : memref<16x512xbf16, #tpu.memory_space<vmem>>, vector<16x512xbf16>
    %c0_4 = arith.constant 0 : index
    %c0_5 = arith.constant 0 : index
    %5 = vector.load %arg4[%c0_4, %c0_5] : memref<512x128xbf16, #tpu.memory_space<vmem>>, vector<512x128xbf16>
    %cst = arith.constant dense<0.000000e+00> : vector<16x128xf32>
    %6 = tpu.matmul %4, %5, %cst {dimension_numbers = #tpu.dot_dimension_numbers<[1], [0], [0], [1], [0, 0, 1, 1], [], []>} : vector<16x512xbf16>, vector<512x128xbf16>, vector<16x128xf32> -> vector<16x128xf32>
    %7 = arith.addf %3, %6 : vector<16x128xf32>
    %c0_6 = arith.constant 0 : index
    %c0_7 = arith.constant 0 : index
    %8 = vector.load %arg7[%c0_6, %c0_7] : memref<16x128xf32, #tpu.memory_space<vmem>>, vector<16x128xf32>
    tpu.vector_store %arg7[%c0_6, %c0_7], %7 {strides = array<i32>} : memref<16x128xf32, #tpu.memory_space<vmem>>, vector<16x128xf32>,
    %c0_i32_8 = arith.constant 0 : i32
    %9 = arith.cmpi eq, %arg2, %c0_i32_8 : i32
    %10 = arith.extui %9 : i1 to i32
    %c0_i32_9 = arith.constant 0 : i32
    %11 = arith.cmpi ne, %10, %c0_i32_9 : i32
    scf.if %11 {
      %c0_10 = arith.constant 0 : index
      %c0_11 = arith.constant 0 : index
      %12 = vector.load %arg7[%c0_10, %c0_11] : memref<16x128xf32, #tpu.memory_space<vmem>>, vector<16x128xf32>
      %c0_12 = arith.constant 0 : index
      %c0_13 = arith.constant 0 : index
      %13 = vector.load %arg5[%c0_12, %c0_13] : memref<1x128xf32, #tpu.memory_space<vmem>>, vector<1x128xf32>
      %14 = vector.broadcast %13 : vector<1x128xf32> to vector<16x128xf32>
      %15 = arith.addf %12, %14 : vector<16x128xf32>
      %c0_14 = arith.constant 0 : index
      %c0_15 = arith.constant 0 : index
      %16 = vector.load %arg6[%c0_14, %c0_15] : memref<16x128xf32, #tpu.memory_space<vmem>>, vector<16x128xf32>
      tpu.vector_store %arg6[%c0_14, %c0_15], %15 {strides = array<i32>} : memref<16x128xf32, #tpu.memory_space<vmem>>, vector<16x128xf32>,
    } else {
    }
    return
  }
  func.func @transform_0(%arg0: i32, %arg1: i32, %arg2: i32) -> (i32, i32) {
    %c0_i32 = arith.constant 0 : i32
    return %arg0, %arg2 : i32, i32
  }
  func.func @transform_1(%arg0: i32, %arg1: i32, %arg2: i32) -> (i32, i32) {
    %c0_i32 = arith.constant 0 : i32
    return %arg2, %arg1 : i32, i32
  }
  func.func @transform_2(%arg0: i32, %arg1: i32, %arg2: i32) -> (i32, i32) {
    %c0_i32 = arith.constant 0 : i32
    %c0_i32_0 = arith.constant 0 : i32
    return %c0_i32, %arg1 : i32, i32
  }
  func.func @transform_3(%arg0: i32, %arg1: i32, %arg2: i32) -> (i32, i32) {
    %c0_i32 = arith.constant 0 : i32
    return %arg0, %arg1 : i32, i32
  }
}

</mosaic_0001>

<bundles_post_ra>
// kernel: forward.6
= control target key start
LH: loop header
LB: loop body
LE: loop exit
PB: predicated region body
PF: predicated region fallthrough
CT: control target
= control target key end

     0   :  { %s2179_s12 = smov 0   ;;  %s2181_s13 = smov 0   ;;  %s2430_s0 = inlined_call_operand.vmem [shape: bf16[800,256], index: 0, kind: input, shape index: {}]   ;;  %s2431_s1 = inlined_call_operand.vmem [shape: bf16[256,128], index: 1, kind: input, shape index: {}]   ;;  %s2432_s2 = inlined_call_operand.vmem [shape: f32[1,128], index: 2, kind: input, shape index: {}]   ;;  %s2433_s3 = inlined_call_operand.vmem [shape: bf16[800,128], index: 3, kind: output, shape index: {}]  }
   0x1   :  { %s2183_s14 = smov 0  }
   0x2 LB: > { %s32_s15 = sadd.s32 1, %s2152_s13  ;;  %p1663_p0 = scmp.ge.s32.totalorder %s2156_s14, 1  ;;  %s2156_s14 = sphi %s2183_s14, %s13_s14   ;;  %s2152_s13 = sphi %s2181_s13, %s2435_s13   ;;  %s2148_s12 = sphi %s2179_s12, %s2434_s12  }
   0x3   : > { %p34_p1 = scmp.ge.s32.totalorder %s32_s15, 2  ;;  %p191_p2 = scmp.lt.s32.totalorder %s2156_s14, 3 }
   0x5   : > { %s2437_s15 = smov (%p34_p1, %s32_s15), 0  ;;  %p192_p3 = pnand %p1663_p0, %p191_p2 }
   0x6   : > { %s234_s18 = smul.u32 (!%p192_p3), 50, %s2148_s12 }
   0x7   : > { %195 = sbr.rel (%p192_p3) target bundleno = 377 (0x179), region = 32 }
   0x8   : > { %p236_p4 = scmp.lt.s32.totalorder (!%p192_p3), %s234_s18, 99 }
   0xc   : > { %v2043_v0 = vld [vmem:[%s2431_s1 + $0x38] sm:$0xff]   ;;  %v2158_v1 = vmov 0   ;;  %v2044_v2 = vld [vmem:[%s2431_s1 + $0x30] sm:$0xff]   ;;  %v2045_v3 = vld [vmem:[%s2431_s1 + $0x28] sm:$0xff]   ;;  %s2439_s18 = smov (!%p236_p4, %s234_s18), 99 }
   0xd   : > { %800 = vmatprep.subr.bf16.mxu0 %v2158_v1  ;;  %1986 = vmatprep.subr.bf16.mxu1 %v2158_v1  ;;  %v2046_v4 = vld [vmem:[%s2431_s1 + $0x20] sm:$0xff]   ;;  %s1786_s25 = sshll.u32 %s2439_s18, 3  ;;  %v2047_v5 = vld [vmem:[%s2431_s1 + $0x18] sm:$0xff]   ;;  %v2048_v7 = vld [vmem:[%s2431_s1 + $0x10] sm:$0xff]   ;;  %s1666_s6 = sshll.u32 %s2439_s18, 2 }
   0xe   : > { %801 = vmatpush1.bf16.msra.mxu0 %v2043_v0  ;;  %2002 = vmatpush1.bf16.msra.mxu1 %v2043_v0  ;;  %s2226_s30 = scalar_lea.vmem %s2430_s0, %s1786_s25  ;;  %v2049_v9 = vld [vmem:[%s2431_s1 + $0x8] sm:$0xff]   ;;  %v2050_v10 = vld [vmem:[%s2431_s1] sm:$0xff]   ;;  %v2051_v11 = vld [vmem:[%s2431_s1 + $0x78] sm:$0xff]   ;;  %s2348_s8 = scalar_lea.vmem %s2433_s3, %s1666_s6 }
   0xf   : > { %802 = vmatprep.subr.bf16.mxu0 %v2158_v1  ;;  %1987 = vmatprep.subr.bf16.mxu1 %v2158_v1  ;;  %v2061_v6 = vld [vmem:[%s2226_s30 + $0x4] ss:$8 sps:$4 sm:$0xff]   ;;  %v2064_v8 = vld [vmem:[%s2226_s30 + $0xd4] ss:$8 sps:$4 sm:$0xff]   ;;  %v2059_v19 = vld [vmem:[%s2226_s30] ss:$8 sps:$4 sm:$0xff]  }
  0x10   : > { %832 = vmatprep.mubr.bf16.mxu0 %v2061_v6  ;;  %936 = vmatprep.mubr.bf16.mxu1 %v2064_v8  ;;  %v2052_v12 = vld [vmem:[%s2431_s1 + $0x70] sm:$0xff]   ;;  %v2053_v13 = vld [vmem:[%s2431_s1 + $0x68] sm:$0xff]   ;;  %v2054_v14 = vld [vmem:[%s2431_s1 + $0x60] sm:$0xff]  }
  0x11   : > { %v2055_v15 = vld [vmem:[%s2431_s1 + $0x58] sm:$0xff]   ;;  %v2056_v16 = vld [vmem:[%s2431_s1 + $0x50] sm:$0xff]   ;;  %v2057_v17 = vld [vmem:[%s2431_s1 + $0x48] sm:$0xff]  }
  0x12   : > { %803 = vmatpush1.bf16.msra.mxu0 %v2044_v2  ;;  %2003 = vmatpush1.bf16.msra.mxu1 %v2044_v2  ;;  %v2058_v18 = vld [vmem:[%s2431_s1 + $0x40] sm:$0xff]   ;;  %v2062_v20 = vld [vmem:[%s2226_s30 + $0xd0] ss:$8 sps:$4 sm:$0xff]   ;;  %v2065_v21 = vld [vmem:[%s2226_s30 + $0x14] ss:$8 sps:$4 sm:$0xff]  }
  0x13   : > { %804 = vmatprep.subr.bf16.mxu0 %v2158_v1  ;;  %1988 = vmatprep.subr.bf16.mxu1 %v2158_v1  ;;  %v2068_v22 = vld [vmem:[%s2226_s30 + $0xe4] ss:$8 sps:$4 sm:$0xff]   ;;  %v2067_v23 = vld [vmem:[%s2226_s30 + $0x10] ss:$8 sps:$4 sm:$0xff]   ;;  %v2070_v24 = vld [vmem:[%s2226_s30 + $0xe0] ss:$8 sps:$4 sm:$0xff]  }
  0x14   : > { %v2071_v25 = vld [vmem:[%s2226_s30 + $0x24] ss:$8 sps:$4 sm:$0xff]   ;;  %v2074_v26 = vld [vmem:[%s2226_s30 + $0xf4] ss:$8 sps:$4 sm:$0xff]   ;;  %v2073_v27 = vld [vmem:[%s2226_s30 + $0x20] ss:$8 sps:$4 sm:$0xff]  }
  0x15   : > { %v2076_v28 = vld [vmem:[%s2226_s30 + $0xf0] ss:$8 sps:$4 sm:$0xff]   ;;  %v2077_v29 = vld [vmem:[%s2226_s30 + $0x34] ss:$8 sps:$4 sm:$0xff]   ;;  %v2080_v30 = vld [vmem:[%s2226_s30 + $0x104] ss:$8 sps:$4 sm:$0xff]  }
  0x16   : > { %805 = vmatpush1.bf16.msra.mxu0 %v2045_v3  ;;  %2004 = vmatpush1.bf16.msra.mxu1 %v2045_v3  ;;  %v2079_v31 = vld [vmem:[%s2226_s30 + $0x30] ss:$8 sps:$4 sm:$0xff]   ;;  %v2082_v32 = vld [vmem:[%s2226_s30 + $0x100] ss:$8 sps:$4 sm:$0xff]   ;;  %v2083_v33 = vld [vmem:[%s2226_s30 + $0x44] ss:$8 sps:$4 sm:$0xff]  }
  0x17   : > { %806 = vmatprep.subr.bf16.mxu0 %v2158_v1  ;;  %1989 = vmatprep.subr.bf16.mxu1 %v2158_v1  ;;  %v2086_v34 = vld [vmem:[%s2226_s30 + $0x114] ss:$8 sps:$4 sm:$0xff]   ;;  %v2085_v35 = vld [vmem:[%s2226_s30 + $0x40] ss:$8 sps:$4 sm:$0xff]   ;;  %v2088_v36 = vld [vmem:[%s2226_s30 + $0x110] ss:$8 sps:$4 sm:$0xff]  }
  0x18   : > { %v2089_v37 = vld [vmem:[%s2226_s30 + $0x54] ss:$8 sps:$4 sm:$0xff]   ;;  %v2092_v38 = vld [vmem:[%s2226_s30 + $0x124] ss:$8 sps:$4 sm:$0xff]   ;;  %v2091_v39 = vld [vmem:[%s2226_s30 + $0x50] ss:$8 sps:$4 sm:$0xff]  }
  0x19   : > { %v2094_v40 = vld [vmem:[%s2226_s30 + $0x120] ss:$8 sps:$4 sm:$0xff]   ;;  %v2095_v41 = vld [vmem:[%s2226_s30 + $0x64] ss:$8 sps:$4 sm:$0xff]   ;;  %v2098_v42 = vld [vmem:[%s2226_s30 + $0x134] ss:$8 sps:$4 sm:$0xff]  }
  0x1a   : > { %807 = vmatpush1.bf16.msra.mxu0 %v2046_v4  ;;  %2005 = vmatpush1.bf16.msra.mxu1 %v2046_v4  ;;  %v2097_v43 = vld [vmem:[%s2226_s30 + $0x60] ss:$8 sps:$4 sm:$0xff]   ;;  %v2100_v44 = vld [vmem:[%s2226_s30 + $0x130] ss:$8 sps:$4 sm:$0xff]   ;;  %v2101_v45 = vld [vmem:[%s2226_s30 + $0x74] ss:$8 sps:$4 sm:$0xff]  }
  0x1b   : > { %808 = vmatprep.subr.bf16.mxu0 %v2158_v1  ;;  %1990 = vmatprep.subr.bf16.mxu1 %v2158_v1  ;;  %v2104_v46 = vld [vmem:[%s2226_s30 + $0x144] ss:$8 sps:$4 sm:$0xff]   ;;  %v2103_v47 = vld [vmem:[%s2226_s30 + $0x70] ss:$8 sps:$4 sm:$0xff]   ;;  %v2106_v48 = vld [vmem:[%s2226_s30 + $0x140] ss:$8 sps:$4 sm:$0xff]  }
  0x1c   : > { %v2107_v49 = vld [vmem:[%s2226_s30 + $0x84] ss:$8 sps:$4 sm:$0xff]   ;;  %v2110_v50 = vld [vmem:[%s2226_s30 + $0x154] ss:$8 sps:$4 sm:$0xff]   ;;  %v2109_v51 = vld [vmem:[%s2226_s30 + $0x80] ss:$8 sps:$4 sm:$0xff]  }
  0x1d   : > { %v2112_v52 = vld [vmem:[%s2226_s30 + $0x150] ss:$8 sps:$4 sm:$0xff]   ;;  %v2113_v53 = vld [vmem:[%s2226_s30 + $0x94] ss:$8 sps:$4 sm:$0xff]   ;;  %v2116_v54 = vld [vmem:[%s2226_s30 + $0x164] ss:$8 sps:$4 sm:$0xff]  }
  0x1e   : > { %809 = vmatpush1.bf16.msra.mxu0 %v2047_v5  ;;  %2006 = vmatpush1.bf16.msra.mxu1 %v2047_v5  ;;  %v2115_v55 = vld [vmem:[%s2226_s30 + $0x90] ss:$8 sps:$4 sm:$0xff]   ;;  %v2118_v56 = vld [vmem:[%s2226_s30 + $0x160] ss:$8 sps:$4 sm:$0xff]   ;;  %v2119_v57 = vld [vmem:[%s2226_s30 + $0xa4] ss:$8 sps:$4 sm:$0xff]  }
  0x1f   : > { %810 = vmatprep.subr.bf16.mxu0 %v2158_v1  ;;  %1991 = vmatprep.subr.bf16.mxu1 %v2158_v1  ;;  %v2122_v58 = vld [vmem:[%s2226_s30 + $0x174] ss:$8 sps:$4 sm:$0xff]   ;;  %v2121_v59 = vld [vmem:[%s2226_s30 + $0xa0] ss:$8 sps:$4 sm:$0xff]   ;;  %v2124_v60 = vld [vmem:[%s2226_s30 + $0x170] ss:$8 sps:$4 sm:$0xff]  }
  0x20   : > { %v2125_v61 = vld [vmem:[%s2226_s30 + $0xb4] ss:$8 sps:$4 sm:$0xff]   ;;  %v2128_v62 = vld [vmem:[%s2226_s30 + $0x184] ss:$8 sps:$4 sm:$0xff]   ;;  %v2127_v63 = vld [vmem:[%s2226_s30 + $0xb0] ss:$8 sps:$4 sm:$0xff]  }
  0x21   : > { %v2130_v0 = vld [vmem:[%s2226_s30 + $0x180] ss:$8 sps:$4 sm:$0xff]  }
  0x22   : > { %811 = vmatpush1.bf16.msra.mxu0 %v2048_v7  ;;  %2007 = vmatpush1.bf16.msra.mxu1 %v2048_v7  ;;  %v2133_v2 = vld [vmem:[%s2226_s30 + $0xc0] ss:$8 sps:$4 sm:$0xff]  }
  0x23   : > { %812 = vmatprep.subr.bf16.mxu0 %v2158_v1  ;;  %1992 = vmatprep.subr.bf16.mxu1 %v2158_v1  ;;  %v2338_v4 = vld [vmem:[%s2432_s2] ss:$0 sm:$0xff] }
  0x26   : > { %813 = vmatpush1.bf16.msra.mxu0 %v2049_v9  ;;  %2008 = vmatpush1.bf16.msra.mxu1 %v2049_v9 }
  0x27   : > { %814 = vmatprep.subr.bf16.mxu0 %v2158_v1  ;;  %1993 = vmatprep.subr.bf16.mxu1 %v2158_v1 }
  0x2a   : > { %815 = vmatpush1.bf16.msra.mxu0 %v2050_v10  ;;  %2009 = vmatpush1.bf16.msra.mxu1 %v2050_v10 }
  0x2b   : > { %816 = vmatprep.subr.bf16.mxu0 %v2158_v1  ;;  %1994 = vmatprep.subr.bf16.mxu1 %v2158_v1 }
  0x2e   : > { %817 = vmatpush2.bf16.msra.mxu0 %v2051_v11  ;;  %2010 = vmatpush2.bf16.msra.mxu1 %v2051_v11 }
  0x2f   : > { %818 = vmatprep.subr.bf16.mxu0 %v2158_v1  ;;  %1995 = vmatprep.subr.bf16.mxu1 %v2158_v1 }
  0x32   : > { %819 = vmatpush2.bf16.msra.mxu0 %v2052_v12  ;;  %2011 = vmatpush2.bf16.msra.mxu1 %v2052_v12 }
  0x33   : > { %820 = vmatprep.subr.bf16.mxu0 %v2158_v1  ;;  %1996 = vmatprep.subr.bf16.mxu1 %v2158_v1 }
  0x36   : > { %821 = vmatpush2.bf16.msra.mxu0 %v2053_v13  ;;  %2012 = vmatpush2.bf16.msra.mxu1 %v2053_v13 }
  0x37   : > { %822 = vmatprep.subr.bf16.mxu0 %v2158_v1  ;;  %1997 = vmatprep.subr.bf16.mxu1 %v2158_v1 }
  0x3a   : > { %823 = vmatpush2.bf16.msra.mxu0 %v2054_v14  ;;  %2013 = vmatpush2.bf16.msra.mxu1 %v2054_v14 }
  0x3b   : > { %824 = vmatprep.subr.bf16.mxu0 %v2158_v1  ;;  %1998 = vmatprep.subr.bf16.mxu1 %v2158_v1 }
  0x3e   : > { %825 = vmatpush2.bf16.msra.mxu0 %v2055_v15  ;;  %2014 = vmatpush2.bf16.msra.mxu1 %v2055_v15 }
  0x3f   : > { %826 = vmatprep.subr.bf16.mxu0 %v2158_v1  ;;  %1999 = vmatprep.subr.bf16.mxu1 %v2158_v1 }
  0x42   : > { %827 = vmatpush2.bf16.msra.mxu0 %v2056_v16  ;;  %2015 = vmatpush2.bf16.msra.mxu1 %v2056_v16 }
  0x43   : > { %828 = vmatprep.subr.bf16.mxu0 %v2158_v1  ;;  %2000 = vmatprep.subr.bf16.mxu1 %v2158_v1 }
  0x46   : > { %829 = vmatpush2.bf16.msra.mxu0 %v2057_v17  ;;  %2016 = vmatpush2.bf16.msra.mxu1 %v2057_v17 }
  0x47   : > { %830 = vmatprep.subr.bf16.mxu0 %v2158_v1  ;;  %2001 = vmatprep.subr.bf16.mxu1 %v2158_v1  ;;  %v2131_v1 = vld [vmem:[%s2226_s30 + $0xc4] ss:$8 sps:$4 sm:$0xff]  }
  0x4a   : > { %831 = vmatpush2.bf16.msra.mxu0 %v2058_v18  ;;  %2017 = vmatpush2.bf16.msra.mxu1 %v2058_v18 }
  0x4d   : > { %833 = vmatmul.mubr.bf16.vlgmr.msra.gmra.mxu0 %v2059_v19  ;;  %937 = vmatmul.mubr.bf16.vlgmr.msra.gmra.mxu1 %v2062_v20 }
  0x4e   : > { %840 = vmatprep.mubr.bf16.mxu0 %v2065_v21  ;;  %944 = vmatprep.mubr.bf16.mxu1 %v2068_v22 }
  0x55   : > { %841 = vmatmul.mubr.bf16.gmra.mxu0 %v2067_v23  ;;  %945 = vmatmul.mubr.bf16.gmra.mxu1 %v2070_v24 }
  0x56   : > { %848 = vmatprep.mubr.bf16.mxu0 %v2071_v25  ;;  %952 = vmatprep.mubr.bf16.mxu1 %v2074_v26 }
  0x5d   : > { %849 = vmatmul.mubr.bf16.gmra.mxu0 %v2073_v27  ;;  %953 = vmatmul.mubr.bf16.gmra.mxu1 %v2076_v28 }
  0x5e   : > { %856 = vmatprep.mubr.bf16.mxu0 %v2077_v29  ;;  %960 = vmatprep.mubr.bf16.mxu1 %v2080_v30 }
  0x65   : > { %857 = vmatmul.mubr.bf16.gmra.mxu0 %v2079_v31  ;;  %961 = vmatmul.mubr.bf16.gmra.mxu1 %v2082_v32 }
  0x66   : > { %864 = vmatprep.mubr.bf16.mxu0 %v2083_v33  ;;  %968 = vmatprep.mubr.bf16.mxu1 %v2086_v34 }
  0x6d   : > { %865 = vmatmul.mubr.bf16.gmra.mxu0 %v2085_v35  ;;  %969 = vmatmul.mubr.bf16.gmra.mxu1 %v2088_v36 }
  0x6e   : > { %872 = vmatprep.mubr.bf16.mxu0 %v2089_v37  ;;  %976 = vmatprep.mubr.bf16.mxu1 %v2092_v38 }
  0x75   : > { %873 = vmatmul.mubr.bf16.gmra.mxu0 %v2091_v39  ;;  %977 = vmatmul.mubr.bf16.gmra.mxu1 %v2094_v40 }
  0x76   : > { %880 = vmatprep.mubr.bf16.mxu0 %v2095_v41  ;;  %984 = vmatprep.mubr.bf16.mxu1 %v2098_v42 }
  0x7d   : > { %881 = vmatmul.mubr.bf16.gmra.mxu0 %v2097_v43  ;;  %985 = vmatmul.mubr.bf16.gmra.mxu1 %v2100_v44 }
  0x7e   : > { %888 = vmatprep.mubr.bf16.mxu0 %v2101_v45  ;;  %992 = vmatprep.mubr.bf16.mxu1 %v2104_v46 }
  0x85   : > { %889 = vmatmul.mubr.bf16.gmra.mxu0 %v2103_v47  ;;  %993 = vmatmul.mubr.bf16.gmra.mxu1 %v2106_v48 }
  0x86   : > { %896 = vmatprep.mubr.bf16.mxu0 %v2107_v49  ;;  %1000 = vmatprep.mubr.bf16.mxu1 %v2110_v50 }
  0x8d   : > { %897 = vmatmul.mubr.bf16.gmra.mxu0 %v2109_v51  ;;  %1001 = vmatmul.mubr.bf16.gmra.mxu1 %v2112_v52 }
  0x8e   : > { %904 = vmatprep.mubr.bf16.mxu0 %v2113_v53  ;;  %1008 = vmatprep.mubr.bf16.mxu1 %v2116_v54 }
  0x95   : > { %905 = vmatmul.mubr.bf16.gmra.mxu0 %v2115_v55  ;;  %1009 = vmatmul.mubr.bf16.gmra.mxu1 %v2118_v56 }
  0x96   : > { %912 = vmatprep.mubr.bf16.mxu0 %v2119_v57  ;;  %1016 = vmatprep.mubr.bf16.mxu1 %v2122_v58 }
  0x9d   : > { %913 = vmatmul.mubr.bf16.gmra.mxu0 %v2121_v59  ;;  %1017 = vmatmul.mubr.bf16.gmra.mxu1 %v2124_v60 }
  0x9e   : > { %920 = vmatprep.mubr.bf16.mxu0 %v2125_v61  ;;  %1024 = vmatprep.mubr.bf16.mxu1 %v2128_v62 }
  0xa5   : > { %921 = vmatmul.mubr.bf16.gmra.mxu0 %v2127_v63  ;;  %1025 = vmatmul.mubr.bf16.gmra.mxu1 %v2130_v0 }
  0xa6   : > { %928 = vmatprep.mubr.bf16.mxu0 %v2131_v1 }
  0xad   : > { %929 = vmatmul.mubr.bf16.gmra.mxu0 %v2133_v2 }
 0x10d   : > { %v834_v3 = vpop.f32.mrf.mxu0  ;;  %v938_v5 = vpop.f32.mrf.mxu1 }
 0x10e   : > { %v1219_v6 = vadd.f32 %v2338_v4, %v938_v5  ;;  %v1193_v9 = vadd.f32 %v2338_v4, %v834_v3 }
 0x10f   : > { %v836_v7 = vpop.f32.mrf.mxu0  ;;  %v940_v8 = vpop.f32.mrf.mxu1 }
 0x110   : > { %v1269_v12 = vmax.f32 %v1219_v6, 0.0  ;;  %v1243_v17 = vmax.f32 %v1193_v9, 0.0 }
 0x111   : > { %v837_v10 = vpop.f32.mrf.mxu0  ;;  %v941_v11 = vpop.f32.mrf.mxu1 }
 0x112   : > { %v1194_v13 = vadd.f32 %v2338_v4, %v837_v10  ;;  %v1220_v14 = vadd.f32 %v2338_v4, %v941_v11 }
 0x113   : > { %v839_v15 = vpop.f32.mrf.mxu0  ;;  %v943_v16 = vpop.f32.mrf.mxu1 }
 0x114   : > { %v1244_v18 = vmax.f32 %v1194_v13, 0.0  ;;  %v1270_v19 = vmax.f32 %v1220_v14, 0.0 }
 0x115   : > { %v842_v20 = vpop.f32.mrf.mxu0  ;;  %v946_v21 = vpop.f32.mrf.mxu1 }
 0x116   : > { %v1840_v22 = vpack.c.bf16 %v1244_v18, %v1243_v17  ;;  %v1905_v23 = vpack.c.bf16 %v1270_v19, %v1269_v12  ;;  %v1221_v24 = vadd.f32 %v2338_v4, %v946_v21  ;;  %v1195_v27 = vadd.f32 %v2338_v4, %v842_v20 }
 0x117   : > { %v844_v25 = vpop.f32.mrf.mxu0  ;;  %v948_v26 = vpop.f32.mrf.mxu1 }
 0x118   : > { %1841 = vst [vmem:[%s2348_s8] sm:$0xff] %v1840_v22   ;;  %1974 = vst [vmem:[%s2348_s8 + $0x68] sm:$0xff] %v1905_v23   ;;  %v1271_v30 = vmax.f32 %v1221_v24, 0.0  ;;  %v1245_v35 = vmax.f32 %v1195_v27, 0.0 }
 0x119   : > { %v845_v28 = vpop.f32.mrf.mxu0  ;;  %v949_v29 = vpop.f32.mrf.mxu1 }
 0x11a   : > { %v1196_v31 = vadd.f32 %v2338_v4, %v845_v28  ;;  %v1222_v32 = vadd.f32 %v2338_v4, %v949_v29 }
 0x11b   : > { %v847_v33 = vpop.f32.mrf.mxu0  ;;  %v951_v34 = vpop.f32.mrf.mxu1 }
 0x11c   : > { %v1246_v36 = vmax.f32 %v1196_v31, 0.0  ;;  %v1272_v37 = vmax.f32 %v1222_v32, 0.0 }
 0x11d   : > { %v850_v38 = vpop.f32.mrf.mxu0  ;;  %v954_v39 = vpop.f32.mrf.mxu1 }
 0x11e   : > { %v1845_v40 = vpack.c.bf16 %v1246_v36, %v1245_v35  ;;  %v1910_v41 = vpack.c.bf16 %v1272_v37, %v1271_v30  ;;  %v1223_v42 = vadd.f32 %v2338_v4, %v954_v39  ;;  %v1197_v45 = vadd.f32 %v2338_v4, %v850_v38 }
 0x11f   : > { %v852_v43 = vpop.f32.mrf.mxu0  ;;  %v956_v44 = vpop.f32.mrf.mxu1 }
 0x120   : > { %1962 = vst [vmem:[%s2348_s8 + $0x8] sm:$0xff] %v1845_v40   ;;  %1975 = vst [vmem:[%s2348_s8 + $0x70] sm:$0xff] %v1910_v41   ;;  %v1273_v48 = vmax.f32 %v1223_v42, 0.0  ;;  %v1247_v53 = vmax.f32 %v1197_v45, 0.0 }
 0x121   : > { %v853_v46 = vpop.f32.mrf.mxu0  ;;  %v957_v47 = vpop.f32.mrf.mxu1 }
 0x122   : > { %v1198_v49 = vadd.f32 %v2338_v4, %v853_v46  ;;  %v1224_v50 = vadd.f32 %v2338_v4, %v957_v47 }
 0x123   : > { %v855_v51 = vpop.f32.mrf.mxu0  ;;  %v959_v52 = vpop.f32.mrf.mxu1 }
 0x124   : > { %v1248_v54 = vmax.f32 %v1198_v49, 0.0  ;;  %v1274_v55 = vmax.f32 %v1224_v50, 0.0 }
 0x125   : > { %v858_v56 = vpop.f32.mrf.mxu0  ;;  %v962_v57 = vpop.f32.mrf.mxu1 }
 0x126   : > { %v1850_v58 = vpack.c.bf16 %v1248_v54, %v1247_v53  ;;  %v1915_v59 = vpack.c.bf16 %v1274_v55, %v1273_v48  ;;  %v1225_v60 = vadd.f32 %v2338_v4, %v962_v57  ;;  %v1199_v63 = vadd.f32 %v2338_v4, %v858_v56 }
 0x127   : > { %v860_v61 = vpop.f32.mrf.mxu0  ;;  %v964_v62 = vpop.f32.mrf.mxu1 }
 0x128   : > { %1963 = vst [vmem:[%s2348_s8 + $0x10] sm:$0xff] %v1850_v58   ;;  %1976 = vst [vmem:[%s2348_s8 + $0x78] sm:$0xff] %v1915_v59   ;;  %v1275_v2 = vmax.f32 %v1225_v60, 0.0  ;;  %v1249_v8 = vmax.f32 %v1199_v63, 0.0 }
 0x129   : > { %v861_v0 = vpop.f32.mrf.mxu0  ;;  %v965_v1 = vpop.f32.mrf.mxu1 }
 0x12a   : > { %v1200_v3 = vadd.f32 %v2338_v4, %v861_v0  ;;  %v1226_v5 = vadd.f32 %v2338_v4, %v965_v1 }
 0x12b   : > { %v863_v6 = vpop.f32.mrf.mxu0  ;;  %v967_v7 = vpop.f32.mrf.mxu1 }
 0x12c   : > { %v1250_v9 = vmax.f32 %v1200_v3, 0.0  ;;  %v1276_v10 = vmax.f32 %v1226_v5, 0.0 }
 0x12d   : > { %v866_v11 = vpop.f32.mrf.mxu0  ;;  %v970_v12 = vpop.f32.mrf.mxu1 }
 0x12e   : > { %v1855_v13 = vpack.c.bf16 %v1250_v9, %v1249_v8  ;;  %v1920_v14 = vpack.c.bf16 %v1276_v10, %v1275_v2  ;;  %v1227_v15 = vadd.f32 %v2338_v4, %v970_v12  ;;  %v1201_v18 = vadd.f32 %v2338_v4, %v866_v11 }
 0x12f   : > { %v868_v16 = vpop.f32.mrf.mxu0  ;;  %v972_v17 = vpop.f32.mrf.mxu1 }
 0x130   : > { %1964 = vst [vmem:[%s2348_s8 + $0x18] sm:$0xff] %v1855_v13   ;;  %1977 = vst [vmem:[%s2348_s8 + $0x80] sm:$0xff] %v1920_v14   ;;  %v1277_v21 = vmax.f32 %v1227_v15, 0.0  ;;  %v1251_v26 = vmax.f32 %v1201_v18, 0.0 }
 0x131   : > { %v869_v19 = vpop.f32.mrf.mxu0  ;;  %v973_v20 = vpop.f32.mrf.mxu1 }
 0x132   : > { %v1202_v22 = vadd.f32 %v2338_v4, %v869_v19  ;;  %v1228_v23 = vadd.f32 %v2338_v4, %v973_v20 }
 0x133   : > { %v871_v24 = vpop.f32.mrf.mxu0  ;;  %v975_v25 = vpop.f32.mrf.mxu1 }
 0x134   : > { %v1252_v27 = vmax.f32 %v1202_v22, 0.0  ;;  %v1278_v28 = vmax.f32 %v1228_v23, 0.0 }
 0x135   : > { %v874_v29 = vpop.f32.mrf.mxu0  ;;  %v978_v30 = vpop.f32.mrf.mxu1 }
 0x136   : > { %v1860_v31 = vpack.c.bf16 %v1252_v27, %v1251_v26  ;;  %v1925_v32 = vpack.c.bf16 %v1278_v28, %v1277_v21  ;;  %v1229_v33 = vadd.f32 %v2338_v4, %v978_v30  ;;  %v1203_v36 = vadd.f32 %v2338_v4, %v874_v29 }
 0x137   : > { %v876_v34 = vpop.f32.mrf.mxu0  ;;  %v980_v35 = vpop.f32.mrf.mxu1 }
 0x138   : > { %1965 = vst [vmem:[%s2348_s8 + $0x20] sm:$0xff] %v1860_v31   ;;  %1978 = vst [vmem:[%s2348_s8 + $0x88] sm:$0xff] %v1925_v32   ;;  %v1279_v39 = vmax.f32 %v1229_v33, 0.0  ;;  %v1253_v44 = vmax.f32 %v1203_v36, 0.0 }
 0x139   : > { %v877_v37 = vpop.f32.mrf.mxu0  ;;  %v981_v38 = vpop.f32.mrf.mxu1 }
 0x13a   : > { %v1204_v40 = vadd.f32 %v2338_v4, %v877_v37  ;;  %v1230_v41 = vadd.f32 %v2338_v4, %v981_v38 }
 0x13b   : > { %v879_v42 = vpop.f32.mrf.mxu0  ;;  %v983_v43 = vpop.f32.mrf.mxu1 }
 0x13c   : > { %v1254_v45 = vmax.f32 %v1204_v40, 0.0  ;;  %v1280_v46 = vmax.f32 %v1230_v41, 0.0 }
 0x13d   : > { %v882_v47 = vpop.f32.mrf.mxu0  ;;  %v986_v48 = vpop.f32.mrf.mxu1 }
 0x13e   : > { %v1865_v49 = vpack.c.bf16 %v1254_v45, %v1253_v44  ;;  %v1930_v50 = vpack.c.bf16 %v1280_v46, %v1279_v39  ;;  %v1231_v51 = vadd.f32 %v2338_v4, %v986_v48  ;;  %v1205_v54 = vadd.f32 %v2338_v4, %v882_v47 }
 0x13f   : > { %v884_v52 = vpop.f32.mrf.mxu0  ;;  %v988_v53 = vpop.f32.mrf.mxu1 }
 0x140   : > { %1966 = vst [vmem:[%s2348_s8 + $0x28] sm:$0xff] %v1865_v49   ;;  %1979 = vst [vmem:[%s2348_s8 + $0x90] sm:$0xff] %v1930_v50   ;;  %v1281_v57 = vmax.f32 %v1231_v51, 0.0  ;;  %v1255_v62 = vmax.f32 %v1205_v54, 0.0 }
 0x141   : > { %v885_v55 = vpop.f32.mrf.mxu0  ;;  %v989_v56 = vpop.f32.mrf.mxu1 }
 0x142   : > { %v1206_v58 = vadd.f32 %v2338_v4, %v885_v55  ;;  %v1232_v59 = vadd.f32 %v2338_v4, %v989_v56 }
 0x143   : > { %v887_v60 = vpop.f32.mrf.mxu0  ;;  %v991_v61 = vpop.f32.mrf.mxu1 }
 0x144   : > { %v1256_v63 = vmax.f32 %v1206_v58, 0.0  ;;  %v1282_v0 = vmax.f32 %v1232_v59, 0.0 }
 0x145   : > { %v890_v1 = vpop.f32.mrf.mxu0  ;;  %v994_v2 = vpop.f32.mrf.mxu1 }
 0x146   : > { %v1870_v3 = vpack.c.bf16 %v1256_v63, %v1255_v62  ;;  %v1935_v5 = vpack.c.bf16 %v1282_v0, %v1281_v57  ;;  %v1233_v6 = vadd.f32 %v2338_v4, %v994_v2  ;;  %v1207_v9 = vadd.f32 %v2338_v4, %v890_v1 }
 0x147   : > { %v892_v7 = vpop.f32.mrf.mxu0  ;;  %v996_v8 = vpop.f32.mrf.mxu1 }
 0x148   : > { %1967 = vst [vmem:[%s2348_s8 + $0x30] sm:$0xff] %v1870_v3   ;;  %1980 = vst [vmem:[%s2348_s8 + $0x98] sm:$0xff] %v1935_v5   ;;  %v1283_v12 = vmax.f32 %v1233_v6, 0.0  ;;  %v1257_v17 = vmax.f32 %v1207_v9, 0.0 }
 0x149   : > { %v893_v10 = vpop.f32.mrf.mxu0  ;;  %v997_v11 = vpop.f32.mrf.mxu1 }
 0x14a   : > { %v1208_v13 = vadd.f32 %v2338_v4, %v893_v10  ;;  %v1234_v14 = vadd.f32 %v2338_v4, %v997_v11 }
 0x14b   : > { %v895_v15 = vpop.f32.mrf.mxu0  ;;  %v999_v16 = vpop.f32.mrf.mxu1 }
 0x14c   : > { %v1258_v18 = vmax.f32 %v1208_v13, 0.0  ;;  %v1284_v19 = vmax.f32 %v1234_v14, 0.0 }
 0x14d   : > { %v898_v20 = vpop.f32.mrf.mxu0  ;;  %v1002_v21 = vpop.f32.mrf.mxu1 }
 0x14e   : > { %v1875_v22 = vpack.c.bf16 %v1258_v18, %v1257_v17  ;;  %v1940_v23 = vpack.c.bf16 %v1284_v19, %v1283_v12  ;;  %v1235_v24 = vadd.f32 %v2338_v4, %v1002_v21  ;;  %v1209_v27 = vadd.f32 %v2338_v4, %v898_v20 }
 0x14f   : > { %v900_v25 = vpop.f32.mrf.mxu0  ;;  %v1004_v26 = vpop.f32.mrf.mxu1 }
 0x150   : > { %1968 = vst [vmem:[%s2348_s8 + $0x38] sm:$0xff] %v1875_v22   ;;  %1981 = vst [vmem:[%s2348_s8 + $0xa0] sm:$0xff] %v1940_v23   ;;  %v1285_v30 = vmax.f32 %v1235_v24, 0.0  ;;  %v1259_v35 = vmax.f32 %v1209_v27, 0.0 }
 0x151   : > { %v901_v28 = vpop.f32.mrf.mxu0  ;;  %v1005_v29 = vpop.f32.mrf.mxu1 }
 0x152   : > { %v1210_v31 = vadd.f32 %v2338_v4, %v901_v28  ;;  %v1236_v32 = vadd.f32 %v2338_v4, %v1005_v29 }
 0x153   : > { %v903_v33 = vpop.f32.mrf.mxu0  ;;  %v1007_v34 = vpop.f32.mrf.mxu1 }
 0x154   : > { %v1260_v36 = vmax.f32 %v1210_v31, 0.0  ;;  %v1286_v37 = vmax.f32 %v1236_v32, 0.0 }
 0x155   : > { %v906_v38 = vpop.f32.mrf.mxu0  ;;  %v1010_v39 = vpop.f32.mrf.mxu1 }
 0x156   : > { %v1880_v40 = vpack.c.bf16 %v1260_v36, %v1259_v35  ;;  %v1945_v41 = vpack.c.bf16 %v1286_v37, %v1285_v30  ;;  %v1237_v42 = vadd.f32 %v2338_v4, %v1010_v39  ;;  %v1211_v45 = vadd.f32 %v2338_v4, %v906_v38 }
 0x157   : > { %v908_v43 = vpop.f32.mrf.mxu0  ;;  %v1012_v44 = vpop.f32.mrf.mxu1 }
 0x158   : > { %1969 = vst [vmem:[%s2348_s8 + $0x40] sm:$0xff] %v1880_v40   ;;  %1982 = vst [vmem:[%s2348_s8 + $0xa8] sm:$0xff] %v1945_v41   ;;  %v1287_v48 = vmax.f32 %v1237_v42, 0.0  ;;  %v1261_v53 = vmax.f32 %v1211_v45, 0.0 }
 0x159   : > { %v909_v46 = vpop.f32.mrf.mxu0  ;;  %v1013_v47 = vpop.f32.mrf.mxu1 }
 0x15a   : > { %v1212_v49 = vadd.f32 %v2338_v4, %v909_v46  ;;  %v1238_v50 = vadd.f32 %v2338_v4, %v1013_v47 }
 0x15b   : > { %v911_v51 = vpop.f32.mrf.mxu0  ;;  %v1015_v52 = vpop.f32.mrf.mxu1 }
 0x15c   : > { %v1262_v54 = vmax.f32 %v1212_v49, 0.0  ;;  %v1288_v55 = vmax.f32 %v1238_v50, 0.0 }
 0x15d   : > { %v914_v56 = vpop.f32.mrf.mxu0  ;;  %v1018_v57 = vpop.f32.mrf.mxu1 }
 0x15e   : > { %v1885_v58 = vpack.c.bf16 %v1262_v54, %v1261_v53  ;;  %v1950_v59 = vpack.c.bf16 %v1288_v55, %v1287_v48  ;;  %v1239_v60 = vadd.f32 %v2338_v4, %v1018_v57  ;;  %v1213_v63 = vadd.f32 %v2338_v4, %v914_v56 }
 0x15f   : > { %v916_v61 = vpop.f32.mrf.mxu0  ;;  %v1020_v62 = vpop.f32.mrf.mxu1 }
 0x160   : > { %1970 = vst [vmem:[%s2348_s8 + $0x48] sm:$0xff] %v1885_v58   ;;  %1983 = vst [vmem:[%s2348_s8 + $0xb0] sm:$0xff] %v1950_v59   ;;  %v1289_v2 = vmax.f32 %v1239_v60, 0.0  ;;  %v1263_v8 = vmax.f32 %v1213_v63, 0.0 }
 0x161   : > { %v917_v0 = vpop.f32.mrf.mxu0  ;;  %v1021_v1 = vpop.f32.mrf.mxu1 }
 0x162   : > { %v1214_v3 = vadd.f32 %v2338_v4, %v917_v0  ;;  %v1240_v5 = vadd.f32 %v2338_v4, %v1021_v1 }
 0x163   : > { %v919_v6 = vpop.f32.mrf.mxu0  ;;  %v1023_v7 = vpop.f32.mrf.mxu1 }
 0x164   : > { %v1264_v9 = vmax.f32 %v1214_v3, 0.0  ;;  %v1290_v10 = vmax.f32 %v1240_v5, 0.0 }
 0x165   : > { %v922_v11 = vpop.f32.mrf.mxu0  ;;  %v1026_v12 = vpop.f32.mrf.mxu1 }
 0x166   : > { %v1890_v13 = vpack.c.bf16 %v1264_v9, %v1263_v8  ;;  %v1955_v14 = vpack.c.bf16 %v1290_v10, %v1289_v2  ;;  %v1241_v15 = vadd.f32 %v2338_v4, %v1026_v12  ;;  %v1215_v18 = vadd.f32 %v2338_v4, %v922_v11 }
 0x167   : > { %v924_v16 = vpop.f32.mrf.mxu0  ;;  %v1028_v17 = vpop.f32.mrf.mxu1 }
 0x168   : > { %1971 = vst [vmem:[%s2348_s8 + $0x50] sm:$0xff] %v1890_v13   ;;  %1984 = vst [vmem:[%s2348_s8 + $0xb8] sm:$0xff] %v1955_v14   ;;  %v1291_v21 = vmax.f32 %v1241_v15, 0.0  ;;  %v1265_v26 = vmax.f32 %v1215_v18, 0.0 }
 0x169   : > { %v925_v19 = vpop.f32.mrf.mxu0  ;;  %v1029_v20 = vpop.f32.mrf.mxu1 }
 0x16a   : > { %v1216_v22 = vadd.f32 %v2338_v4, %v925_v19  ;;  %v1242_v23 = vadd.f32 %v2338_v4, %v1029_v20 }
 0x16b   : > { %v927_v24 = vpop.f32.mrf.mxu0  ;;  %v1031_v25 = vpop.f32.mrf.mxu1 }
 0x16c   : > { %v1266_v27 = vmax.f32 %v1216_v22, 0.0  ;;  %v1292_v28 = vmax.f32 %v1242_v23, 0.0 }
 0x16d   : > { %v930_v29 = vpop.f32.mrf.mxu0 }
 0x16e   : > { %v1895_v30 = vpack.c.bf16 %v1266_v27, %v1265_v26  ;;  %v1960_v31 = vpack.c.bf16 %v1292_v28, %v1291_v21  ;;  %v1217_v33 = vadd.f32 %v2338_v4, %v930_v29 }
 0x16f   : > { %v932_v32 = vpop.f32.mrf.mxu0 }
 0x170   : > { %1972 = vst [vmem:[%s2348_s8 + $0x58] sm:$0xff] %v1895_v30   ;;  %1985 = vst [vmem:[%s2348_s8 + $0xc0] sm:$0xff] %v1960_v31   ;;  %v1267_v37 = vmax.f32 %v1217_v33, 0.0 }
 0x171   : > { %v933_v34 = vpop.f32.mrf.mxu0 }
 0x172   : > { %v1218_v35 = vadd.f32 %v2338_v4, %v933_v34 }
 0x173   : > { %v935_v36 = vpop.f32.mrf.mxu0 }
 0x174   : > { %v1268_v38 = vmax.f32 %v1218_v35, 0.0 }
 0x176   : > { %v1900_v39 = vpack.c.bf16 %v1268_v38, %v1267_v37 }
 0x178   : > { %1973 = vst [vmem:[%s2348_s8 + $0x60] sm:$0xff] %v1900_v39  }
 0x179 PF: > { %s13_s14 = sadd.s32 1, %s2156_s14   ;;  %s2434_s12 = smov %s2152_s13 }
 0x17a   : > { %p10_p5 = scmp.ge.s32.totalorder %s13_s14, 4   ;;  %s2435_s13 = smov %s2437_s15 }
 0x17c   :  { %12 = sbr.rel (!%p10_p5) target bundleno = 2 (0x2), region = 76 }

// kernel: forward.7
= control target key start
LH: loop header
LB: loop body
LE: loop exit
PB: predicated region body
PF: predicated region fallthrough
CT: control target
= control target key end

     0   :  { %s2189_s12 = smov 0   ;;  %s2191_s13 = smov 0   ;;  %s2592_s0 = inlined_call_operand.vmem [shape: bf16[192,1024], index: 0, kind: input, shape index: {}]   ;;  %s2593_s1 = inlined_call_operand.vmem [shape: bf16[1024,128], index: 1, kind: input, shape index: {}]   ;;  %s2594_s2 = inlined_call_operand.vmem [shape: f32[1,128], index: 2, kind: input, shape index: {}]   ;;  %s2595_s3 = inlined_call_operand.vmem [shape: bf16[192,128], index: 3, kind: output, shape index: {}]  }
   0x1   :  { %s2193_s14 = smov 0  }
   0x2 LB: > { %s32_s15 = sadd.s32 1, %s2163_s13  ;;  %p1670_p0 = scmp.ge.s32.totalorder %s2167_s14, 1  ;;  %s2167_s14 = sphi %s2193_s14, %s13_s14   ;;  %s2163_s13 = sphi %s2191_s13, %s2601_s13   ;;  %s2159_s12 = sphi %s2189_s12, %s2600_s12  }
   0x3   : > { %p34_p1 = scmp.ge.s32.totalorder %s32_s15, 2  ;;  %p191_p2 = scmp.lt.s32.totalorder %s2167_s14, 3 }
   0x5   : > { %s2603_s15 = smov (%p34_p1, %s32_s15), 0  ;;  %p192_p3 = pnand %p1670_p0, %p191_p2 }
   0x7   : > { %195 = sbr.rel (%p192_p3) target bundleno = 346 (0x15a), region = 32 }
   0xc   : > { %v2081_v0 = vld [vmem:[%s2593_s1 + $0x78] sm:$0xff]   ;;  %v2085_v4 = vld [vmem:[%s2593_s1 + $0x70] sm:$0xff]   ;;  %v2089_v8 = vld [vmem:[%s2593_s1 + $0x68] sm:$0xff]   ;;  %s234_s23 = smul.u32 12, %s2159_s12 }
   0xd   : > { %v2082_v1 = vld [vmem:[%s2593_s1 + $0xf8] sm:$0xff]   ;;  %1849 = vmatprep.subr.bf16.mxu0 %v2081_v0  ;;  %v2086_v5 = vld [vmem:[%s2593_s1 + $0xf0] sm:$0xff]   ;;  %v2090_v9 = vld [vmem:[%s2593_s1 + $0xe8] sm:$0xff]  }
   0xe   : > { %v2083_v2 = vld [vmem:[%s2593_s1 + $0x38] sm:$0xff]   ;;  %1901 = vmatprep.subr.bf16.mxu1 %v2082_v1  ;;  %v2087_v6 = vld [vmem:[%s2593_s1 + $0x30] sm:$0xff]   ;;  %v2091_v10 = vld [vmem:[%s2593_s1 + $0x28] sm:$0xff]   ;;  %p236_p4 = scmp.lt.s32.totalorder %s234_s23, 23 }
   0xf   : > { %v2084_v3 = vld [vmem:[%s2593_s1 + $0xb8] sm:$0xff]   ;;  %1850 = vmatpush3.bf16.msra.mxu0 %v2083_v2  ;;  %v2088_v7 = vld [vmem:[%s2593_s1 + $0xb0] sm:$0xff]   ;;  %v2092_v11 = vld [vmem:[%s2593_s1 + $0xa8] sm:$0xff]  }
  0x10   : > { %1902 = vmatpush3.bf16.msra.mxu1 %v2084_v3  ;;  %1851 = vmatprep.subr.bf16.mxu0 %v2085_v4  ;;  %v2093_v12 = vld [vmem:[%s2593_s1 + $0x60] sm:$0xff]   ;;  %v2097_v16 = vld [vmem:[%s2593_s1 + $0x58] sm:$0xff]   ;;  %v2101_v20 = vld [vmem:[%s2593_s1 + $0x50] sm:$0xff]   ;;  %s2605_s23 = smov (!%p236_p4, %s234_s23), 23 }
  0x11   : > { %1903 = vmatprep.subr.bf16.mxu1 %v2086_v5  ;;  %v2094_v13 = vld [vmem:[%s2593_s1 + $0xe0] sm:$0xff]   ;;  %v2098_v17 = vld [vmem:[%s2593_s1 + $0xd8] sm:$0xff]   ;;  %v2102_v21 = vld [vmem:[%s2593_s1 + $0xd0] sm:$0xff]   ;;  %s1801_s25 = sshll.u32 %s2605_s23, 5  ;;  %s1673_s10 = sshll.u32 %s2605_s23, 2 }
  0x12   : > { %v2095_v14 = vld [vmem:[%s2593_s1 + $0x20] sm:$0xff]   ;;  %v2099_v18 = vld [vmem:[%s2593_s1 + $0x18] sm:$0xff]   ;;  %v2103_v22 = vld [vmem:[%s2593_s1 + $0x10] sm:$0xff]   ;;  %s2306_s6 = scalar_lea.vmem %s2592_s0, %s1801_s25  ;;  %s2537_s16 = scalar_lea.vmem %s2595_s3, %s1673_s10 }
  0x13   : > { %1852 = vmatpush3.bf16.msra.mxu0 %v2087_v6  ;;  %v2096_v15 = vld [vmem:[%s2593_s1 + $0xa0] sm:$0xff]   ;;  %v2100_v19 = vld [vmem:[%s2593_s1 + $0x98] sm:$0xff]   ;;  %v2104_v23 = vld [vmem:[%s2593_s1 + $0x90] sm:$0xff]  }
  0x14   : > { %1904 = vmatpush3.bf16.msra.mxu1 %v2088_v7  ;;  %1853 = vmatprep.subr.bf16.mxu0 %v2089_v8  ;;  %v2105_v24 = vld [vmem:[%s2593_s1 + $0x48] sm:$0xff]   ;;  %v2109_v28 = vld [vmem:[%s2593_s1 + $0x40] sm:$0xff]   ;;  %v2113_v40 = vld [vmem:[%s2593_s1 + $0x178] sm:$0xff]  }
  0x15   : > { %1905 = vmatprep.subr.bf16.mxu1 %v2090_v9  ;;  %v2106_v25 = vld [vmem:[%s2593_s1 + $0xc8] sm:$0xff]   ;;  %v2110_v29 = vld [vmem:[%s2593_s1 + $0xc0] sm:$0xff]   ;;  %v2114_v41 = vld [vmem:[%s2593_s1 + $0x138] sm:$0xff]  }
  0x16   : > { %v2107_v26 = vld [vmem:[%s2593_s1 + $0x8] sm:$0xff]   ;;  %v2111_v30 = vld [vmem:[%s2593_s1] sm:$0xff]   ;;  %v2115_v42 = vld [vmem:[%s2593_s1 + $0x1f8] sm:$0xff]  }
  0x17   : > { %1854 = vmatpush3.bf16.msra.mxu0 %v2091_v10  ;;  %v2108_v27 = vld [vmem:[%s2593_s1 + $0x88] sm:$0xff]   ;;  %v2112_v31 = vld [vmem:[%s2593_s1 + $0x80] sm:$0xff]   ;;  %v2116_v43 = vld [vmem:[%s2593_s1 + $0x1b8] sm:$0xff]  }
  0x18   : > { %1906 = vmatpush3.bf16.msra.mxu1 %v2092_v11  ;;  %1855 = vmatprep.subr.bf16.mxu0 %v2093_v12  ;;  %v296_v32 = vld [vmem:[%s2306_s6] sm:$0xff]  ;;  %v297_v34 = vld [vmem:[%s2306_s6 + $0x8] sm:$0xff]  ;;  %v2117_v44 = vld [vmem:[%s2593_s1 + $0x170] sm:$0xff]  }
  0x19   : > { %1907 = vmatprep.subr.bf16.mxu1 %v2094_v13  ;;  %v300_v33 = vld [vmem:[%s2306_s6 + $0x20] sm:$0xff]  ;;  %v301_v37 = vld [vmem:[%s2306_s6 + $0x28] sm:$0xff]  ;;  %v2118_v51 = vld [vmem:[%s2593_s1 + $0x130] sm:$0xff]  }
  0x1a   : > { %v1674_v35 = vcombine.low %v296_v32, %v300_v33  ;;  %v1675_v36 = vcombine.high %v296_v32, %v300_v33  ;;  %v1676_v38 = vcombine.low %v297_v34, %v301_v37  ;;  %v1677_v39 = vcombine.high %v297_v34, %v301_v37  ;;  %v304_v45 = vld [vmem:[%s2306_s6 + $0x40] sm:$0xff]  ;;  %v305_v48 = vld [vmem:[%s2306_s6 + $0x48] sm:$0xff]  ;;  %v2119_v54 = vld [vmem:[%s2593_s1 + $0x1f0] sm:$0xff]  }
  0x1b   : > { %1856 = vmatpush3.bf16.msra.mxu0 %v2095_v14  ;;  %v308_v46 = vld [vmem:[%s2306_s6 + $0x60] sm:$0xff]  ;;  %v309_v49 = vld [vmem:[%s2306_s6 + $0x68] sm:$0xff]  ;;  %v2120_v55 = vld [vmem:[%s2593_s1 + $0x1b0] sm:$0xff]  }
  0x1c   : > { %1908 = vmatpush3.bf16.msra.mxu1 %v2096_v15  ;;  %1857 = vmatprep.subr.bf16.mxu0 %v2097_v16  ;;  %v1683_v47 = vcombine.high %v304_v45, %v308_v46  ;;  %v1685_v50 = vcombine.high %v305_v48, %v309_v49  ;;  %v1682_v52 = vcombine.low %v304_v45, %v308_v46  ;;  %v2121_v56 = vld [vmem:[%s2593_s1 + $0x168] sm:$0xff]   ;;  %v312_v59 = vld [vmem:[%s2306_s6 + $0x80] sm:$0xff]  ;;  %v2129_v14 = vld [vmem:[%s2593_s1 + $0x158] sm:$0xff]  }
  0x1d   : > { %1909 = vmatprep.subr.bf16.mxu1 %v2098_v17  ;;  %1128 = vmatprep.mubr.bf16.mxu0 %v1675_v36  ;;  %v1684_v53 = vcombine.low %v305_v48, %v309_v49  ;;  %v2122_v57 = vld [vmem:[%s2593_s1 + $0x128] sm:$0xff]   ;;  %v316_v60 = vld [vmem:[%s2306_s6 + $0xa0] sm:$0xff]  ;;  %v2130_v15 = vld [vmem:[%s2593_s1 + $0x118] sm:$0xff]  }
  0x1e   : > { %1209 = vmatprep.mubr.bf16.mxu1 %v1677_v39  ;;  %v2123_v58 = vld [vmem:[%s2593_s1 + $0x1e8] sm:$0xff]   ;;  %v1691_v63 = vcombine.high %v312_v59, %v316_v60  ;;  %v1690_v2 = vcombine.low %v312_v59, %v316_v60  ;;  %v2125_v3 = vld [vmem:[%s2593_s1 + $0x160] sm:$0xff]   ;;  %v2131_v17 = vld [vmem:[%s2593_s1 + $0x1d8] sm:$0xff]  }
  0x1f   : > { %1858 = vmatpush3.bf16.msra.mxu0 %v2099_v18  ;;  %v313_v61 = vld [vmem:[%s2306_s6 + $0x88] sm:$0xff]  ;;  %v2126_v5 = vld [vmem:[%s2593_s1 + $0x120] sm:$0xff]   ;;  %v302_v48 = vld [vmem:[%s2306_s6 + $0x30] sm:$0xff] }
  0x20   : > { %1910 = vmatpush3.bf16.msra.mxu1 %v2100_v19  ;;  %1859 = vmatprep.subr.bf16.mxu0 %v2101_v20  ;;  %v317_v62 = vld [vmem:[%s2306_s6 + $0xa8] sm:$0xff]  ;;  %v2127_v6 = vld [vmem:[%s2593_s1 + $0x1e0] sm:$0xff]   ;;  %v2132_v19 = vld [vmem:[%s2593_s1 + $0x198] sm:$0xff]  }
  0x21   : > { %1911 = vmatprep.subr.bf16.mxu1 %v2102_v21  ;;  %v1693_v0 = vcombine.high %v313_v61, %v317_v62  ;;  %v2124_v1 = vld [vmem:[%s2593_s1 + $0x1a8] sm:$0xff]   ;;  %v1692_v4 = vcombine.low %v313_v61, %v317_v62  ;;  %v2128_v7 = vld [vmem:[%s2593_s1 + $0x1a0] sm:$0xff]   ;;  %v2133_v20 = vld [vmem:[%s2593_s1 + $0x150] sm:$0xff]  }
  0x22   : > { %v320_v8 = vld [vmem:[%s2306_s6 + $0xc0] sm:$0xff]  ;;  %v321_v10 = vld [vmem:[%s2306_s6 + $0xc8] sm:$0xff]  ;;  %v299_v49 = vld [vmem:[%s2306_s6 + $0x18] sm:$0xff] }
  0x23   : > { %1860 = vmatpush3.bf16.msra.mxu0 %v2103_v22  ;;  %v324_v9 = vld [vmem:[%s2306_s6 + $0xe0] sm:$0xff]  ;;  %v325_v12 = vld [vmem:[%s2306_s6 + $0xe8] sm:$0xff]  ;;  %v314_v62 = vld [vmem:[%s2306_s6 + $0x90] sm:$0xff] }
  0x24   : > { %1912 = vmatpush3.bf16.msra.mxu1 %v2104_v23  ;;  %1861 = vmatprep.subr.bf16.mxu0 %v2105_v24  ;;  %v1699_v11 = vcombine.high %v320_v8, %v324_v9  ;;  %v1701_v13 = vcombine.high %v321_v10, %v325_v12  ;;  %v1698_v16 = vcombine.low %v320_v8, %v324_v9  ;;  %v328_v21 = vld [vmem:[%s2306_s6 + $0x100] sm:$0xff]  ;;  %v329_v24 = vld [vmem:[%s2306_s6 + $0x108] sm:$0xff]  ;;  %v323_v8 = vld [vmem:[%s2306_s6 + $0xd8] sm:$0xff] }
  0x25   : > { %1913 = vmatprep.subr.bf16.mxu1 %v2106_v25  ;;  %v1700_v18 = vcombine.low %v321_v10, %v325_v12  ;;  %v332_v22 = vld [vmem:[%s2306_s6 + $0x120] sm:$0xff]  ;;  %v333_v25 = vld [vmem:[%s2306_s6 + $0x128] sm:$0xff]  ;;  %v327_v9 = vld [vmem:[%s2306_s6 + $0xf8] sm:$0xff] }
  0x26   : > { %v1707_v23 = vcombine.high %v328_v21, %v332_v22  ;;  %v2138_v32 = vld [vmem:[%s2593_s1 + $0x108] sm:$0xff]   ;;  %v1708_v33 = vcombine.low %v329_v24, %v333_v25  ;;  %v340_v36 = vld [vmem:[%s2306_s6 + $0x160] sm:$0xff] }
  0x27   : > { %1862 = vmatpush3.bf16.msra.mxu0 %v2107_v26  ;;  %v1709_v26 = vcombine.high %v329_v24, %v333_v25  ;;  %v2139_v34 = vld [vmem:[%s2593_s1 + $0x1c8] sm:$0xff]   ;;  %v2144_v45 = vld [vmem:[%s2593_s1 + $0x180] sm:$0xff]   ;;  %v339_v24 = vld [vmem:[%s2306_s6 + $0x158] sm:$0xff] }
  0x28   : > { %1914 = vmatpush3.bf16.msra.mxu1 %v2108_v27  ;;  %1863 = vmatprep.subr.bf16.mxu0 %v2109_v28  ;;  %v2134_v27 = vld [vmem:[%s2593_s1 + $0x110] sm:$0xff]   ;;  %v337_v37 = vld [vmem:[%s2306_s6 + $0x148] sm:$0xff]  ;;  %v343_v25 = vld [vmem:[%s2306_s6 + $0x178] sm:$0xff] }
  0x29   : > { %1915 = vmatprep.subr.bf16.mxu1 %v2110_v29  ;;  %v2135_v28 = vld [vmem:[%s2593_s1 + $0x1d0] sm:$0xff]  }
  0x2a   : > { %v2136_v29 = vld [vmem:[%s2593_s1 + $0x190] sm:$0xff]  }
  0x2b   : > { %1864 = vmatpush3.bf16.msra.mxu0 %v2111_v30  ;;  %v2137_v30 = vld [vmem:[%s2593_s1 + $0x148] sm:$0xff]  }
  0x2c   : > { %1916 = vmatpush3.bf16.msra.mxu1 %v2112_v31  ;;  %1953 = vmatprep.subr.bf16.mxu0 %v2113_v40  ;;  %v1706_v31 = vcombine.low %v328_v21, %v332_v22  ;;  %v338_v22 = vld [vmem:[%s2306_s6 + $0x150] sm:$0xff] }
  0x2d   : > { %2005 = vmatprep.subr.bf16.mxu1 %v2115_v42  ;;  %v2141_v42 = vld [vmem:[%s2593_s1 + $0x140] sm:$0xff]  }
  0x2e   : > { %1129 = vmatmul.mubr.bf16.vlgmr.msra.gmra.mxu0 %v1674_v35  ;;  %v336_v35 = vld [vmem:[%s2306_s6 + $0x140] sm:$0xff] }
  0x2f   : > { %1210 = vmatmul.mubr.bf16.vlgmr.msra.gmra.mxu1 %v1676_v38  ;;  %1954 = vmatpush3.bf16.msra.mxu0 %v2114_v41  ;;  %v341_v38 = vld [vmem:[%s2306_s6 + $0x168] sm:$0xff]  ;;  %v1715_v39 = vcombine.high %v336_v35, %v340_v36  ;;  %v1714_v46 = vcombine.low %v336_v35, %v340_v36 }
  0x30   : > { %2006 = vmatpush3.bf16.msra.mxu1 %v2116_v43  ;;  %1955 = vmatprep.subr.bf16.mxu0 %v2117_v44  ;;  %v1717_v40 = vcombine.high %v337_v37, %v341_v38  ;;  %v2140_v41 = vld [vmem:[%s2593_s1 + $0x188] sm:$0xff]   ;;  %v2142_v43 = vld [vmem:[%s2593_s1 + $0x100] sm:$0xff]  }
  0x31   : > { %1136 = vmatprep.mubr.bf16.mxu0 %v1683_v47  ;;  %1217 = vmatprep.mubr.bf16.mxu1 %v1685_v50  ;;  %v2143_v44 = vld [vmem:[%s2593_s1 + $0x1c0] sm:$0xff]   ;;  %v298_v47 = vld [vmem:[%s2306_s6 + $0x10] sm:$0xff]  ;;  %v1716_v50 = vcombine.low %v337_v37, %v341_v38 }
  0x32   : > { %2007 = vmatprep.subr.bf16.mxu1 %v2119_v54  ;;  %v306_v54 = vld [vmem:[%s2306_s6 + $0x50] sm:$0xff] }
  0x33   : > { %1956 = vmatpush3.bf16.msra.mxu0 %v2118_v51  ;;  %v1679_v51 = vcombine.high %v298_v47, %v302_v48 }
  0x34   : > { %2008 = vmatpush3.bf16.msra.mxu1 %v2120_v55  ;;  %1957 = vmatprep.subr.bf16.mxu0 %v2121_v56  ;;  %v310_v55 = vld [vmem:[%s2306_s6 + $0x70] sm:$0xff]  ;;  %v307_v56 = vld [vmem:[%s2306_s6 + $0x58] sm:$0xff] }
  0x35   : > { %2009 = vmatprep.subr.bf16.mxu1 %v2123_v58  ;;  %v1678_v58 = vcombine.low %v298_v47, %v302_v48  ;;  %v1687_v60 = vcombine.high %v306_v54, %v310_v55 }
  0x36   : > { %1137 = vmatmul.mubr.bf16.gmra.mxu0 %v1682_v52  ;;  %v303_v52 = vld [vmem:[%s2306_s6 + $0x38] sm:$0xff] }
  0x37   : > { %1218 = vmatmul.mubr.bf16.gmra.mxu1 %v1684_v53  ;;  %1958 = vmatpush3.bf16.msra.mxu0 %v2122_v57  ;;  %v1681_v53 = vcombine.high %v299_v49, %v303_v52  ;;  %v311_v57 = vld [vmem:[%s2306_s6 + $0x78] sm:$0xff]  ;;  %v1680_v59 = vcombine.low %v299_v49, %v303_v52 }
  0x38   : > { %1144 = vmatprep.mubr.bf16.mxu0 %v1691_v63  ;;  %1225 = vmatprep.mubr.bf16.mxu1 %v1693_v0  ;;  %v1689_v61 = vcombine.high %v307_v56, %v311_v57  ;;  %v318_v63 = vld [vmem:[%s2306_s6 + $0xb0] sm:$0xff]  ;;  %v315_v0 = vld [vmem:[%s2306_s6 + $0x98] sm:$0xff] }
  0x39   : > { %2010 = vmatpush3.bf16.msra.mxu1 %v2124_v1  ;;  %1959 = vmatprep.subr.bf16.mxu0 %v2125_v3  ;;  %v319_v1 = vld [vmem:[%s2306_s6 + $0xb8] sm:$0xff]  ;;  %v1688_v3 = vcombine.low %v307_v56, %v311_v57  ;;  %v1694_v10 = vcombine.low %v314_v62, %v318_v63 }
  0x3a   : > { %2011 = vmatprep.subr.bf16.mxu1 %v2127_v6  ;;  %v322_v6 = vld [vmem:[%s2306_s6 + $0xd0] sm:$0xff] }
  0x3b   : > { %1960 = vmatpush3.bf16.msra.mxu0 %v2126_v5  ;;  %v1697_v5 = vcombine.high %v315_v0, %v319_v1 }
  0x3c   : > { %1961 = vmatprep.subr.bf16.mxu0 %v2129_v14  ;;  %v330_v14 = vld [vmem:[%s2306_s6 + $0x110] sm:$0xff] }
  0x3d   : > { %2012 = vmatpush3.bf16.msra.mxu1 %v2128_v7  ;;  %v326_v7 = vld [vmem:[%s2306_s6 + $0xf0] sm:$0xff] }
  0x3e   : > { %1145 = vmatmul.mubr.bf16.gmra.mxu0 %v1690_v2  ;;  %2013 = vmatprep.subr.bf16.mxu1 %v2131_v17  ;;  %v1686_v2 = vcombine.low %v306_v54, %v310_v55  ;;  %v1703_v12 = vcombine.high %v322_v6, %v326_v7  ;;  %v335_v17 = vld [vmem:[%s2306_s6 + $0x138] sm:$0xff] }
  0x3f   : > { %1226 = vmatmul.mubr.bf16.gmra.mxu1 %v1692_v4  ;;  %1152 = vmatprep.mubr.bf16.mxu0 %v1699_v11  ;;  %v1695_v4 = vcombine.high %v314_v62, %v318_v63  ;;  %v1696_v11 = vcombine.low %v315_v0, %v319_v1 }
  0x40   : > { %1233 = vmatprep.mubr.bf16.mxu1 %v1701_v13  ;;  %1962 = vmatpush3.bf16.msra.mxu0 %v2130_v15  ;;  %v1705_v13 = vcombine.high %v323_v8, %v327_v9  ;;  %v334_v15 = vld [vmem:[%s2306_s6 + $0x130] sm:$0xff] }
  0x41   : > { %2014 = vmatpush3.bf16.msra.mxu1 %v2132_v19  ;;  %1963 = vmatprep.subr.bf16.mxu0 %v2133_v20  ;;  %v1704_v19 = vcombine.low %v323_v8, %v327_v9  ;;  %v1711_v20 = vcombine.high %v330_v14, %v334_v15 }
  0x42   : > { %2015 = vmatprep.subr.bf16.mxu1 %v2135_v28 }
  0x44   : > { %1964 = vmatpush3.bf16.msra.mxu0 %v2134_v27 }
  0x45   : > { %2016 = vmatpush3.bf16.msra.mxu1 %v2136_v29  ;;  %1965 = vmatprep.subr.bf16.mxu0 %v2137_v30  ;;  %v1721_v29 = vcombine.high %v339_v24, %v343_v25 }
  0x46   : > { %1153 = vmatmul.mubr.bf16.gmra.mxu0 %v1698_v16  ;;  %2017 = vmatprep.subr.bf16.mxu1 %v2139_v34  ;;  %v331_v16 = vld [vmem:[%s2306_s6 + $0x118] sm:$0xff] }
  0x47   : > { %1234 = vmatmul.mubr.bf16.gmra.mxu1 %v1700_v18  ;;  %1160 = vmatprep.mubr.bf16.mxu0 %v1707_v23  ;;  %v1702_v18 = vcombine.low %v322_v6, %v326_v7  ;;  %v1713_v21 = vcombine.high %v331_v16, %v335_v17  ;;  %v342_v23 = vld [vmem:[%s2306_s6 + $0x170] sm:$0xff]  ;;  %v1712_v27 = vcombine.low %v331_v16, %v335_v17 }
  0x48   : > { %1241 = vmatprep.mubr.bf16.mxu1 %v1709_v26  ;;  %1966 = vmatpush3.bf16.msra.mxu0 %v2138_v32  ;;  %v1710_v26 = vcombine.low %v330_v14, %v334_v15  ;;  %v1719_v28 = vcombine.high %v338_v22, %v342_v23  ;;  %v1718_v30 = vcombine.low %v338_v22, %v342_v23 }
  0x49   : > { %2018 = vmatpush3.bf16.msra.mxu1 %v2140_v41  ;;  %1967 = vmatprep.subr.bf16.mxu0 %v2141_v42 }
  0x4a   : > { %2019 = vmatprep.subr.bf16.mxu1 %v2143_v44 }
  0x4c   : > { %1968 = vmatpush3.bf16.msra.mxu0 %v2142_v43 }
  0x4d   : > { %2020 = vmatpush3.bf16.msra.mxu1 %v2144_v45 }
  0x4e   : > { %1161 = vmatmul.mubr.bf16.gmra.mxu0 %v1706_v31  ;;  %v1720_v31 = vcombine.low %v339_v24, %v343_v25 }
  0x4f   : > { %1242 = vmatmul.mubr.bf16.gmra.mxu1 %v1708_v33  ;;  %1168 = vmatprep.mubr.bf16.mxu0 %v1715_v39 }
  0x50   : > { %1249 = vmatprep.mubr.bf16.mxu1 %v1717_v40 }
  0x56   : > { %1169 = vmatmul.mubr.bf16.gmra.mxu0 %v1714_v46 }
  0x57   : > { %1250 = vmatmul.mubr.bf16.gmra.mxu1 %v1716_v50  ;;  %1290 = vmatprep.mubr.bf16.mxu0 %v1679_v51 }
  0x58   : > { %1371 = vmatprep.mubr.bf16.mxu1 %v1681_v53 }
  0x5e   : > { %1291 = vmatmul.mubr.bf16.vlgmr.msra.gmra.mxu0 %v1678_v58 }
  0x5f   : > { %1372 = vmatmul.mubr.bf16.vlgmr.msra.gmra.mxu1 %v1680_v59  ;;  %1298 = vmatprep.mubr.bf16.mxu0 %v1687_v60 }
  0x60   : > { %1379 = vmatprep.mubr.bf16.mxu1 %v1689_v61 }
  0x66   : > { %1299 = vmatmul.mubr.bf16.gmra.mxu0 %v1686_v2 }
  0x67   : > { %1380 = vmatmul.mubr.bf16.gmra.mxu1 %v1688_v3  ;;  %1306 = vmatprep.mubr.bf16.mxu0 %v1695_v4 }
  0x68   : > { %1387 = vmatprep.mubr.bf16.mxu1 %v1697_v5 }
  0x6e   : > { %1307 = vmatmul.mubr.bf16.gmra.mxu0 %v1694_v10 }
  0x6f   : > { %1388 = vmatmul.mubr.bf16.gmra.mxu1 %v1696_v11  ;;  %1314 = vmatprep.mubr.bf16.mxu0 %v1703_v12 }
  0x70   : > { %1395 = vmatprep.mubr.bf16.mxu1 %v1705_v13 }
  0x76   : > { %1315 = vmatmul.mubr.bf16.gmra.mxu0 %v1702_v18 }
  0x77   : > { %1396 = vmatmul.mubr.bf16.gmra.mxu1 %v1704_v19  ;;  %1322 = vmatprep.mubr.bf16.mxu0 %v1711_v20 }
  0x78   : > { %1403 = vmatprep.mubr.bf16.mxu1 %v1713_v21 }
  0x7e   : > { %1323 = vmatmul.mubr.bf16.gmra.mxu0 %v1710_v26 }
  0x7f   : > { %1404 = vmatmul.mubr.bf16.gmra.mxu1 %v1712_v27  ;;  %1330 = vmatprep.mubr.bf16.mxu0 %v1719_v28 }
  0x80   : > { %1411 = vmatprep.mubr.bf16.mxu1 %v1721_v29 }
  0x86   : > { %1331 = vmatmul.mubr.bf16.gmra.mxu0 %v1718_v30 }
  0x87   : > { %1412 = vmatmul.mubr.bf16.gmra.mxu1 %v1720_v31 }
  0xee   : > { %v1865_v32 = vpop.f32.mrf.mxu0 }
  0xef   : > { %v1917_v33 = vpop.f32.mrf.mxu1 }
  0xf0   : > { %v1866_v34 = vpop.f32.mrf.mxu0 }
  0xf1   : > { %v1918_v35 = vpop.f32.mrf.mxu1  ;;  %v1867_v15 = vadd.f32 %v1866_v34, %v1865_v32 }
  0xf2   : > { %v1868_v36 = vpop.f32.mrf.mxu0  ;;  %v1919_v16 = vadd.f32 %v1918_v35, %v1917_v33  ;;  %v2525_v35 = vld [vmem:[%s2594_s2] ss:$0 sm:$0xff] }
  0xf3   : > { %v1920_v37 = vpop.f32.mrf.mxu1 }
  0xf4   : > { %v1869_v38 = vpop.f32.mrf.mxu0  ;;  %v1212_v23 = vadd.f32 %v1919_v16, %v1867_v15 }
  0xf5   : > { %v1921_v39 = vpop.f32.mrf.mxu1  ;;  %v1870_v20 = vadd.f32 %v1869_v38, %v1868_v36 }
  0xf6   : > { %v1871_v40 = vpop.f32.mrf.mxu0  ;;  %v1922_v21 = vadd.f32 %v1921_v39, %v1920_v37 }
  0xf7   : > { %v1923_v41 = vpop.f32.mrf.mxu1 }
  0xf8   : > { %v1872_v42 = vpop.f32.mrf.mxu0  ;;  %v1215_v30 = vadd.f32 %v1922_v21, %v1870_v20 }
  0xf9   : > { %v1924_v43 = vpop.f32.mrf.mxu1 }
  0xfa   : > { %v1874_v44 = vpop.f32.mrf.mxu0 }
  0xfb   : > { %v1926_v45 = vpop.f32.mrf.mxu1 }
  0xfc   : > { %v1875_v46 = vpop.f32.mrf.mxu0 }
  0xfd   : > { %v1927_v47 = vpop.f32.mrf.mxu1  ;;  %v1876_v15 = vadd.f32 %v1875_v46, %v1874_v44 }
  0xfe   : > { %v2458_v48 = vpop.f32.mrf.mxu0  ;;  %v1928_v16 = vadd.f32 %v1927_v47, %v1926_v45 }
  0xff   : > { %v2460_v49 = vpop.f32.mrf.mxu1 }
 0x100   : > { %v2462_v50 = vpop.f32.mrf.mxu0 }
 0x101   : > { %v2464_v51 = vpop.f32.mrf.mxu1 }
 0x102   : > { %v2466_v52 = vpop.f32.mrf.mxu0  ;;  %v1931_v44 = vadd.f32 %v2464_v51, %v2460_v49 }
 0x103   : > { %v2468_v53 = vpop.f32.mrf.mxu1 }
 0x104   : > { %v2470_v54 = vpop.f32.mrf.mxu0 }
 0x105   : > { %v2472_v55 = vpop.f32.mrf.mxu1  ;;  %v1882_v49 = vadd.f32 %v2470_v54, %v2466_v52 }
 0x106   : > { %v2474_v56 = vpop.f32.mrf.mxu0 }
 0x107   : > { %v2476_v57 = vpop.f32.mrf.mxu1 }
 0x108   : > { %v2478_v58 = vpop.f32.mrf.mxu0 }
 0x109   : > { %v2480_v59 = vpop.f32.mrf.mxu1  ;;  %v1885_v52 = vadd.f32 %v2478_v58, %v2474_v56 }
 0x10a   : > { %v2482_v60 = vpop.f32.mrf.mxu0 }
 0x10b   : > { %v2484_v61 = vpop.f32.mrf.mxu1 }
 0x10c   : > { %v2486_v62 = vpop.f32.mrf.mxu0 }
 0x10d   : > { %v2488_v63 = vpop.f32.mrf.mxu1 }
 0x10e   : > { %v2490_v0 = vpop.f32.mrf.mxu0  ;;  %v1940_v56 = vadd.f32 %v2488_v63, %v2484_v61 }
 0x10f   : > { %v2492_v1 = vpop.f32.mrf.mxu1 }
 0x110   : > { %v2494_v2 = vpop.f32.mrf.mxu0 }
 0x111   : > { %v2496_v3 = vpop.f32.mrf.mxu1 }
 0x112   : > { %v2498_v4 = vpop.f32.mrf.mxu0  ;;  %v1943_v61 = vadd.f32 %v2496_v3, %v2492_v1 }
 0x113   : > { %v2500_v5 = vpop.f32.mrf.mxu1 }
 0x114   : > { %v2502_v6 = vpop.f32.mrf.mxu0 }
 0x115   : > { %v2504_v7 = vpop.f32.mrf.mxu1 }
 0x116   : > { %v2506_v8 = vpop.f32.mrf.mxu0 }
 0x117   : > { %v2508_v9 = vpop.f32.mrf.mxu1 }
 0x118   : > { %v2510_v10 = vpop.f32.mrf.mxu0 }
 0x119   : > { %v2512_v11 = vpop.f32.mrf.mxu1 }
 0x11a   : > { %v2514_v12 = vpop.f32.mrf.mxu0 }
 0x11b   : > { %v2516_v13 = vpop.f32.mrf.mxu1 }
 0x11c   : > { %2596 = vst [vmem:[#allocation3_spill] sm:$0xff] %v2516_v13  ;;  %v2518_v14 = vpop.f32.mrf.mxu0  ;;  %v1873_v13 = vadd.f32 %v1872_v42, %v1871_v40 }
 0x11d   : > { %2597 = vst [vmem:[#allocation4_spill] sm:$0xff] %v2518_v14  ;;  %v2520_v17 = vpop.f32.mrf.mxu1  ;;  %v1925_v14 = vadd.f32 %v1924_v43, %v1923_v41 }
 0x11e   : > { %v1969_v18 = vpop.f32.mrf.mxu0 }
 0x11f   : > { %v2021_v19 = vpop.f32.mrf.mxu1 }
 0x120   : > { %v1970_v22 = vpop.f32.mrf.mxu0 }
 0x121   : > { %v1971_v24 = vadd.f32 %v1970_v22, %v1969_v18  ;;  %v2022_v25 = vpop.f32.mrf.mxu1 }
 0x122   : > { %v1972_v26 = vpop.f32.mrf.mxu0  ;;  %v2023_v28 = vadd.f32 %v2022_v25, %v2021_v19  ;;  %v1220_v19 = vadd.f32 %v1925_v14, %v1873_v13  ;;  %v1223_v25 = vadd.f32 %v1928_v16, %v1876_v15 }
 0x123   : > { %v1293_v27 = vadd.f32 %v1971_v24, %v1212_v23  ;;  %v2024_v29 = vpop.f32.mrf.mxu1 }
 0x124   : > { %v1973_v31 = vpop.f32.mrf.mxu0 }
 0x125   : > { %v1374_v32 = vadd.f32 %v2023_v28, %v1293_v27  ;;  %v1974_v33 = vadd.f32 %v1973_v31, %v1972_v26  ;;  %v2025_v34 = vpop.f32.mrf.mxu1  ;;  %v1879_v26 = vadd.f32 %v2462_v50, %v2458_v48  ;;  %v1934_v50 = vadd.f32 %v2472_v55, %v2468_v53 }
 0x126   : > { %v1975_v36 = vpop.f32.mrf.mxu0  ;;  %v2026_v38 = vadd.f32 %v2025_v34, %v2024_v29  ;;  %v1937_v53 = vadd.f32 %v2480_v59, %v2476_v57 }
 0x127   : > { %v1296_v37 = vadd.f32 %v1974_v33, %v1215_v30  ;;  %v2027_v39 = vpop.f32.mrf.mxu1  ;;  %v1466_v40 = vadd.f32 %v2525_v35, %v1374_v32  ;;  %v1228_v32 = vadd.f32 %v1931_v44, %v1879_v26 }
 0x128   : > { %v1976_v18 = vpop.f32.mrf.mxu0  ;;  %v1236_v57 = vadd.f32 %v1937_v53, %v1885_v52 }
 0x129   : > { %v1377_v41 = vadd.f32 %v2026_v38, %v1296_v37  ;;  %v1977_v42 = vadd.f32 %v1976_v18, %v1975_v36  ;;  %v2028_v43 = vpop.f32.mrf.mxu1  ;;  %v1478_v46 = vmax.f32 %v1466_v40, 0.0 }
 0x12a   : > { %v1978_v20 = vpop.f32.mrf.mxu0  ;;  %v2029_v23 = vadd.f32 %v2028_v43, %v2027_v39 }
 0x12b   : > { %v1467_v21 = vadd.f32 %v2525_v35, %v1377_v41  ;;  %v1301_v22 = vadd.f32 %v1977_v42, %v1220_v19  ;;  %v2030_v24 = vpop.f32.mrf.mxu1  ;;  %v1231_v19 = vadd.f32 %v1934_v50, %v1882_v49 }
 0x12c   : > { %v1979_v45 = vpop.f32.mrf.mxu0 }
 0x12d   : > { %v1479_v47 = vmax.f32 %v1467_v21, 0.0  ;;  %v1382_v13 = vadd.f32 %v2029_v23, %v1301_v22  ;;  %v1980_v14 = vadd.f32 %v1979_v45, %v1978_v20  ;;  %v2031_v27 = vpop.f32.mrf.mxu1 }
 0x12e   : > { %v1981_v28 = vpop.f32.mrf.mxu0  ;;  %v2032_v31 = vadd.f32 %v2031_v27, %v2030_v24 }
 0x12f   : > { %v1817_v29 = vpack.c.bf16 %v1479_v47, %v1478_v46  ;;  %v1304_v30 = vadd.f32 %v1980_v14, %v1223_v25  ;;  %v2033_v48 = vpop.f32.mrf.mxu1  ;;  %v1468_v33 = vadd.f32 %v2525_v35, %v1382_v13  ;;  %v1888_v25 = vadd.f32 %v2486_v62, %v2482_v60 }
 0x130   : > { %v1982_v51 = vpop.f32.mrf.mxu0  ;;  %v1891_v60 = vadd.f32 %v2494_v2, %v2490_v0  ;;  %v1946_v0 = vadd.f32 %v2504_v7, %v2500_v5  ;;  %v1949_v5 = vadd.f32 %v2512_v11, %v2508_v9 }
 0x131   : > { %1818 = vst [vmem:[%s2537_s16] sm:$0xff] %v1817_v29   ;;  %v1385_v34 = vadd.f32 %v2032_v31, %v1304_v30  ;;  %v1983_v36 = vadd.f32 %v1982_v51, %v1981_v28  ;;  %v2034_v37 = vpop.f32.mrf.mxu1  ;;  %v1480_v55 = vmax.f32 %v1468_v33, 0.0  ;;  %v1239_v28 = vadd.f32 %v1940_v56, %v1888_v25 }
 0x132   : > { %v1984_v38 = vpop.f32.mrf.mxu0  ;;  %v2035_v16 = vadd.f32 %v2034_v37, %v2033_v48  ;;  %v1244_v1 = vadd.f32 %v1943_v61, %v1891_v60 }
 0x133   : > { %v1469_v39 = vadd.f32 %v2525_v35, %v1385_v34  ;;  %v1309_v15 = vadd.f32 %v1983_v36, %v1228_v32  ;;  %v2036_v18 = vpop.f32.mrf.mxu1  ;;  %v1894_v34 = vadd.f32 %v2502_v6, %v2498_v4  ;;  %v1897_v4 = vadd.f32 %v2510_v10, %v2506_v8 }
 0x134   : > { %v1985_v54 = vpop.f32.mrf.mxu0 }
 0x135   : > { %v1481_v40 = vmax.f32 %v1469_v39, 0.0  ;;  %v1390_v41 = vadd.f32 %v2035_v16, %v1309_v15  ;;  %v1986_v42 = vadd.f32 %v1985_v54, %v1984_v38  ;;  %v2037_v43 = vpop.f32.mrf.mxu1  ;;  %v1247_v52 = vadd.f32 %v1946_v0, %v1894_v34 }
 0x136   : > { %v1987_v20 = vpop.f32.mrf.mxu0  ;;  %v2038_v23 = vadd.f32 %v2037_v43, %v2036_v18  ;;  %v1252_v9 = vadd.f32 %v1949_v5, %v1897_v4 }
 0x137   : > { %v1822_v21 = vpack.c.bf16 %v1481_v40, %v1480_v55  ;;  %v1312_v22 = vadd.f32 %v1986_v42, %v1231_v19  ;;  %v2039_v24 = vpop.f32.mrf.mxu1  ;;  %v1470_v59 = vadd.f32 %v2525_v35, %v1390_v41 }
 0x138   : > { %v1988_v58 = vpop.f32.mrf.mxu0 }
 0x139   : > { %1844 = vst [vmem:[%s2537_s16 + $0x8] sm:$0xff] %v1822_v21   ;;  %v1393_v26 = vadd.f32 %v2038_v23, %v1312_v22  ;;  %v1989_v44 = vadd.f32 %v1988_v58, %v1987_v20  ;;  %v2040_v45 = vpop.f32.mrf.mxu1  ;;  %v1482_v63 = vmax.f32 %v1470_v59, 0.0  ;;  %v2598_v22 = vld [vmem:[#allocation4_spill] sm:$0xff] }
 0x13a   : > { %v1990_v46 = vpop.f32.mrf.mxu0  ;;  %v2041_v14 = vadd.f32 %v2040_v45, %v2039_v24  ;;  %v1900_v23 = vadd.f32 %v2598_v22, %v2514_v12  ;;  %v2599_v24 = vld [vmem:[#allocation3_spill] sm:$0xff] }
 0x13b   : > { %v1471_v47 = vadd.f32 %v2525_v35, %v1393_v26  ;;  %v1317_v13 = vadd.f32 %v1989_v44, %v1236_v57  ;;  %v2042_v27 = vpop.f32.mrf.mxu1  ;;  %v1952_v8 = vadd.f32 %v2520_v17, %v2599_v24 }
 0x13c   : > { %v1991_v62 = vpop.f32.mrf.mxu0 }
 0x13d   : > { %v1483_v29 = vmax.f32 %v1471_v47, 0.0  ;;  %v1398_v30 = vadd.f32 %v2041_v14, %v1317_v13  ;;  %v1992_v31 = vadd.f32 %v1991_v62, %v1990_v46  ;;  %v2043_v48 = vpop.f32.mrf.mxu1  ;;  %v1255_v46 = vadd.f32 %v1952_v8, %v1900_v23 }
 0x13e   : > { %v1993_v49 = vpop.f32.mrf.mxu0  ;;  %v2044_v32 = vadd.f32 %v2043_v48, %v2042_v27 }
 0x13f   : > { %v1827_v50 = vpack.c.bf16 %v1483_v29, %v1482_v63  ;;  %v1320_v51 = vadd.f32 %v1992_v31, %v1239_v28  ;;  %v2045_v33 = vpop.f32.mrf.mxu1  ;;  %v1472_v3 = vadd.f32 %v2525_v35, %v1398_v30 }
 0x140   : > { %v1994_v2 = vpop.f32.mrf.mxu0 }
 0x141   : > { %1845 = vst [vmem:[%s2537_s16 + $0x10] sm:$0xff] %v1827_v50   ;;  %v1401_v36 = vadd.f32 %v2044_v32, %v1320_v51  ;;  %v1995_v37 = vadd.f32 %v1994_v2, %v1993_v49  ;;  %v2046_v38 = vpop.f32.mrf.mxu1  ;;  %v1484_v7 = vmax.f32 %v1472_v3, 0.0 }
 0x142   : > { %v1996_v39 = vpop.f32.mrf.mxu0  ;;  %v2047_v18 = vadd.f32 %v2046_v38, %v2045_v33 }
 0x143   : > { %v1473_v15 = vadd.f32 %v2525_v35, %v1401_v36  ;;  %v1325_v16 = vadd.f32 %v1995_v37, %v1244_v1  ;;  %v2048_v19 = vpop.f32.mrf.mxu1 }
 0x144   : > { %v1997_v6 = vpop.f32.mrf.mxu0 }
 0x145   : > { %v1485_v53 = vmax.f32 %v1473_v15, 0.0  ;;  %v1406_v54 = vadd.f32 %v2047_v18, %v1325_v16  ;;  %v1998_v55 = vadd.f32 %v1997_v6, %v1996_v39  ;;  %v2049_v40 = vpop.f32.mrf.mxu1 }
 0x146   : > { %v1999_v41 = vpop.f32.mrf.mxu0  ;;  %v2050_v20 = vadd.f32 %v2049_v40, %v2048_v19 }
 0x147   : > { %v1832_v42 = vpack.c.bf16 %v1485_v53, %v1484_v7  ;;  %v1328_v43 = vadd.f32 %v1998_v55, %v1247_v52  ;;  %v2051_v21 = vpop.f32.mrf.mxu1  ;;  %v1474_v11 = vadd.f32 %v2525_v35, %v1406_v54 }
 0x148   : > { %v2000_v10 = vpop.f32.mrf.mxu0 }
 0x149   : > { %1846 = vst [vmem:[%s2537_s16 + $0x18] sm:$0xff] %v1832_v42   ;;  %v1409_v25 = vadd.f32 %v2050_v20, %v1328_v43  ;;  %v2001_v56 = vadd.f32 %v2000_v10, %v1999_v41  ;;  %v2052_v58 = vpop.f32.mrf.mxu1  ;;  %v1486_v47 = vmax.f32 %v1474_v11, 0.0 }
 0x14a   : > { %v2002_v57 = vpop.f32.mrf.mxu0  ;;  %v2053_v44 = vadd.f32 %v2052_v58, %v2051_v21 }
 0x14b   : > { %v1475_v59 = vadd.f32 %v2525_v35, %v1409_v25  ;;  %v1333_v26 = vadd.f32 %v2001_v56, %v1252_v9  ;;  %v2054_v45 = vpop.f32.mrf.mxu1 }
 0x14c   : > { %v2003_v12 = vpop.f32.mrf.mxu0 }
 0x14d   : > { %v1487_v17 = vmax.f32 %v1475_v59, 0.0  ;;  %v1414_v13 = vadd.f32 %v2053_v44, %v1333_v26  ;;  %v2004_v14 = vadd.f32 %v2003_v12, %v2002_v57  ;;  %v2055_v27 = vpop.f32.mrf.mxu1 }
 0x14e   : > { %v2056_v61 = vadd.f32 %v2055_v27, %v2054_v45 }
 0x14f   : > { %v1837_v28 = vpack.c.bf16 %v1487_v17, %v1486_v47  ;;  %v1336_v60 = vadd.f32 %v2004_v14, %v1255_v46  ;;  %v1476_v62 = vadd.f32 %v2525_v35, %v1414_v13 }
 0x151   : > { %1847 = vst [vmem:[%s2537_s16 + $0x20] sm:$0xff] %v1837_v28   ;;  %v1417_v63 = vadd.f32 %v2056_v61, %v1336_v60  ;;  %v1488_v30 = vmax.f32 %v1476_v62, 0.0 }
 0x153   : > { %v1477_v29 = vadd.f32 %v2525_v35, %v1417_v63 }
 0x155   : > { %v1489_v31 = vmax.f32 %v1477_v29, 0.0 }
 0x157   : > { %v1842_v48 = vpack.c.bf16 %v1489_v31, %v1488_v30 }
 0x159   : > { %1848 = vst [vmem:[%s2537_s16 + $0x28] sm:$0xff] %v1842_v48  }
 0x15a PF: > { %s13_s14 = sadd.s32 1, %s2167_s14   ;;  %s2600_s12 = smov %s2163_s13 }
 0x15b   : > { %p10_p5 = scmp.ge.s32.totalorder %s13_s14, 4   ;;  %s2601_s13 = smov %s2603_s15 }
 0x15d   :  { %12 = sbr.rel (!%p10_p5) target bundleno = 2 (0x2), region = 76 }

// kernel: forward.8
= control target key start
LH: loop header
LB: loop body
LE: loop exit
PB: predicated region body
PF: predicated region fallthrough
CT: control target
= control target key end

     0   :  { %s1309_s12 = smov 0   ;;  %s1311_s13 = smov 0   ;;  %s1470_s0 = inlined_call_operand.vmem [shape: bf16[128,1152], index: 0, kind: input, shape index: {}]   ;;  %s1471_s1 = inlined_call_operand.vmem [shape: bf16[1152,128], index: 1, kind: input, shape index: {}]   ;;  %s1472_s2 = inlined_call_operand.vmem [shape: f32[1,128], index: 2, kind: input, shape index: {}]   ;;  %s1473_s3 = inlined_call_operand.vmem [shape: bf16[128,128], index: 3, kind: output, shape index: {}]  }
   0x1   :  { %s1313_s14 = smov 0   ;;  %s1315_s15 = smov 0  }
   0x2   :  { %s1317_s16 = smov 0   ;;  %s1319_s17 = smov 0  }
   0x3   :  { %s1321_s18 = smov 0  }
   0x4 LB: > { %s25_s19 = sadd.s32 1, %s1278_s16  ;;  %s32_s20 = sadd.s32 1, %s1282_s17  ;;  %s1286_s18 = sphi %s1321_s18, %s13_s18   ;;  %s1282_s17 = sphi %s1319_s17, %s1479_s17   ;;  %s1278_s16 = sphi %s1317_s16, %s1478_s16   ;;  %s1274_s15 = sphi %s1315_s15, %s1477_s15   ;;  %s1270_s14 = sphi %s1313_s14, %s1476_s14   ;;  %s1266_s13 = sphi %s1311_s13, %s1475_s13   ;;  %s1262_s12 = sphi %s1309_s12, %s1474_s12  }
   0x5   : > { %p26_p0 = scmp.ge.s32.totalorder %s25_s19, 3  ;;  %p48_p1 = scmp.ne.s32.totalorder %s1266_s13, %s1262_s12 }
   0x6   : > { %p49_p2 = scmp.eq.s32.totalorder %s1286_s18, 0  ;;  %s41_s24 = sadd.s32 1, %s1266_s13 }
   0x7   : > { %s1481_s19 = smov (%p26_p0, %s25_s19), 0  ;;  %s1483_s20 = smov (!%p26_p0, %s32_s20), %s1282_s17 }
   0x8   : > { %p50_p3 = por %p49_p2, %p48_p1  ;;  %p34_p4 = scmp.ge.s32.totalorder %s1483_s20, 2 }
   0x9   : > { %s37_s21 = ssub.s32 %s1278_s16, %s1481_s19  ;;  %p952_p6 = scmp.ge.s32.totalorder %s1286_s18, 6 }
   0xa   : > { %s1485_s20 = smov (%p34_p4, %s1483_s20), 0 }
   0xb   : > { %s36_s22 = ssub.s32 %s1282_s17, %s1485_s20  ;;  %162 = sbr.rel (%p952_p6) target bundleno = 34 (0x22), region = 20 }
   0xc   : > { %s38_s23 = sor.u32 %s37_s21, %s36_s22 }
   0xd   : > { %p39_p5 = scmp.eq.s32.totalorder %s38_s23, 0 }
   0xf   : > { %s1360_s25 = scalar_select %p39_p5, %s1266_s13, %s41_s24  }
  0x10   : > { %165 = sbr.rel (!%p50_p3) target bundleno = 34 (0x22), region = 24  ;;  %s167_s26 = sand.u32 (%p50_p3), 1, %s1266_s13  }
  0x11   : > { %s171_s27 = smul.u32 (%p50_p3), 3, %s1278_s16 }
  0x12   : > { %s1132_s28 = smul.u32 (%p50_p3), 96, %s167_s26 }
  0x13   : > { %s1133_s29 = smul.u32 (%p50_p3), 72, %s1282_s17 }
  0x14   : > { %s169_s8 = scalar_lea.vmem (%p50_p3), [#allocation3], %s1132_s28 }
  0x15   : > { %s173_s30 = sadd.s32 %s1133_s29, %s171_s27 }
  0x16   : > { %s955_s4 = sshll.u32 %s173_s30, 2 }
  0x17   : > { %s1369_s7 = scalar_lea.vmem %s1470_s0, %s955_s4 }
  0x18   : > { %v190_v0 = vld [vmem:[%s1369_s7] sm:$0xff]  ;;  %v194_v2 = vld [vmem:[%s1369_s7 + $0x48] sm:$0xff]  ;;  %v198_v4 = vld [vmem:[%s1369_s7 + $0x90] sm:$0xff] }
  0x19   : > { %v192_v1 = vld [vmem:[%s1369_s7 + $0x24] sm:$0xff]  ;;  %191 = vst [vmem:[%s169_s8] sm:$0xff] %v190_v0  ;;  %195 = vst [vmem:[%s169_s8 + $0x18] sm:$0xff] %v194_v2  ;;  %v196_v3 = vld [vmem:[%s1369_s7 + $0x6c] sm:$0xff] }
  0x1a   : > { %193 = vst [vmem:[%s169_s8 + $0xc] sm:$0xff] %v192_v1  ;;  %v200_v5 = vld [vmem:[%s1369_s7 + $0xb4] sm:$0xff]  ;;  %197 = vst [vmem:[%s169_s8 + $0x24] sm:$0xff] %v196_v3  ;;  %v204_v7 = vld [vmem:[%s1369_s7 + $0xfc] sm:$0xff] }
  0x1b   : > { %199 = vst [vmem:[%s169_s8 + $0x30] sm:$0xff] %v198_v4  ;;  %201 = vst [vmem:[%s169_s8 + $0x3c] sm:$0xff] %v200_v5  ;;  %v202_v6 = vld [vmem:[%s1369_s7 + $0xd8] sm:$0xff]  ;;  %v956_v8 = vld [vmem:[%s1369_s7 + $0x8] sm:$0xf] }
  0x1c   : > { %203 = vst [vmem:[%s169_s8 + $0x48] sm:$0xff] %v202_v6  ;;  %205 = vst [vmem:[%s169_s8 + $0x54] sm:$0xff] %v204_v7  ;;  %v958_v9 = vld [vmem:[%s1369_s7 + $0x2c] sm:$0xf]  ;;  %v960_v10 = vld [vmem:[%s1369_s7 + $0x50] sm:$0xf] }
  0x1d   : > { %957 = vst [vmem:[%s169_s8 + $0x8] sm:$0xf] %v956_v8  ;;  %v962_v11 = vld [vmem:[%s1369_s7 + $0x74] sm:$0xf]  ;;  %959 = vst [vmem:[%s169_s8 + $0x14] sm:$0xf] %v958_v9 }
  0x1e   : > { %961 = vst [vmem:[%s169_s8 + $0x20] sm:$0xf] %v960_v10  ;;  %963 = vst [vmem:[%s169_s8 + $0x2c] sm:$0xf] %v962_v11  ;;  %v964_v12 = vld [vmem:[%s1369_s7 + $0x98] sm:$0xf] }
  0x1f   : > { %v966_v13 = vld [vmem:[%s1369_s7 + $0xbc] sm:$0xf]  ;;  %v968_v14 = vld [vmem:[%s1369_s7 + $0xe0] sm:$0xf]  ;;  %965 = vst [vmem:[%s169_s8 + $0x38] sm:$0xf] %v964_v12 }
  0x20   : > { %967 = vst [vmem:[%s169_s8 + $0x44] sm:$0xf] %v966_v13  ;;  %969 = vst [vmem:[%s169_s8 + $0x50] sm:$0xf] %v968_v14  ;;  %v970_v15 = vld [vmem:[%s1369_s7 + $0x104] sm:$0xf] }
  0x21   : > { %971 = vst [vmem:[%s169_s8 + $0x5c] sm:$0xf] %v970_v15 }
  0x22 PF: > { %p972_p7 = scmp.ge.s32.totalorder %s1286_s18, 1  ;;  %p246_p8 = scmp.lt.s32.totalorder %s1286_s18, 7 }
  0x24   : > { %p247_p9 = pnand %p972_p7, %p246_p8 }
  0x25   : > { %s253_s9 = sand.u32 (!%p247_p9), 1, %s1262_s12   ;;  %s292_s10 = smul.u32 (!%p247_p9), 48, %s1270_s14 }
  0x26   : > { %250 = sbr.rel (%p247_p9) target bundleno = 333 (0x14d), region = 54  ;;  %s974_s21 = sshll.u32 (!%p247_p9), %s1274_s15, 3 }
  0x27   : > { %s1134_s11 = smul.u32 (!%p247_p9), 96, %s253_s9  ;;  %p293_p10 = scmp.lt.s32.totalorder (!%p247_p9), %s292_s10, 143 }
  0x28   : > { %p305_p11 = scmp.lt.s32.totalorder (!%p247_p9), %s974_s21, 15  ;;  %p976_p12 = scmp.ne.s32.totalorder (!%p247_p9), %s1270_s14, 0 }
  0x29   : > { %s1402_s12 = scalar_lea.vmem (!%p247_p9), [#allocation3], %s1134_s11 }
  0x2b   : > { %s1487_s10 = smov (!%p293_p10, %s292_s10), 143  ;;  %s1489_s21 = smov (!%p305_p11, %s974_s21), 15 }
  0x2c   : > { %s973_s22 = sshll.u32 %s1487_s10, 2  ;;  %s975_s27 = sshll.u32 %s1489_s21, 2 }
  0x2d   : > { %s1395_s26 = scalar_lea.vmem %s1471_s1, %s973_s22  ;;  %s1400_s30 = scalar_lea.vmem %s1473_s3, %s975_s27 }
  0x2e   : > { %317 = sbr.rel (%p976_p12) target bundleno = 56 (0x38), region = 62 }
  0x33   : > { %v1288_v16 = vmov 0.0  }
  0x34   : > { %318 = vst [vmem:[#allocation2 + $0x30] sm:$0xff] %v1288_v16  ;;  %319 = vst [vmem:[#allocation2] sm:$0xff] %v1288_v16 }
  0x35   : > { %320 = vst [vmem:[#allocation2 + $0x18] sm:$0xff] %v1288_v16  ;;  %321 = vst [vmem:[#allocation2 + $0x10] sm:$0xff] %v1288_v16 }
  0x36   : > { %322 = vst [vmem:[#allocation2 + $0x8] sm:$0xff] %v1288_v16  ;;  %323 = vst [vmem:[#allocation2 + $0x20] sm:$0xff] %v1288_v16 }
  0x37   : > { %324 = vst [vmem:[#allocation2 + $0x28] sm:$0xff] %v1288_v16  ;;  %325 = vst [vmem:[#allocation2 + $0x38] sm:$0xff] %v1288_v16 }
  0x38 PF: > { %v1192_v17 = vld [vmem:[%s1395_s26 + $0x78] sm:$0xff]   ;;  %v1195_v20 = vld [vmem:[%s1395_s26 + $0x70] sm:$0xff]   ;;  %v1198_v23 = vld [vmem:[%s1395_s26 + $0x68] sm:$0xff]   ;;  %p1013_p13 = scmp.ne.s32.totalorder %s1270_s14, 2 }
  0x39   : > { %v1193_v18 = vld [vmem:[%s1395_s26 + $0x38] sm:$0xff]   ;;  %1056 = vmatprep.subr.bf16.mxu0 %v1192_v17  ;;  %v1196_v21 = vld [vmem:[%s1395_s26 + $0x30] sm:$0xff]   ;;  %v1199_v24 = vld [vmem:[%s1395_s26 + $0x28] sm:$0xff]  }
  0x3a   : > { %v1194_v19 = vld [vmem:[%s1395_s26 + $0xb8] sm:$0xff]   ;;  %1057 = vmatpush3.bf16.msra.mxu0 %v1193_v18  ;;  %v1197_v22 = vld [vmem:[%s1395_s26 + $0xb0] sm:$0xff]   ;;  %v1200_v25 = vld [vmem:[%s1395_s26 + $0xa8] sm:$0xff]  }
  0x3b   : > { %1108 = vmatprep.subr.bf16.mxu1 %v1194_v19  ;;  %1058 = vmatprep.subr.bf16.mxu0 %v1195_v20  ;;  %v1201_v26 = vld [vmem:[%s1395_s26 + $0x60] sm:$0xff]   ;;  %v1204_v29 = vld [vmem:[%s1395_s26 + $0x58] sm:$0xff]   ;;  %v1207_v32 = vld [vmem:[%s1395_s26 + $0x50] sm:$0xff]  }
  0x3c   : > { %1109 = vmatpush3.bf16.msra.mxu1 %v1194_v19  ;;  %v1202_v27 = vld [vmem:[%s1395_s26 + $0x20] sm:$0xff]   ;;  %v1206_v30 = vld [vmem:[%s1395_s26 + $0x98] sm:$0xff]   ;;  %v1209_v33 = vld [vmem:[%s1395_s26 + $0x90] sm:$0xff]  }
  0x3d   : > { %1110 = vmatprep.subr.bf16.mxu1 %v1197_v22  ;;  %v1203_v28 = vld [vmem:[%s1395_s26 + $0xa0] sm:$0xff]   ;;  %v1205_v31 = vld [vmem:[%s1395_s26 + $0x18] sm:$0xff]   ;;  %v1208_v34 = vld [vmem:[%s1395_s26 + $0x10] sm:$0xff]  }
  0x3e   : > { %1059 = vmatpush3.bf16.msra.mxu0 %v1196_v21  ;;  %v1210_v35 = vld [vmem:[%s1395_s26 + $0x48] sm:$0xff]   ;;  %v1213_v38 = vld [vmem:[%s1395_s26 + $0x40] sm:$0xff]   ;;  %v1228_v49 = vld [vmem:[%s1402_s12 + $0x50] ss:$12 sps:$4 sm:$0xff]  }
  0x3f   : > { %1060 = vmatprep.subr.bf16.mxu0 %v1198_v23  ;;  %v1211_v36 = vld [vmem:[%s1395_s26 + $0x8] sm:$0xff]   ;;  %v1215_v39 = vld [vmem:[%s1395_s26 + $0x80] sm:$0xff]   ;;  %v1226_v50 = vld [vmem:[%s1402_s12 + $0x30] ss:$12 sps:$4 sm:$0xff]  }
  0x40   : > { %1111 = vmatpush3.bf16.msra.mxu1 %v1197_v22  ;;  %v1212_v37 = vld [vmem:[%s1395_s26 + $0x88] sm:$0xff]   ;;  %v1218_v40 = vld [vmem:[%s1402_s12 + $0x4] ss:$12 sps:$4 sm:$0xff]   ;;  %v1224_v48 = vld [vmem:[%s1402_s12 + $0x34] ss:$12 sps:$4 sm:$0xff]  }
  0x41   : > { %1112 = vmatprep.subr.bf16.mxu1 %v1200_v25  ;;  %v1219_v41 = vld [vmem:[%s1402_s12 + $0x8] ss:$12 sps:$4 sm:$0xff]   ;;  %v1214_v42 = vld [vmem:[%s1395_s26] sm:$0xff]   ;;  %638 = vmatprep.mubr.bf16.mxu0 %v1218_v40  ;;  %v1229_v51 = vld [vmem:[%s1402_s12 + $0x4c] ss:$12 sps:$4 sm:$0xff]  }
  0x42   : > { %1061 = vmatpush3.bf16.msra.mxu0 %v1199_v24  ;;  %1124 = vmatprep.mubr.bf16.mxu1 %v1219_v41  ;;  %v1216_v43 = vld [vmem:[%s1402_s12] ss:$12 sps:$4 sm:$0xff]   ;;  %v1221_v44 = vld [vmem:[%s1402_s12 + $0x1c] ss:$12 sps:$4 sm:$0xff]   ;;  %v1227_v46 = vld [vmem:[%s1402_s12 + $0x38] ss:$12 sps:$4 sm:$0xff]  }
  0x43   : > { %1062 = vmatprep.subr.bf16.mxu0 %v1201_v26  ;;  %v1220_v45 = vld [vmem:[%s1402_s12 + $0x20] ss:$12 sps:$4 sm:$0xff]   ;;  %v1223_v47 = vld [vmem:[%s1402_s12 + $0x18] ss:$12 sps:$4 sm:$0xff]   ;;  %v1231_v52 = vld [vmem:[%s1402_s12 + $0x48] ss:$12 sps:$4 sm:$0xff]  }
  0x44   : > { %1113 = vmatpush3.bf16.msra.mxu1 %v1200_v25  ;;  %v326_v58 = vld [vmem:[#allocation2 + $0x30] sm:$0xff]  ;;  %v327_v2 = vld [vmem:[#allocation2] sm:$0xff]  ;;  %v328_v9 = vld [vmem:[#allocation2 + $0x18] sm:$0xff] }
  0x45   : > { %1114 = vmatprep.subr.bf16.mxu1 %v1203_v28  ;;  %v329_v16 = vld [vmem:[#allocation2 + $0x10] sm:$0xff]  ;;  %v330_v24 = vld [vmem:[#allocation2 + $0x8] sm:$0xff] }
  0x46   : > { %1063 = vmatpush3.bf16.msra.mxu0 %v1202_v27 }
  0x47   : > { %1064 = vmatprep.subr.bf16.mxu0 %v1204_v29 }
  0x48   : > { %1115 = vmatpush3.bf16.msra.mxu1 %v1203_v28 }
  0x49   : > { %1116 = vmatprep.subr.bf16.mxu1 %v1206_v30 }
  0x4a   : > { %1065 = vmatpush3.bf16.msra.mxu0 %v1205_v31  ;;  %v331_v31 = vld [vmem:[#allocation2 + $0x20] sm:$0xff] }
  0x4b   : > { %1066 = vmatprep.subr.bf16.mxu0 %v1207_v32 }
  0x4c   : > { %1117 = vmatpush3.bf16.msra.mxu1 %v1206_v30 }
  0x4d   : > { %1118 = vmatprep.subr.bf16.mxu1 %v1209_v33 }
  0x4e   : > { %1067 = vmatpush3.bf16.msra.mxu0 %v1208_v34 }
  0x4f   : > { %1068 = vmatprep.subr.bf16.mxu0 %v1210_v35 }
  0x50   : > { %1119 = vmatpush3.bf16.msra.mxu1 %v1209_v33 }
  0x51   : > { %1120 = vmatprep.subr.bf16.mxu1 %v1212_v37 }
  0x52   : > { %1069 = vmatpush3.bf16.msra.mxu0 %v1211_v36  ;;  %v332_v36 = vld [vmem:[#allocation2 + $0x28] sm:$0xff] }
  0x53   : > { %1070 = vmatprep.subr.bf16.mxu0 %v1213_v38 }
  0x54   : > { %1121 = vmatpush3.bf16.msra.mxu1 %v1212_v37 }
  0x55   : > { %1122 = vmatprep.subr.bf16.mxu1 %v1215_v39 }
  0x56   : > { %1071 = vmatpush3.bf16.msra.mxu0 %v1214_v42  ;;  %v333_v42 = vld [vmem:[#allocation2 + $0x38] sm:$0xff] }
  0x58   : > { %1123 = vmatpush3.bf16.msra.mxu1 %v1215_v39 }
  0x59   : > { %639 = vmatmul.mubr.bf16.vlgmr.msra.gmra.mxu0 %v1216_v43 }
  0x5a   : > { %646 = vmatprep.mubr.bf16.mxu0 %v1221_v44 }
  0x5b   : > { %1125 = vmatmul.mubr.bf16.vlgmr.msra.gmra.mxu1 %v1220_v45 }
  0x5c   : > { %1128 = vmatprep.mubr.bf16.mxu1 %v1227_v46 }
  0x61   : > { %647 = vmatmul.mubr.bf16.gmra.mxu0 %v1223_v47 }
  0x62   : > { %654 = vmatprep.mubr.bf16.mxu0 %v1224_v48 }
  0x63   : > { %1129 = vmatmul.mubr.bf16.gmra.mxu1 %v1228_v49 }
  0x69   : > { %655 = vmatmul.mubr.bf16.gmra.mxu0 %v1226_v50 }
  0x6a   : > { %662 = vmatprep.mubr.bf16.mxu0 %v1229_v51 }
  0x71   : > { %663 = vmatmul.mubr.bf16.gmra.mxu0 %v1231_v52 }
 0x119   : > { %v1072_v53 = vpop.f32.mrf.mxu0 }
 0x11b   : > { %v1073_v54 = vpop.f32.mrf.mxu0  ;;  %v1126_v55 = vpop.f32.mrf.mxu1 }
 0x11c   : > { %v1074_v56 = vadd.f32 %v1073_v54, %v1072_v53 }
 0x11d   : > { %v1075_v57 = vpop.f32.mrf.mxu0  ;;  %v705_v59 = vpop.f32.mrf.mxu1 }
 0x11e   : > { %v706_v60 = vadd.f32 %v1074_v56, %v705_v59 }
 0x11f   : > { %v1076_v61 = vpop.f32.mrf.mxu0  ;;  %v1127_v62 = vpop.f32.mrf.mxu1 }
 0x120   : > { %v736_v63 = vadd.f32 %v706_v60, %v326_v58  ;;  %v1077_v0 = vadd.f32 %v1076_v61, %v1075_v57 }
 0x121   : > { %v1078_v1 = vpop.f32.mrf.mxu0  ;;  %v708_v3 = vpop.f32.mrf.mxu1 }
 0x122   : > { %744 = vst [vmem:[#allocation2 + $0x30] sm:$0xff] %v736_v63  ;;  %v709_v4 = vadd.f32 %v1077_v0, %v708_v3 }
 0x123   : > { %v1079_v5 = vpop.f32.mrf.mxu0  ;;  %v1130_v6 = vpop.f32.mrf.mxu1 }
 0x124   : > { %v737_v7 = vadd.f32 %v709_v4, %v327_v2  ;;  %v1080_v8 = vadd.f32 %v1079_v5, %v1078_v1 }
 0x125   : > { %v1081_v10 = vpop.f32.mrf.mxu0  ;;  %v721_v13 = vpop.f32.mrf.mxu1 }
 0x126   : > { %745 = vst [vmem:[#allocation2] sm:$0xff] %v737_v7  ;;  %v714_v11 = vadd.f32 %v1126_v55, %v1080_v8 }
 0x127   : > { %v1082_v12 = vpop.f32.mrf.mxu0  ;;  %v1131_v20 = vpop.f32.mrf.mxu1 }
 0x128   : > { %v738_v14 = vadd.f32 %v714_v11, %v328_v9  ;;  %v1083_v15 = vadd.f32 %v1082_v12, %v1081_v10 }
 0x129   : > { %v1084_v17 = vpop.f32.mrf.mxu0  ;;  %v724_v27 = vpop.f32.mrf.mxu1 }
 0x12a   : > { %746 = vst [vmem:[#allocation2 + $0x18] sm:$0xff] %v738_v14  ;;  %v717_v18 = vadd.f32 %v1127_v62, %v1083_v15 }
 0x12b   : > { %v1085_v19 = vpop.f32.mrf.mxu0 }
 0x12c   : > { %v739_v21 = vadd.f32 %v717_v18, %v329_v16  ;;  %v1086_v22 = vadd.f32 %v1085_v19, %v1084_v17 }
 0x12d   : > { %v1087_v23 = vpop.f32.mrf.mxu0 }
 0x12e   : > { %747 = vst [vmem:[#allocation2 + $0x10] sm:$0xff] %v739_v21  ;;  %v722_v25 = vadd.f32 %v1086_v22, %v721_v13 }
 0x12f   : > { %v1088_v26 = vpop.f32.mrf.mxu0 }
 0x130   : > { %v740_v28 = vadd.f32 %v722_v25, %v330_v24  ;;  %v1089_v29 = vadd.f32 %v1088_v26, %v1087_v23 }
 0x131   : > { %v1090_v30 = vpop.f32.mrf.mxu0 }
 0x132   : > { %748 = vst [vmem:[#allocation2 + $0x8] sm:$0xff] %v740_v28  ;;  %v725_v32 = vadd.f32 %v1089_v29, %v724_v27 }
 0x133   : > { %v1091_v33 = vpop.f32.mrf.mxu0 }
 0x134   : > { %v741_v34 = vadd.f32 %v725_v32, %v331_v31  ;;  %v1092_v35 = vadd.f32 %v1091_v33, %v1090_v30 }
 0x135   : > { %v1093_v37 = vpop.f32.mrf.mxu0 }
 0x136   : > { %749 = vst [vmem:[#allocation2 + $0x20] sm:$0xff] %v741_v34  ;;  %v730_v38 = vadd.f32 %v1130_v6, %v1092_v35 }
 0x137   : > { %v1094_v39 = vpop.f32.mrf.mxu0 }
 0x138   : > { %v742_v40 = vadd.f32 %v730_v38, %v332_v36  ;;  %v1095_v41 = vadd.f32 %v1094_v39, %v1093_v37 }
 0x13a   : > { %750 = vst [vmem:[#allocation2 + $0x28] sm:$0xff] %v742_v40  ;;  %v733_v43 = vadd.f32 %v1131_v20, %v1095_v41  ;;  %755 = sbr.rel (%p1013_p13) target bundleno = 333 (0x14d), region = 66 }
 0x13c   : > { %v743_v44 = vadd.f32 %v733_v43, %v333_v42 }
 0x13e   : > { %751 = vst [vmem:[#allocation2 + $0x38] sm:$0xff] %v743_v44 }
 0x13f   : > { %v756_v45 = vld [vmem:[#allocation2 + $0x30] sm:$0xff]  ;;  %v757_v46 = vld [vmem:[#allocation2] sm:$0xff]  ;;  %v758_v50 = vld [vmem:[#allocation2 + $0x18] sm:$0xff] }
 0x140   : > { %v1014_v47 = vld [vmem:[%s1472_s2] ss:$0 sm:$0xff]  ;;  %v759_v51 = vld [vmem:[#allocation2 + $0x10] sm:$0xff]  ;;  %v760_v52 = vld [vmem:[#allocation2 + $0x8] sm:$0xff] }
 0x141   : > { %v771_v48 = vadd.f32 %v1014_v47, %v756_v45  ;;  %v772_v49 = vadd.f32 %v1014_v47, %v757_v46  ;;  %v773_v53 = vadd.f32 %v1014_v47, %v758_v50  ;;  %v774_v54 = vadd.f32 %v1014_v47, %v759_v51  ;;  %v761_v55 = vld [vmem:[#allocation2 + $0x20] sm:$0xff]  ;;  %v762_v57 = vld [vmem:[#allocation2 + $0x28] sm:$0xff] }
 0x142   : > { %v775_v56 = vadd.f32 %v1014_v47, %v760_v52  ;;  %v776_v61 = vadd.f32 %v1014_v47, %v761_v55  ;;  %v777_v62 = vadd.f32 %v1014_v47, %v762_v57 }
 0x143   : > { %v779_v59 = vmax.f32 %v771_v48, 0.0  ;;  %v780_v60 = vmax.f32 %v772_v49, 0.0  ;;  %v781_v63 = vmax.f32 %v773_v53, 0.0  ;;  %v782_v0 = vmax.f32 %v774_v54, 0.0 }
 0x144   : > { %v783_v1 = vmax.f32 %v775_v56, 0.0  ;;  %v784_v4 = vmax.f32 %v776_v61, 0.0  ;;  %v785_v5 = vmax.f32 %v777_v62, 0.0 }
 0x145   : > { %v763_v58 = vld [vmem:[#allocation2 + $0x38] sm:$0xff]  ;;  %v1036_v3 = vpack.c.bf16 %v780_v60, %v779_v59  ;;  %v1041_v6 = vpack.c.bf16 %v782_v0, %v781_v63 }
 0x146   : > { %v778_v2 = vadd.f32 %v1014_v47, %v763_v58  ;;  %v1046_v8 = vpack.c.bf16 %v784_v4, %v783_v1 }
 0x147   : > { %1037 = vst [vmem:[%s1400_s30] sm:$0xff] %v1036_v3   ;;  %1053 = vst [vmem:[%s1400_s30 + $0x8] sm:$0xff] %v1041_v6  }
 0x148   : > { %v786_v7 = vmax.f32 %v778_v2, 0.0  ;;  %1054 = vst [vmem:[%s1400_s30 + $0x10] sm:$0xff] %v1046_v8  }
 0x14a   : > { %v1051_v9 = vpack.c.bf16 %v786_v7, %v785_v5 }
 0x14c   : > { %1055 = vst [vmem:[%s1400_s30 + $0x18] sm:$0xff] %v1051_v9  }
 0x14d PF: > { %s13_s18 = sadd.s32 1, %s1286_s18   ;;  %s1474_s12 = smov %s1266_s13 }
 0x14e   : > { %p10_p0 = scmp.ge.s32.totalorder %s13_s18, 8   ;;  %s1475_s13 = smov %s1360_s25 }
 0x14f   : > { %s1476_s14 = smov %s1278_s16  ;;  %s1477_s15 = smov %s1282_s17 }
 0x150   : > { %s1478_s16 = smov %s1481_s19  ;;  %s1479_s17 = smov %s1485_s20 }
 0x151   :  { %12 = sbr.rel (!%p10_p0) target bundleno = 4 (0x4), region = 113 }

// kernel: forward.9
= control target key start
LH: loop header
LB: loop body
LE: loop exit
PB: predicated region body
PF: predicated region fallthrough
CT: control target
= control target key end

     0   :  { %s4458_s0 = inlined_call_operand.vmem [shape: bf16[16,6272], index: 0, kind: input, shape index: {}]   ;;  %s4459_s1 = inlined_call_operand.vmem [shape: bf16[6272,1024], index: 1, kind: input, shape index: {}]   ;;  %s4460_s2 = inlined_call_operand.vmem [shape: f32[1,1024], index: 2, kind: input, shape index: {}]   ;;  %s4461_s3 = inlined_call_operand.vmem [shape: bf16[16,1024], index: 3, kind: output, shape index: {}]  }
   0x1   :  { %4463 = sst [smem:[#allocation7_spill]] %s4458_s0 }
   0x2   :  { %4464 = sst [smem:[#allocation8_spill]] %s4459_s1 }
   0x3   :  { %s3559_s12 = smov 0   ;;  %s3561_s13 = smov 0  }
   0x4   :  { %s3563_s14 = smov 0   ;;  %s3565_s15 = smov 0  }
   0x5   :  { %s3567_s16 = smov 0   ;;  %s3569_s17 = smov 0  }
   0x6   :  { %s3571_s18 = smov 0   ;;  %s3573_s19 = smov 0  }
   0x7   :  { %s3575_s20 = smov 0   ;;  %s3577_s21 = smov 0  }
   0x8   :  { %s3579_s22 = smov 0  }
   0x9 LB: > { %s2745_s23 = sadd.s32 4294967295, %s3535_s22   ;;  %s25_s24 = sadd.s32 1, %s3527_s20  ;;  %s3535_s22 = sphi %s3579_s22, %s13_s22   ;;  %s3531_s21 = sphi %s3577_s21, %s4481_s21   ;;  %s3527_s20 = sphi %s3575_s20, %s4480_s20   ;;  %s3523_s19 = sphi %s3573_s19, %s4479_s19   ;;  %s3519_s18 = sphi %s3571_s18, %s4478_s18   ;;  %s3515_s17 = sphi %s3569_s17, %s4477_s17   ;;  %s3511_s16 = sphi %s3567_s16, %s4476_s16   ;;  %s3507_s15 = sphi %s3565_s15, %s4475_s15   ;;  %s3503_s14 = sphi %s3563_s14, %s4474_s14   ;;  %s3499_s13 = sphi %s3561_s13, %s4473_s13   ;;  %s3495_s12 = sphi %s3559_s12, %s4472_s12  }
   0xa   : > { %p26_p0 = scmp.ge.s32.totalorder %s25_s24, 7  ;;  %s28_s25 = sadd.s32 1, %s3531_s21 }
   0xb   : > { %s41_s26 = sadd.s32 1, %s3515_s17  ;;  %p48_p1 = scmp.ne.s32.totalorder %s3515_s17, %s3511_s16 }
   0xc   : > { %s4483_s24 = smov (%p26_p0, %s25_s24), 0  ;;  %s4485_s25 = smov (!%p26_p0, %s28_s25), %s3531_s21 }
   0xd   : > { %s37_s27 = ssub.s32 %s3527_s20, %s4483_s24  ;;  %p49_p2 = scmp.eq.s32.totalorder %s3535_s22, 0 }
   0xe   : > { %p30_p3 = scmp.ge.s32.totalorder %s4485_s25, 2  ;;  %p39_p4 = scmp.eq.s32.totalorder %s37_s27, 0 }
   0xf   : > { %p3626_p5 = por %p49_p2, %p48_p1  ;;  %s69_s29 = sadd.s32 1, %s3507_s15 }
  0x10   : > { %s4487_s25 = smov (%p30_p3, %s4485_s25), 0  ;;  %p76_p6 = scmp.ne.s32.totalorder %s3507_s15, %s3503_s14 }
  0x11   : > { %4466 = sst [smem:[#allocation6_spill]] %s4487_s25  ;;  %s65_s4 = ssub.s32 %s3531_s21, %s4487_s25 }
  0x12   : > { %s3634_s30 = scalar_select %p39_p4, %s3515_s17, %s41_s26  }
  0x13   : > { %s66_s5 = sor.u32 %s65_s4, %s37_s27  ;;  %p121_p7 = scmp.eq.s32.totalorder %s65_s4, 0 }
  0x14   : > { %p67_p8 = scmp.eq.s32.totalorder %s66_s5, 0  ;;  %p3640_p9 = por %p76_p6, %p49_p2 }
  0x15   : > { %s123_s7 = sadd.s32 1, %s3499_s13  ;;  %p133_p10 = scmp.ne.s32.totalorder %s3499_s13, %s3495_s12 }
  0x16   : > { %s3648_s8 = scalar_select %p67_p8, %s3507_s15, %s69_s29  }
  0x17   : > { %s3651_s9 = scalar_select %p121_p7, %s3499_s13, %s123_s7  }
  0x18   : > { %p134_p11 = scmp.eq.s32.totalorder %s2745_s23, 13  ;;  %p2748_p13 = scmp.ge.s32.totalorder %s3535_s22, 14 }
  0x1a   : > { %p3653_p12 = por %p134_p11, %p133_p10  ;;  %156 = sbr.rel (%p2748_p13) target bundleno = 166 (0xa6), region = 16 }
  0x1f   : > { %159 = sbr.rel (!%p3626_p5) target bundleno = 44 (0x2c), region = 20  ;;  %s161_s11 = sand.u32 (%p3626_p5), 1, %s3515_s17  }
  0x20   : > { %s3002_s26 = smul.u32 (%p3626_p5), 28, %s3527_s20  ;;  %s4469_s0 = sld [smem:[#allocation7_spill]] (%p3626_p5) }
  0x21   : > { %s3009_s27 = smul.u32 (%p3626_p5), 56, %s161_s11 }
  0x23   : > { %s163_s23 = scalar_lea.vmem (%p3626_p5), [#allocation3], %s3009_s27 }
  0x26   : > { %s169_s5 = scalar_lea.vmem %s4469_s0, %s3002_s26 }
  0x27   : > { %v184_v0 = vld [vmem:[%s169_s5] sm:$0xff]  ;;  %v186_v1 = vld [vmem:[%s169_s5 + $0x8] sm:$0xff]  ;;  %v188_v2 = vld [vmem:[%s169_s5 + $0x10] sm:$0xff] }
  0x28   : > { %185 = vst [vmem:[%s163_s23] sm:$0xff] %v184_v0  ;;  %187 = vst [vmem:[%s163_s23 + $0x8] sm:$0xff] %v186_v1  ;;  %v190_v3 = vld [vmem:[%s169_s5 + $0xc4] sm:$0xff]  ;;  %v192_v4 = vld [vmem:[%s169_s5 + $0xcc] sm:$0xff] }
  0x29   : > { %189 = vst [vmem:[%s163_s23 + $0x10] sm:$0xff] %v188_v2  ;;  %v194_v5 = vld [vmem:[%s169_s5 + $0xd4] sm:$0xff]  ;;  %191 = vst [vmem:[%s163_s23 + $0x1c] sm:$0xff] %v190_v3  ;;  %v2752_v7 = vld [vmem:[%s169_s5 + $0xdc] sm:$0xf] }
  0x2a   : > { %193 = vst [vmem:[%s163_s23 + $0x24] sm:$0xff] %v192_v4  ;;  %195 = vst [vmem:[%s163_s23 + $0x2c] sm:$0xff] %v194_v5  ;;  %v2750_v6 = vld [vmem:[%s169_s5 + $0x18] sm:$0xf] }
  0x2b   : > { %2751 = vst [vmem:[%s163_s23 + $0x18] sm:$0xf] %v2750_v6  ;;  %2753 = vst [vmem:[%s163_s23 + $0x34] sm:$0xf] %v2752_v7 }
  0x2c PF: > { %213 = sbr.rel (!%p3640_p9) target bundleno = 166 (0xa6), region = 46  ;;  %s215_s28 = sand.u32 (%p3640_p9), 1, %s3507_s15  }
  0x2d   : > { %s3010_s7 = smul.u32 (%p3640_p9), 1792, %s215_s28  ;;  %s2754_s11 = sshll.u32 (%p3640_p9), %s3531_s21, 2 }
  0x2e   : > { %s3003_s26 = smul.u32 (%p3640_p9), 896, %s3527_s20  ;;  %s4470_s1 = sld [smem:[#allocation8_spill]] (%p3640_p9) }
  0x2f   : > { %s3678_s6 = scalar_lea.vmem (%p3640_p9), [#allocation4], %s3010_s7 }
  0x30   : > { %s221_s27 = sadd.s32 (%p3640_p9), %s3003_s26, %s2754_s11 }
  0x31   : > { %s2756_s29 = sshll.u32 %s221_s27, 2 }
  0x34   : > { %s3673_s25 = scalar_lea.vmem %s4470_s1, %s2756_s29 }
  0x35   : > { %v236_v8 = vld [vmem:[%s3673_s25] sm:$0xff]  ;;  %v238_v9 = vld [vmem:[%s3673_s25 + $0x8] sm:$0xff] }
  0x36   : > { %v240_v10 = vld [vmem:[%s3673_s25 + $0x20] sm:$0xff]  ;;  %237 = vst [vmem:[%s3678_s6] sm:$0xff] %v236_v8  ;;  %239 = vst [vmem:[%s3678_s6 + $0x8] sm:$0xff] %v238_v9  ;;  %v242_v11 = vld [vmem:[%s3673_s25 + $0x28] sm:$0xff] }
  0x37   : > { %241 = vst [vmem:[%s3678_s6 + $0x10] sm:$0xff] %v240_v10  ;;  %v244_v12 = vld [vmem:[%s3673_s25 + $0x40] sm:$0xff]  ;;  %v246_v13 = vld [vmem:[%s3673_s25 + $0x48] sm:$0xff]  ;;  %243 = vst [vmem:[%s3678_s6 + $0x18] sm:$0xff] %v242_v11 }
  0x38   : > { %245 = vst [vmem:[%s3678_s6 + $0x20] sm:$0xff] %v244_v12  ;;  %247 = vst [vmem:[%s3678_s6 + $0x28] sm:$0xff] %v246_v13  ;;  %v248_v14 = vld [vmem:[%s3673_s25 + $0x60] sm:$0xff]  ;;  %v250_v15 = vld [vmem:[%s3673_s25 + $0x68] sm:$0xff] }
  0x39   : > { %v252_v16 = vld [vmem:[%s3673_s25 + $0x80] sm:$0xff]  ;;  %249 = vst [vmem:[%s3678_s6 + $0x30] sm:$0xff] %v248_v14  ;;  %251 = vst [vmem:[%s3678_s6 + $0x38] sm:$0xff] %v250_v15  ;;  %v254_v17 = vld [vmem:[%s3673_s25 + $0x88] sm:$0xff] }
  0x3a   : > { %253 = vst [vmem:[%s3678_s6 + $0x40] sm:$0xff] %v252_v16  ;;  %v256_v18 = vld [vmem:[%s3673_s25 + $0xa0] sm:$0xff]  ;;  %v258_v19 = vld [vmem:[%s3673_s25 + $0xa8] sm:$0xff]  ;;  %255 = vst [vmem:[%s3678_s6 + $0x48] sm:$0xff] %v254_v17 }
  0x3b   : > { %257 = vst [vmem:[%s3678_s6 + $0x50] sm:$0xff] %v256_v18  ;;  %259 = vst [vmem:[%s3678_s6 + $0x58] sm:$0xff] %v258_v19  ;;  %v260_v20 = vld [vmem:[%s3673_s25 + $0xc0] sm:$0xff]  ;;  %v262_v21 = vld [vmem:[%s3673_s25 + $0xc8] sm:$0xff] }
  0x3c   : > { %v264_v22 = vld [vmem:[%s3673_s25 + $0xe0] sm:$0xff]  ;;  %261 = vst [vmem:[%s3678_s6 + $0x60] sm:$0xff] %v260_v20  ;;  %263 = vst [vmem:[%s3678_s6 + $0x68] sm:$0xff] %v262_v21  ;;  %v266_v23 = vld [vmem:[%s3673_s25 + $0xe8] sm:$0xff] }
  0x3d   : > { %265 = vst [vmem:[%s3678_s6 + $0x70] sm:$0xff] %v264_v22  ;;  %v268_v24 = vld [vmem:[%s3673_s25 + $0x100] sm:$0xff]  ;;  %v270_v25 = vld [vmem:[%s3673_s25 + $0x108] sm:$0xff]  ;;  %267 = vst [vmem:[%s3678_s6 + $0x78] sm:$0xff] %v266_v23 }
  0x3e   : > { %269 = vst [vmem:[%s3678_s6 + $0x80] sm:$0xff] %v268_v24  ;;  %271 = vst [vmem:[%s3678_s6 + $0x88] sm:$0xff] %v270_v25  ;;  %v272_v26 = vld [vmem:[%s3673_s25 + $0x120] sm:$0xff]  ;;  %v274_v27 = vld [vmem:[%s3673_s25 + $0x128] sm:$0xff] }
  0x3f   : > { %v276_v28 = vld [vmem:[%s3673_s25 + $0x140] sm:$0xff]  ;;  %273 = vst [vmem:[%s3678_s6 + $0x90] sm:$0xff] %v272_v26  ;;  %275 = vst [vmem:[%s3678_s6 + $0x98] sm:$0xff] %v274_v27  ;;  %v278_v29 = vld [vmem:[%s3673_s25 + $0x148] sm:$0xff] }
  0x40   : > { %277 = vst [vmem:[%s3678_s6 + $0xa0] sm:$0xff] %v276_v28  ;;  %v280_v30 = vld [vmem:[%s3673_s25 + $0x160] sm:$0xff]  ;;  %v282_v31 = vld [vmem:[%s3673_s25 + $0x168] sm:$0xff]  ;;  %279 = vst [vmem:[%s3678_s6 + $0xa8] sm:$0xff] %v278_v29 }
  0x41   : > { %281 = vst [vmem:[%s3678_s6 + $0xb0] sm:$0xff] %v280_v30  ;;  %283 = vst [vmem:[%s3678_s6 + $0xb8] sm:$0xff] %v282_v31  ;;  %v284_v32 = vld [vmem:[%s3673_s25 + $0x180] sm:$0xff]  ;;  %v286_v33 = vld [vmem:[%s3673_s25 + $0x188] sm:$0xff] }
  0x42   : > { %v288_v34 = vld [vmem:[%s3673_s25 + $0x1a0] sm:$0xff]  ;;  %285 = vst [vmem:[%s3678_s6 + $0xc0] sm:$0xff] %v284_v32  ;;  %287 = vst [vmem:[%s3678_s6 + $0xc8] sm:$0xff] %v286_v33  ;;  %v290_v35 = vld [vmem:[%s3673_s25 + $0x1a8] sm:$0xff] }
  0x43   : > { %289 = vst [vmem:[%s3678_s6 + $0xd0] sm:$0xff] %v288_v34  ;;  %v292_v36 = vld [vmem:[%s3673_s25 + $0x1c0] sm:$0xff]  ;;  %v294_v37 = vld [vmem:[%s3673_s25 + $0x1c8] sm:$0xff]  ;;  %291 = vst [vmem:[%s3678_s6 + $0xd8] sm:$0xff] %v290_v35 }
  0x44   : > { %293 = vst [vmem:[%s3678_s6 + $0xe0] sm:$0xff] %v292_v36  ;;  %295 = vst [vmem:[%s3678_s6 + $0xe8] sm:$0xff] %v294_v37  ;;  %v296_v38 = vld [vmem:[%s3673_s25 + $0x1e0] sm:$0xff]  ;;  %v298_v39 = vld [vmem:[%s3673_s25 + $0x1e8] sm:$0xff] }
  0x45   : > { %v300_v40 = vld [vmem:[%s3673_s25 + $0x200] sm:$0xff]  ;;  %297 = vst [vmem:[%s3678_s6 + $0xf0] sm:$0xff] %v296_v38  ;;  %299 = vst [vmem:[%s3678_s6 + $0xf8] sm:$0xff] %v298_v39  ;;  %v302_v41 = vld [vmem:[%s3673_s25 + $0x208] sm:$0xff] }
  0x46   : > { %301 = vst [vmem:[%s3678_s6 + $0x100] sm:$0xff] %v300_v40  ;;  %v304_v42 = vld [vmem:[%s3673_s25 + $0x220] sm:$0xff]  ;;  %v306_v43 = vld [vmem:[%s3673_s25 + $0x228] sm:$0xff]  ;;  %303 = vst [vmem:[%s3678_s6 + $0x108] sm:$0xff] %v302_v41 }
  0x47   : > { %305 = vst [vmem:[%s3678_s6 + $0x110] sm:$0xff] %v304_v42  ;;  %307 = vst [vmem:[%s3678_s6 + $0x118] sm:$0xff] %v306_v43  ;;  %v308_v44 = vld [vmem:[%s3673_s25 + $0x240] sm:$0xff]  ;;  %v310_v45 = vld [vmem:[%s3673_s25 + $0x248] sm:$0xff] }
  0x48   : > { %v312_v46 = vld [vmem:[%s3673_s25 + $0x260] sm:$0xff]  ;;  %309 = vst [vmem:[%s3678_s6 + $0x120] sm:$0xff] %v308_v44  ;;  %311 = vst [vmem:[%s3678_s6 + $0x128] sm:$0xff] %v310_v45  ;;  %v314_v47 = vld [vmem:[%s3673_s25 + $0x268] sm:$0xff] }
  0x49   : > { %313 = vst [vmem:[%s3678_s6 + $0x130] sm:$0xff] %v312_v46  ;;  %v316_v48 = vld [vmem:[%s3673_s25 + $0x280] sm:$0xff]  ;;  %v318_v49 = vld [vmem:[%s3673_s25 + $0x288] sm:$0xff]  ;;  %315 = vst [vmem:[%s3678_s6 + $0x138] sm:$0xff] %v314_v47 }
  0x4a   : > { %317 = vst [vmem:[%s3678_s6 + $0x140] sm:$0xff] %v316_v48  ;;  %319 = vst [vmem:[%s3678_s6 + $0x148] sm:$0xff] %v318_v49  ;;  %v320_v50 = vld [vmem:[%s3673_s25 + $0x2a0] sm:$0xff]  ;;  %v322_v51 = vld [vmem:[%s3673_s25 + $0x2a8] sm:$0xff] }
  0x4b   : > { %v324_v52 = vld [vmem:[%s3673_s25 + $0x2c0] sm:$0xff]  ;;  %321 = vst [vmem:[%s3678_s6 + $0x150] sm:$0xff] %v320_v50  ;;  %323 = vst [vmem:[%s3678_s6 + $0x158] sm:$0xff] %v322_v51  ;;  %v326_v53 = vld [vmem:[%s3673_s25 + $0x2c8] sm:$0xff] }
  0x4c   : > { %325 = vst [vmem:[%s3678_s6 + $0x160] sm:$0xff] %v324_v52  ;;  %v328_v54 = vld [vmem:[%s3673_s25 + $0x2e0] sm:$0xff]  ;;  %v330_v55 = vld [vmem:[%s3673_s25 + $0x2e8] sm:$0xff]  ;;  %327 = vst [vmem:[%s3678_s6 + $0x168] sm:$0xff] %v326_v53 }
  0x4d   : > { %329 = vst [vmem:[%s3678_s6 + $0x170] sm:$0xff] %v328_v54  ;;  %331 = vst [vmem:[%s3678_s6 + $0x178] sm:$0xff] %v330_v55  ;;  %v332_v56 = vld [vmem:[%s3673_s25 + $0x300] sm:$0xff]  ;;  %v334_v57 = vld [vmem:[%s3673_s25 + $0x308] sm:$0xff] }
  0x4e   : > { %v336_v58 = vld [vmem:[%s3673_s25 + $0x320] sm:$0xff]  ;;  %333 = vst [vmem:[%s3678_s6 + $0x180] sm:$0xff] %v332_v56  ;;  %335 = vst [vmem:[%s3678_s6 + $0x188] sm:$0xff] %v334_v57  ;;  %v338_v59 = vld [vmem:[%s3673_s25 + $0x328] sm:$0xff] }
  0x4f   : > { %337 = vst [vmem:[%s3678_s6 + $0x190] sm:$0xff] %v336_v58  ;;  %v340_v60 = vld [vmem:[%s3673_s25 + $0x340] sm:$0xff]  ;;  %v342_v61 = vld [vmem:[%s3673_s25 + $0x348] sm:$0xff]  ;;  %339 = vst [vmem:[%s3678_s6 + $0x198] sm:$0xff] %v338_v59 }
  0x50   : > { %341 = vst [vmem:[%s3678_s6 + $0x1a0] sm:$0xff] %v340_v60  ;;  %343 = vst [vmem:[%s3678_s6 + $0x1a8] sm:$0xff] %v342_v61  ;;  %v344_v62 = vld [vmem:[%s3673_s25 + $0x360] sm:$0xff]  ;;  %v346_v63 = vld [vmem:[%s3673_s25 + $0x368] sm:$0xff] }
  0x51   : > { %v348_v0 = vld [vmem:[%s3673_s25 + $0x380] sm:$0xff]  ;;  %345 = vst [vmem:[%s3678_s6 + $0x1b0] sm:$0xff] %v344_v62  ;;  %347 = vst [vmem:[%s3678_s6 + $0x1b8] sm:$0xff] %v346_v63  ;;  %v350_v1 = vld [vmem:[%s3673_s25 + $0x388] sm:$0xff] }
  0x52   : > { %349 = vst [vmem:[%s3678_s6 + $0x1c0] sm:$0xff] %v348_v0  ;;  %v352_v2 = vld [vmem:[%s3673_s25 + $0x3a0] sm:$0xff]  ;;  %v354_v3 = vld [vmem:[%s3673_s25 + $0x3a8] sm:$0xff]  ;;  %351 = vst [vmem:[%s3678_s6 + $0x1c8] sm:$0xff] %v350_v1 }
  0x53   : > { %353 = vst [vmem:[%s3678_s6 + $0x1d0] sm:$0xff] %v352_v2  ;;  %355 = vst [vmem:[%s3678_s6 + $0x1d8] sm:$0xff] %v354_v3  ;;  %v356_v4 = vld [vmem:[%s3673_s25 + $0x3c0] sm:$0xff]  ;;  %v358_v5 = vld [vmem:[%s3673_s25 + $0x3c8] sm:$0xff] }
  0x54   : > { %v360_v6 = vld [vmem:[%s3673_s25 + $0x3e0] sm:$0xff]  ;;  %357 = vst [vmem:[%s3678_s6 + $0x1e0] sm:$0xff] %v356_v4  ;;  %359 = vst [vmem:[%s3678_s6 + $0x1e8] sm:$0xff] %v358_v5  ;;  %v362_v7 = vld [vmem:[%s3673_s25 + $0x3e8] sm:$0xff] }
  0x55   : > { %361 = vst [vmem:[%s3678_s6 + $0x1f0] sm:$0xff] %v360_v6  ;;  %v364_v8 = vld [vmem:[%s3673_s25 + $0x400] sm:$0xff]  ;;  %v366_v9 = vld [vmem:[%s3673_s25 + $0x408] sm:$0xff]  ;;  %363 = vst [vmem:[%s3678_s6 + $0x1f8] sm:$0xff] %v362_v7 }
  0x56   : > { %365 = vst [vmem:[%s3678_s6 + $0x200] sm:$0xff] %v364_v8  ;;  %367 = vst [vmem:[%s3678_s6 + $0x208] sm:$0xff] %v366_v9  ;;  %v368_v10 = vld [vmem:[%s3673_s25 + $0x420] sm:$0xff]  ;;  %v370_v11 = vld [vmem:[%s3673_s25 + $0x428] sm:$0xff] }
  0x57   : > { %v372_v12 = vld [vmem:[%s3673_s25 + $0x440] sm:$0xff]  ;;  %369 = vst [vmem:[%s3678_s6 + $0x210] sm:$0xff] %v368_v10  ;;  %371 = vst [vmem:[%s3678_s6 + $0x218] sm:$0xff] %v370_v11  ;;  %v374_v13 = vld [vmem:[%s3673_s25 + $0x448] sm:$0xff] }
  0x58   : > { %373 = vst [vmem:[%s3678_s6 + $0x220] sm:$0xff] %v372_v12  ;;  %v376_v14 = vld [vmem:[%s3673_s25 + $0x460] sm:$0xff]  ;;  %v378_v15 = vld [vmem:[%s3673_s25 + $0x468] sm:$0xff]  ;;  %375 = vst [vmem:[%s3678_s6 + $0x228] sm:$0xff] %v374_v13 }
  0x59   : > { %377 = vst [vmem:[%s3678_s6 + $0x230] sm:$0xff] %v376_v14  ;;  %379 = vst [vmem:[%s3678_s6 + $0x238] sm:$0xff] %v378_v15  ;;  %v380_v16 = vld [vmem:[%s3673_s25 + $0x480] sm:$0xff]  ;;  %v382_v17 = vld [vmem:[%s3673_s25 + $0x488] sm:$0xff] }
  0x5a   : > { %v384_v18 = vld [vmem:[%s3673_s25 + $0x4a0] sm:$0xff]  ;;  %381 = vst [vmem:[%s3678_s6 + $0x240] sm:$0xff] %v380_v16  ;;  %383 = vst [vmem:[%s3678_s6 + $0x248] sm:$0xff] %v382_v17  ;;  %v386_v19 = vld [vmem:[%s3673_s25 + $0x4a8] sm:$0xff] }
  0x5b   : > { %385 = vst [vmem:[%s3678_s6 + $0x250] sm:$0xff] %v384_v18  ;;  %v388_v20 = vld [vmem:[%s3673_s25 + $0x4c0] sm:$0xff]  ;;  %v390_v21 = vld [vmem:[%s3673_s25 + $0x4c8] sm:$0xff]  ;;  %387 = vst [vmem:[%s3678_s6 + $0x258] sm:$0xff] %v386_v19 }
  0x5c   : > { %389 = vst [vmem:[%s3678_s6 + $0x260] sm:$0xff] %v388_v20  ;;  %391 = vst [vmem:[%s3678_s6 + $0x268] sm:$0xff] %v390_v21  ;;  %v392_v22 = vld [vmem:[%s3673_s25 + $0x4e0] sm:$0xff]  ;;  %v394_v23 = vld [vmem:[%s3673_s25 + $0x4e8] sm:$0xff] }
  0x5d   : > { %v396_v24 = vld [vmem:[%s3673_s25 + $0x500] sm:$0xff]  ;;  %393 = vst [vmem:[%s3678_s6 + $0x270] sm:$0xff] %v392_v22  ;;  %395 = vst [vmem:[%s3678_s6 + $0x278] sm:$0xff] %v394_v23  ;;  %v398_v25 = vld [vmem:[%s3673_s25 + $0x508] sm:$0xff] }
  0x5e   : > { %397 = vst [vmem:[%s3678_s6 + $0x280] sm:$0xff] %v396_v24  ;;  %v400_v26 = vld [vmem:[%s3673_s25 + $0x520] sm:$0xff]  ;;  %v402_v27 = vld [vmem:[%s3673_s25 + $0x528] sm:$0xff]  ;;  %399 = vst [vmem:[%s3678_s6 + $0x288] sm:$0xff] %v398_v25 }
  0x5f   : > { %401 = vst [vmem:[%s3678_s6 + $0x290] sm:$0xff] %v400_v26  ;;  %403 = vst [vmem:[%s3678_s6 + $0x298] sm:$0xff] %v402_v27  ;;  %v404_v28 = vld [vmem:[%s3673_s25 + $0x540] sm:$0xff]  ;;  %v406_v29 = vld [vmem:[%s3673_s25 + $0x548] sm:$0xff] }
  0x60   : > { %v408_v30 = vld [vmem:[%s3673_s25 + $0x560] sm:$0xff]  ;;  %405 = vst [vmem:[%s3678_s6 + $0x2a0] sm:$0xff] %v404_v28  ;;  %407 = vst [vmem:[%s3678_s6 + $0x2a8] sm:$0xff] %v406_v29  ;;  %v410_v31 = vld [vmem:[%s3673_s25 + $0x568] sm:$0xff] }
  0x61   : > { %409 = vst [vmem:[%s3678_s6 + $0x2b0] sm:$0xff] %v408_v30  ;;  %v412_v32 = vld [vmem:[%s3673_s25 + $0x580] sm:$0xff]  ;;  %v414_v33 = vld [vmem:[%s3673_s25 + $0x588] sm:$0xff]  ;;  %411 = vst [vmem:[%s3678_s6 + $0x2b8] sm:$0xff] %v410_v31 }
  0x62   : > { %413 = vst [vmem:[%s3678_s6 + $0x2c0] sm:$0xff] %v412_v32  ;;  %415 = vst [vmem:[%s3678_s6 + $0x2c8] sm:$0xff] %v414_v33  ;;  %v416_v34 = vld [vmem:[%s3673_s25 + $0x5a0] sm:$0xff]  ;;  %v418_v35 = vld [vmem:[%s3673_s25 + $0x5a8] sm:$0xff] }
  0x63   : > { %v420_v36 = vld [vmem:[%s3673_s25 + $0x5c0] sm:$0xff]  ;;  %417 = vst [vmem:[%s3678_s6 + $0x2d0] sm:$0xff] %v416_v34  ;;  %419 = vst [vmem:[%s3678_s6 + $0x2d8] sm:$0xff] %v418_v35  ;;  %v422_v37 = vld [vmem:[%s3673_s25 + $0x5c8] sm:$0xff] }
  0x64   : > { %421 = vst [vmem:[%s3678_s6 + $0x2e0] sm:$0xff] %v420_v36  ;;  %v424_v38 = vld [vmem:[%s3673_s25 + $0x5e0] sm:$0xff]  ;;  %v426_v39 = vld [vmem:[%s3673_s25 + $0x5e8] sm:$0xff]  ;;  %423 = vst [vmem:[%s3678_s6 + $0x2e8] sm:$0xff] %v422_v37 }
  0x65   : > { %425 = vst [vmem:[%s3678_s6 + $0x2f0] sm:$0xff] %v424_v38  ;;  %427 = vst [vmem:[%s3678_s6 + $0x2f8] sm:$0xff] %v426_v39  ;;  %v428_v40 = vld [vmem:[%s3673_s25 + $0x600] sm:$0xff]  ;;  %v430_v41 = vld [vmem:[%s3673_s25 + $0x608] sm:$0xff] }
  0x66   : > { %v432_v42 = vld [vmem:[%s3673_s25 + $0x620] sm:$0xff]  ;;  %429 = vst [vmem:[%s3678_s6 + $0x300] sm:$0xff] %v428_v40  ;;  %431 = vst [vmem:[%s3678_s6 + $0x308] sm:$0xff] %v430_v41  ;;  %v434_v43 = vld [vmem:[%s3673_s25 + $0x628] sm:$0xff] }
  0x67   : > { %433 = vst [vmem:[%s3678_s6 + $0x310] sm:$0xff] %v432_v42  ;;  %v436_v44 = vld [vmem:[%s3673_s25 + $0x640] sm:$0xff]  ;;  %v438_v45 = vld [vmem:[%s3673_s25 + $0x648] sm:$0xff]  ;;  %435 = vst [vmem:[%s3678_s6 + $0x318] sm:$0xff] %v434_v43 }
  0x68   : > { %437 = vst [vmem:[%s3678_s6 + $0x320] sm:$0xff] %v436_v44  ;;  %439 = vst [vmem:[%s3678_s6 + $0x328] sm:$0xff] %v438_v45  ;;  %v440_v46 = vld [vmem:[%s3673_s25 + $0x660] sm:$0xff]  ;;  %v442_v47 = vld [vmem:[%s3673_s25 + $0x668] sm:$0xff] }
  0x69   : > { %v444_v48 = vld [vmem:[%s3673_s25 + $0x680] sm:$0xff]  ;;  %441 = vst [vmem:[%s3678_s6 + $0x330] sm:$0xff] %v440_v46  ;;  %443 = vst [vmem:[%s3678_s6 + $0x338] sm:$0xff] %v442_v47  ;;  %v446_v49 = vld [vmem:[%s3673_s25 + $0x688] sm:$0xff] }
  0x6a   : > { %445 = vst [vmem:[%s3678_s6 + $0x340] sm:$0xff] %v444_v48  ;;  %v448_v50 = vld [vmem:[%s3673_s25 + $0x6a0] sm:$0xff]  ;;  %v450_v51 = vld [vmem:[%s3673_s25 + $0x6a8] sm:$0xff]  ;;  %447 = vst [vmem:[%s3678_s6 + $0x348] sm:$0xff] %v446_v49 }
  0x6b   : > { %449 = vst [vmem:[%s3678_s6 + $0x350] sm:$0xff] %v448_v50  ;;  %451 = vst [vmem:[%s3678_s6 + $0x358] sm:$0xff] %v450_v51  ;;  %v452_v52 = vld [vmem:[%s3673_s25 + $0x6c0] sm:$0xff]  ;;  %v454_v53 = vld [vmem:[%s3673_s25 + $0x6c8] sm:$0xff] }
  0x6c   : > { %v456_v54 = vld [vmem:[%s3673_s25 + $0x6e0] sm:$0xff]  ;;  %453 = vst [vmem:[%s3678_s6 + $0x360] sm:$0xff] %v452_v52  ;;  %455 = vst [vmem:[%s3678_s6 + $0x368] sm:$0xff] %v454_v53  ;;  %v458_v55 = vld [vmem:[%s3673_s25 + $0x6e8] sm:$0xff] }
  0x6d   : > { %457 = vst [vmem:[%s3678_s6 + $0x370] sm:$0xff] %v456_v54  ;;  %v460_v56 = vld [vmem:[%s3673_s25 + $0x700] sm:$0xff]  ;;  %v462_v57 = vld [vmem:[%s3673_s25 + $0x708] sm:$0xff]  ;;  %459 = vst [vmem:[%s3678_s6 + $0x378] sm:$0xff] %v458_v55 }
  0x6e   : > { %461 = vst [vmem:[%s3678_s6 + $0x380] sm:$0xff] %v460_v56  ;;  %463 = vst [vmem:[%s3678_s6 + $0x388] sm:$0xff] %v462_v57  ;;  %v464_v58 = vld [vmem:[%s3673_s25 + $0x720] sm:$0xff]  ;;  %v466_v59 = vld [vmem:[%s3673_s25 + $0x728] sm:$0xff] }
  0x6f   : > { %v468_v60 = vld [vmem:[%s3673_s25 + $0x740] sm:$0xff]  ;;  %465 = vst [vmem:[%s3678_s6 + $0x390] sm:$0xff] %v464_v58  ;;  %467 = vst [vmem:[%s3678_s6 + $0x398] sm:$0xff] %v466_v59  ;;  %v470_v61 = vld [vmem:[%s3673_s25 + $0x748] sm:$0xff] }
  0x70   : > { %469 = vst [vmem:[%s3678_s6 + $0x3a0] sm:$0xff] %v468_v60  ;;  %v472_v62 = vld [vmem:[%s3673_s25 + $0x760] sm:$0xff]  ;;  %v474_v63 = vld [vmem:[%s3673_s25 + $0x768] sm:$0xff]  ;;  %471 = vst [vmem:[%s3678_s6 + $0x3a8] sm:$0xff] %v470_v61 }
  0x71   : > { %473 = vst [vmem:[%s3678_s6 + $0x3b0] sm:$0xff] %v472_v62  ;;  %475 = vst [vmem:[%s3678_s6 + $0x3b8] sm:$0xff] %v474_v63  ;;  %v476_v0 = vld [vmem:[%s3673_s25 + $0x780] sm:$0xff]  ;;  %v478_v1 = vld [vmem:[%s3673_s25 + $0x788] sm:$0xff] }
  0x72   : > { %v480_v2 = vld [vmem:[%s3673_s25 + $0x7a0] sm:$0xff]  ;;  %477 = vst [vmem:[%s3678_s6 + $0x3c0] sm:$0xff] %v476_v0  ;;  %479 = vst [vmem:[%s3678_s6 + $0x3c8] sm:$0xff] %v478_v1  ;;  %v482_v3 = vld [vmem:[%s3673_s25 + $0x7a8] sm:$0xff] }
  0x73   : > { %481 = vst [vmem:[%s3678_s6 + $0x3d0] sm:$0xff] %v480_v2  ;;  %v484_v4 = vld [vmem:[%s3673_s25 + $0x7c0] sm:$0xff]  ;;  %v486_v5 = vld [vmem:[%s3673_s25 + $0x7c8] sm:$0xff]  ;;  %483 = vst [vmem:[%s3678_s6 + $0x3d8] sm:$0xff] %v482_v3 }
  0x74   : > { %485 = vst [vmem:[%s3678_s6 + $0x3e0] sm:$0xff] %v484_v4  ;;  %487 = vst [vmem:[%s3678_s6 + $0x3e8] sm:$0xff] %v486_v5  ;;  %v488_v6 = vld [vmem:[%s3673_s25 + $0x7e0] sm:$0xff]  ;;  %v490_v7 = vld [vmem:[%s3673_s25 + $0x7e8] sm:$0xff] }
  0x75   : > { %v492_v8 = vld [vmem:[%s3673_s25 + $0x800] sm:$0xff]  ;;  %489 = vst [vmem:[%s3678_s6 + $0x3f0] sm:$0xff] %v488_v6  ;;  %491 = vst [vmem:[%s3678_s6 + $0x3f8] sm:$0xff] %v490_v7  ;;  %v494_v9 = vld [vmem:[%s3673_s25 + $0x808] sm:$0xff] }
  0x76   : > { %493 = vst [vmem:[%s3678_s6 + $0x400] sm:$0xff] %v492_v8  ;;  %v496_v10 = vld [vmem:[%s3673_s25 + $0x820] sm:$0xff]  ;;  %v498_v11 = vld [vmem:[%s3673_s25 + $0x828] sm:$0xff]  ;;  %495 = vst [vmem:[%s3678_s6 + $0x408] sm:$0xff] %v494_v9 }
  0x77   : > { %497 = vst [vmem:[%s3678_s6 + $0x410] sm:$0xff] %v496_v10  ;;  %499 = vst [vmem:[%s3678_s6 + $0x418] sm:$0xff] %v498_v11  ;;  %v500_v12 = vld [vmem:[%s3673_s25 + $0x840] sm:$0xff]  ;;  %v502_v13 = vld [vmem:[%s3673_s25 + $0x848] sm:$0xff] }
  0x78   : > { %v504_v14 = vld [vmem:[%s3673_s25 + $0x860] sm:$0xff]  ;;  %501 = vst [vmem:[%s3678_s6 + $0x420] sm:$0xff] %v500_v12  ;;  %503 = vst [vmem:[%s3678_s6 + $0x428] sm:$0xff] %v502_v13  ;;  %v506_v15 = vld [vmem:[%s3673_s25 + $0x868] sm:$0xff] }
  0x79   : > { %505 = vst [vmem:[%s3678_s6 + $0x430] sm:$0xff] %v504_v14  ;;  %v508_v16 = vld [vmem:[%s3673_s25 + $0x880] sm:$0xff]  ;;  %v510_v17 = vld [vmem:[%s3673_s25 + $0x888] sm:$0xff]  ;;  %507 = vst [vmem:[%s3678_s6 + $0x438] sm:$0xff] %v506_v15 }
  0x7a   : > { %509 = vst [vmem:[%s3678_s6 + $0x440] sm:$0xff] %v508_v16  ;;  %511 = vst [vmem:[%s3678_s6 + $0x448] sm:$0xff] %v510_v17  ;;  %v512_v18 = vld [vmem:[%s3673_s25 + $0x8a0] sm:$0xff]  ;;  %v514_v19 = vld [vmem:[%s3673_s25 + $0x8a8] sm:$0xff] }
  0x7b   : > { %v516_v20 = vld [vmem:[%s3673_s25 + $0x8c0] sm:$0xff]  ;;  %513 = vst [vmem:[%s3678_s6 + $0x450] sm:$0xff] %v512_v18  ;;  %515 = vst [vmem:[%s3678_s6 + $0x458] sm:$0xff] %v514_v19  ;;  %v518_v21 = vld [vmem:[%s3673_s25 + $0x8c8] sm:$0xff] }
  0x7c   : > { %517 = vst [vmem:[%s3678_s6 + $0x460] sm:$0xff] %v516_v20  ;;  %v520_v22 = vld [vmem:[%s3673_s25 + $0x8e0] sm:$0xff]  ;;  %v522_v23 = vld [vmem:[%s3673_s25 + $0x8e8] sm:$0xff]  ;;  %519 = vst [vmem:[%s3678_s6 + $0x468] sm:$0xff] %v518_v21 }
  0x7d   : > { %521 = vst [vmem:[%s3678_s6 + $0x470] sm:$0xff] %v520_v22  ;;  %523 = vst [vmem:[%s3678_s6 + $0x478] sm:$0xff] %v522_v23  ;;  %v524_v24 = vld [vmem:[%s3673_s25 + $0x900] sm:$0xff]  ;;  %v526_v25 = vld [vmem:[%s3673_s25 + $0x908] sm:$0xff] }
  0x7e   : > { %v528_v26 = vld [vmem:[%s3673_s25 + $0x920] sm:$0xff]  ;;  %525 = vst [vmem:[%s3678_s6 + $0x480] sm:$0xff] %v524_v24  ;;  %527 = vst [vmem:[%s3678_s6 + $0x488] sm:$0xff] %v526_v25  ;;  %v530_v27 = vld [vmem:[%s3673_s25 + $0x928] sm:$0xff] }
  0x7f   : > { %529 = vst [vmem:[%s3678_s6 + $0x490] sm:$0xff] %v528_v26  ;;  %v532_v28 = vld [vmem:[%s3673_s25 + $0x940] sm:$0xff]  ;;  %v534_v29 = vld [vmem:[%s3673_s25 + $0x948] sm:$0xff]  ;;  %531 = vst [vmem:[%s3678_s6 + $0x498] sm:$0xff] %v530_v27 }
  0x80   : > { %533 = vst [vmem:[%s3678_s6 + $0x4a0] sm:$0xff] %v532_v28  ;;  %535 = vst [vmem:[%s3678_s6 + $0x4a8] sm:$0xff] %v534_v29  ;;  %v536_v30 = vld [vmem:[%s3673_s25 + $0x960] sm:$0xff]  ;;  %v538_v31 = vld [vmem:[%s3673_s25 + $0x968] sm:$0xff] }
  0x81   : > { %v540_v32 = vld [vmem:[%s3673_s25 + $0x980] sm:$0xff]  ;;  %537 = vst [vmem:[%s3678_s6 + $0x4b0] sm:$0xff] %v536_v30  ;;  %539 = vst [vmem:[%s3678_s6 + $0x4b8] sm:$0xff] %v538_v31  ;;  %v542_v33 = vld [vmem:[%s3673_s25 + $0x988] sm:$0xff] }
  0x82   : > { %541 = vst [vmem:[%s3678_s6 + $0x4c0] sm:$0xff] %v540_v32  ;;  %v544_v34 = vld [vmem:[%s3673_s25 + $0x9a0] sm:$0xff]  ;;  %v546_v35 = vld [vmem:[%s3673_s25 + $0x9a8] sm:$0xff]  ;;  %543 = vst [vmem:[%s3678_s6 + $0x4c8] sm:$0xff] %v542_v33 }
  0x83   : > { %545 = vst [vmem:[%s3678_s6 + $0x4d0] sm:$0xff] %v544_v34  ;;  %547 = vst [vmem:[%s3678_s6 + $0x4d8] sm:$0xff] %v546_v35  ;;  %v548_v36 = vld [vmem:[%s3673_s25 + $0x9c0] sm:$0xff]  ;;  %v550_v37 = vld [vmem:[%s3673_s25 + $0x9c8] sm:$0xff] }
  0x84   : > { %v552_v38 = vld [vmem:[%s3673_s25 + $0x9e0] sm:$0xff]  ;;  %549 = vst [vmem:[%s3678_s6 + $0x4e0] sm:$0xff] %v548_v36  ;;  %551 = vst [vmem:[%s3678_s6 + $0x4e8] sm:$0xff] %v550_v37  ;;  %v554_v39 = vld [vmem:[%s3673_s25 + $0x9e8] sm:$0xff] }
  0x85   : > { %553 = vst [vmem:[%s3678_s6 + $0x4f0] sm:$0xff] %v552_v38  ;;  %v556_v40 = vld [vmem:[%s3673_s25 + $0xa00] sm:$0xff]  ;;  %v558_v41 = vld [vmem:[%s3673_s25 + $0xa08] sm:$0xff]  ;;  %555 = vst [vmem:[%s3678_s6 + $0x4f8] sm:$0xff] %v554_v39 }
  0x86   : > { %557 = vst [vmem:[%s3678_s6 + $0x500] sm:$0xff] %v556_v40  ;;  %559 = vst [vmem:[%s3678_s6 + $0x508] sm:$0xff] %v558_v41  ;;  %v560_v42 = vld [vmem:[%s3673_s25 + $0xa20] sm:$0xff]  ;;  %v562_v43 = vld [vmem:[%s3673_s25 + $0xa28] sm:$0xff] }
  0x87   : > { %v564_v44 = vld [vmem:[%s3673_s25 + $0xa40] sm:$0xff]  ;;  %561 = vst [vmem:[%s3678_s6 + $0x510] sm:$0xff] %v560_v42  ;;  %563 = vst [vmem:[%s3678_s6 + $0x518] sm:$0xff] %v562_v43  ;;  %v566_v45 = vld [vmem:[%s3673_s25 + $0xa48] sm:$0xff] }
  0x88   : > { %565 = vst [vmem:[%s3678_s6 + $0x520] sm:$0xff] %v564_v44  ;;  %v568_v46 = vld [vmem:[%s3673_s25 + $0xa60] sm:$0xff]  ;;  %v570_v47 = vld [vmem:[%s3673_s25 + $0xa68] sm:$0xff]  ;;  %567 = vst [vmem:[%s3678_s6 + $0x528] sm:$0xff] %v566_v45 }
  0x89   : > { %569 = vst [vmem:[%s3678_s6 + $0x530] sm:$0xff] %v568_v46  ;;  %571 = vst [vmem:[%s3678_s6 + $0x538] sm:$0xff] %v570_v47  ;;  %v572_v48 = vld [vmem:[%s3673_s25 + $0xa80] sm:$0xff]  ;;  %v574_v49 = vld [vmem:[%s3673_s25 + $0xa88] sm:$0xff] }
  0x8a   : > { %v576_v50 = vld [vmem:[%s3673_s25 + $0xaa0] sm:$0xff]  ;;  %573 = vst [vmem:[%s3678_s6 + $0x540] sm:$0xff] %v572_v48  ;;  %575 = vst [vmem:[%s3678_s6 + $0x548] sm:$0xff] %v574_v49  ;;  %v578_v51 = vld [vmem:[%s3673_s25 + $0xaa8] sm:$0xff] }
  0x8b   : > { %577 = vst [vmem:[%s3678_s6 + $0x550] sm:$0xff] %v576_v50  ;;  %v580_v52 = vld [vmem:[%s3673_s25 + $0xac0] sm:$0xff]  ;;  %v582_v53 = vld [vmem:[%s3673_s25 + $0xac8] sm:$0xff]  ;;  %579 = vst [vmem:[%s3678_s6 + $0x558] sm:$0xff] %v578_v51 }
  0x8c   : > { %581 = vst [vmem:[%s3678_s6 + $0x560] sm:$0xff] %v580_v52  ;;  %583 = vst [vmem:[%s3678_s6 + $0x568] sm:$0xff] %v582_v53  ;;  %v584_v54 = vld [vmem:[%s3673_s25 + $0xae0] sm:$0xff]  ;;  %v586_v55 = vld [vmem:[%s3673_s25 + $0xae8] sm:$0xff] }
  0x8d   : > { %v588_v56 = vld [vmem:[%s3673_s25 + $0xb00] sm:$0xff]  ;;  %585 = vst [vmem:[%s3678_s6 + $0x570] sm:$0xff] %v584_v54  ;;  %587 = vst [vmem:[%s3678_s6 + $0x578] sm:$0xff] %v586_v55  ;;  %v590_v57 = vld [vmem:[%s3673_s25 + $0xb08] sm:$0xff] }
  0x8e   : > { %589 = vst [vmem:[%s3678_s6 + $0x580] sm:$0xff] %v588_v56  ;;  %v592_v58 = vld [vmem:[%s3673_s25 + $0xb20] sm:$0xff]  ;;  %v594_v59 = vld [vmem:[%s3673_s25 + $0xb28] sm:$0xff]  ;;  %591 = vst [vmem:[%s3678_s6 + $0x588] sm:$0xff] %v590_v57 }
  0x8f   : > { %593 = vst [vmem:[%s3678_s6 + $0x590] sm:$0xff] %v592_v58  ;;  %595 = vst [vmem:[%s3678_s6 + $0x598] sm:$0xff] %v594_v59  ;;  %v596_v60 = vld [vmem:[%s3673_s25 + $0xb40] sm:$0xff]  ;;  %v598_v61 = vld [vmem:[%s3673_s25 + $0xb48] sm:$0xff] }
  0x90   : > { %v600_v62 = vld [vmem:[%s3673_s25 + $0xb60] sm:$0xff]  ;;  %597 = vst [vmem:[%s3678_s6 + $0x5a0] sm:$0xff] %v596_v60  ;;  %599 = vst [vmem:[%s3678_s6 + $0x5a8] sm:$0xff] %v598_v61  ;;  %v602_v63 = vld [vmem:[%s3673_s25 + $0xb68] sm:$0xff] }
  0x91   : > { %601 = vst [vmem:[%s3678_s6 + $0x5b0] sm:$0xff] %v600_v62  ;;  %v604_v0 = vld [vmem:[%s3673_s25 + $0xb80] sm:$0xff]  ;;  %v606_v1 = vld [vmem:[%s3673_s25 + $0xb88] sm:$0xff]  ;;  %603 = vst [vmem:[%s3678_s6 + $0x5b8] sm:$0xff] %v602_v63 }
  0x92   : > { %605 = vst [vmem:[%s3678_s6 + $0x5c0] sm:$0xff] %v604_v0  ;;  %607 = vst [vmem:[%s3678_s6 + $0x5c8] sm:$0xff] %v606_v1  ;;  %v608_v2 = vld [vmem:[%s3673_s25 + $0xba0] sm:$0xff]  ;;  %v610_v3 = vld [vmem:[%s3673_s25 + $0xba8] sm:$0xff] }
  0x93   : > { %v612_v4 = vld [vmem:[%s3673_s25 + $0xbc0] sm:$0xff]  ;;  %609 = vst [vmem:[%s3678_s6 + $0x5d0] sm:$0xff] %v608_v2  ;;  %611 = vst [vmem:[%s3678_s6 + $0x5d8] sm:$0xff] %v610_v3  ;;  %v614_v5 = vld [vmem:[%s3673_s25 + $0xbc8] sm:$0xff] }
  0x94   : > { %613 = vst [vmem:[%s3678_s6 + $0x5e0] sm:$0xff] %v612_v4  ;;  %v616_v6 = vld [vmem:[%s3673_s25 + $0xbe0] sm:$0xff]  ;;  %v618_v7 = vld [vmem:[%s3673_s25 + $0xbe8] sm:$0xff]  ;;  %615 = vst [vmem:[%s3678_s6 + $0x5e8] sm:$0xff] %v614_v5 }
  0x95   : > { %617 = vst [vmem:[%s3678_s6 + $0x5f0] sm:$0xff] %v616_v6  ;;  %619 = vst [vmem:[%s3678_s6 + $0x5f8] sm:$0xff] %v618_v7  ;;  %v620_v8 = vld [vmem:[%s3673_s25 + $0xc00] sm:$0xff]  ;;  %v622_v9 = vld [vmem:[%s3673_s25 + $0xc08] sm:$0xff] }
  0x96   : > { %v624_v10 = vld [vmem:[%s3673_s25 + $0xc20] sm:$0xff]  ;;  %621 = vst [vmem:[%s3678_s6 + $0x600] sm:$0xff] %v620_v8  ;;  %623 = vst [vmem:[%s3678_s6 + $0x608] sm:$0xff] %v622_v9  ;;  %v626_v11 = vld [vmem:[%s3673_s25 + $0xc28] sm:$0xff] }
  0x97   : > { %625 = vst [vmem:[%s3678_s6 + $0x610] sm:$0xff] %v624_v10  ;;  %v628_v12 = vld [vmem:[%s3673_s25 + $0xc40] sm:$0xff]  ;;  %v630_v13 = vld [vmem:[%s3673_s25 + $0xc48] sm:$0xff]  ;;  %627 = vst [vmem:[%s3678_s6 + $0x618] sm:$0xff] %v626_v11 }
  0x98   : > { %629 = vst [vmem:[%s3678_s6 + $0x620] sm:$0xff] %v628_v12  ;;  %631 = vst [vmem:[%s3678_s6 + $0x628] sm:$0xff] %v630_v13  ;;  %v632_v14 = vld [vmem:[%s3673_s25 + $0xc60] sm:$0xff]  ;;  %v634_v15 = vld [vmem:[%s3673_s25 + $0xc68] sm:$0xff] }
  0x99   : > { %v636_v16 = vld [vmem:[%s3673_s25 + $0xc80] sm:$0xff]  ;;  %633 = vst [vmem:[%s3678_s6 + $0x630] sm:$0xff] %v632_v14  ;;  %635 = vst [vmem:[%s3678_s6 + $0x638] sm:$0xff] %v634_v15  ;;  %v638_v17 = vld [vmem:[%s3673_s25 + $0xc88] sm:$0xff] }
  0x9a   : > { %637 = vst [vmem:[%s3678_s6 + $0x640] sm:$0xff] %v636_v16  ;;  %v640_v18 = vld [vmem:[%s3673_s25 + $0xca0] sm:$0xff]  ;;  %v642_v19 = vld [vmem:[%s3673_s25 + $0xca8] sm:$0xff]  ;;  %639 = vst [vmem:[%s3678_s6 + $0x648] sm:$0xff] %v638_v17 }
  0x9b   : > { %641 = vst [vmem:[%s3678_s6 + $0x650] sm:$0xff] %v640_v18  ;;  %643 = vst [vmem:[%s3678_s6 + $0x658] sm:$0xff] %v642_v19  ;;  %v644_v20 = vld [vmem:[%s3673_s25 + $0xcc0] sm:$0xff]  ;;  %v646_v21 = vld [vmem:[%s3673_s25 + $0xcc8] sm:$0xff] }
  0x9c   : > { %v648_v22 = vld [vmem:[%s3673_s25 + $0xce0] sm:$0xff]  ;;  %645 = vst [vmem:[%s3678_s6 + $0x660] sm:$0xff] %v644_v20  ;;  %647 = vst [vmem:[%s3678_s6 + $0x668] sm:$0xff] %v646_v21  ;;  %v650_v23 = vld [vmem:[%s3673_s25 + $0xce8] sm:$0xff] }
  0x9d   : > { %649 = vst [vmem:[%s3678_s6 + $0x670] sm:$0xff] %v648_v22  ;;  %v652_v24 = vld [vmem:[%s3673_s25 + $0xd00] sm:$0xff]  ;;  %v654_v25 = vld [vmem:[%s3673_s25 + $0xd08] sm:$0xff]  ;;  %651 = vst [vmem:[%s3678_s6 + $0x678] sm:$0xff] %v650_v23 }
  0x9e   : > { %653 = vst [vmem:[%s3678_s6 + $0x680] sm:$0xff] %v652_v24  ;;  %655 = vst [vmem:[%s3678_s6 + $0x688] sm:$0xff] %v654_v25  ;;  %v656_v26 = vld [vmem:[%s3673_s25 + $0xd20] sm:$0xff]  ;;  %v658_v27 = vld [vmem:[%s3673_s25 + $0xd28] sm:$0xff] }
  0x9f   : > { %v660_v28 = vld [vmem:[%s3673_s25 + $0xd40] sm:$0xff]  ;;  %657 = vst [vmem:[%s3678_s6 + $0x690] sm:$0xff] %v656_v26  ;;  %659 = vst [vmem:[%s3678_s6 + $0x698] sm:$0xff] %v658_v27  ;;  %v662_v29 = vld [vmem:[%s3673_s25 + $0xd48] sm:$0xff] }
  0xa0   : > { %661 = vst [vmem:[%s3678_s6 + $0x6a0] sm:$0xff] %v660_v28  ;;  %v664_v30 = vld [vmem:[%s3673_s25 + $0xd60] sm:$0xff]  ;;  %v666_v31 = vld [vmem:[%s3673_s25 + $0xd68] sm:$0xff]  ;;  %663 = vst [vmem:[%s3678_s6 + $0x6a8] sm:$0xff] %v662_v29 }
  0xa1   : > { %665 = vst [vmem:[%s3678_s6 + $0x6b0] sm:$0xff] %v664_v30  ;;  %667 = vst [vmem:[%s3678_s6 + $0x6b8] sm:$0xff] %v666_v31  ;;  %v668_v32 = vld [vmem:[%s3673_s25 + $0xd80] sm:$0xff]  ;;  %v670_v33 = vld [vmem:[%s3673_s25 + $0xd88] sm:$0xff] }
  0xa2   : > { %v672_v34 = vld [vmem:[%s3673_s25 + $0xda0] sm:$0xff]  ;;  %669 = vst [vmem:[%s3678_s6 + $0x6c0] sm:$0xff] %v668_v32  ;;  %671 = vst [vmem:[%s3678_s6 + $0x6c8] sm:$0xff] %v670_v33  ;;  %v674_v35 = vld [vmem:[%s3673_s25 + $0xda8] sm:$0xff] }
  0xa3   : > { %673 = vst [vmem:[%s3678_s6 + $0x6d0] sm:$0xff] %v672_v34  ;;  %v676_v36 = vld [vmem:[%s3673_s25 + $0xdc0] sm:$0xff]  ;;  %v678_v37 = vld [vmem:[%s3673_s25 + $0xdc8] sm:$0xff]  ;;  %675 = vst [vmem:[%s3678_s6 + $0x6d8] sm:$0xff] %v674_v35 }
  0xa4   : > { %677 = vst [vmem:[%s3678_s6 + $0x6e0] sm:$0xff] %v676_v36  ;;  %679 = vst [vmem:[%s3678_s6 + $0x6e8] sm:$0xff] %v678_v37  ;;  %v680_v38 = vld [vmem:[%s3673_s25 + $0xde0] sm:$0xff]  ;;  %v682_v39 = vld [vmem:[%s3673_s25 + $0xde8] sm:$0xff] }
  0xa5   : > { %681 = vst [vmem:[%s3678_s6 + $0x6f0] sm:$0xff] %v680_v38  ;;  %683 = vst [vmem:[%s3678_s6 + $0x6f8] sm:$0xff] %v682_v39 }
  0xa6 PF: > { %p2757_p0 = scmp.ge.s32.totalorder %s3535_s22, 1  ;;  %p696_p1 = scmp.lt.s32.totalorder %s3535_s22, 15 }
  0xa8   : > { %p697_p2 = pnand %p2757_p0, %p696_p1 }
  0xa9   : > { %s703_s0 = sand.u32 (!%p697_p2), 1, %s3511_s16   ;;  %s710_s5 = sand.u32 (!%p697_p2), 1, %s3503_s14  }
  0xaa   : > { %700 = sbr.rel (%p697_p2) target bundleno = 643 (0x283), region = 73  ;;  %s737_s28 = sand.u32 (!%p697_p2), 1, %s3495_s12  }
  0xab   : > { %s3011_s23 = smul.u32 (!%p697_p2), 56, %s703_s0  ;;  %s2758_s25 = sshll.u32 (!%p697_p2), %s737_s28, 5 }
  0xac   : > { %s3012_s7 = smul.u32 (!%p697_p2), 1792, %s710_s5  ;;  %s2759_s11 = sshll.u32 (!%p697_p2), %s3523_s19, 2 }
  0xad   : > { %p745_p3 = scmp.lt.s32.totalorder (!%p697_p2), %s2759_s11, 7  ;;  %s4137_s4 = scalar_lea.vmem (!%p697_p2), [#allocation3], %s3011_s23 }
  0xae   : > { %s4139_s6 = scalar_lea.vmem (!%p697_p2), [#allocation4], %s3012_s7  ;;  %s4141_s1 = scalar_lea.vmem (!%p697_p2), [#allocation5], %s2758_s25 }
  0xaf   : > { %s4489_s11 = smov (!%p745_p3, %s2759_s11), 7  ;;  %p2760_p4 = scmp.ne.s32.totalorder %s3519_s18, 0 }
  0xb0   : > { %s747_s29 = scalar_lea.vmem %s4460_s2, %s4489_s11 }
  0xb1   : > { %755 = sbr.rel (%p2760_p4) target bundleno = 187 (0xbb), region = 85 }
  0xb6   : > { %v3537_v40 = vmov 0.0  }
  0xb7   : > { %756 = vst [vmem:[#allocation2 + $0x30] sm:$0xff] %v3537_v40  ;;  %757 = vst [vmem:[#allocation2] sm:$0xff] %v3537_v40 }
  0xb8   : > { %758 = vst [vmem:[#allocation2 + $0x18] sm:$0xff] %v3537_v40  ;;  %759 = vst [vmem:[#allocation2 + $0x10] sm:$0xff] %v3537_v40 }
  0xb9   : > { %760 = vst [vmem:[#allocation2 + $0x8] sm:$0xff] %v3537_v40  ;;  %761 = vst [vmem:[#allocation2 + $0x20] sm:$0xff] %v3537_v40 }
  0xba   : > { %762 = vst [vmem:[#allocation2 + $0x28] sm:$0xff] %v3537_v40  ;;  %763 = vst [vmem:[#allocation2 + $0x38] sm:$0xff] %v3537_v40 }
  0xbb PF: > { %v3103_v41 = vld [vmem:[%s4139_s6 + $0xe4] ss:$16 sps:$4 sm:$0xff]   ;;  %v3107_v43 = vld [vmem:[%s4139_s6 + $0xe0] ss:$16 sps:$4 sm:$0xff]   ;;  %p2992_p5 = scmp.ne.s32.totalorder %s3519_s18, 6 }
  0xbc   : > { %v3105_v42 = vld [vmem:[%s4139_s6 + $0x2e4] ss:$16 sps:$4 sm:$0xff]   ;;  %2160 = vmatprep.subr.bf16.mxu0 %v3103_v41  ;;  %v3108_v44 = vld [vmem:[%s4139_s6 + $0x2e0] ss:$16 sps:$4 sm:$0xff]  }
  0xbd   : > { %2203 = vmatprep.subr.bf16.mxu1 %v3105_v42  ;;  %v3109_v45 = vld [vmem:[%s4139_s6 + $0xc4] ss:$16 sps:$4 sm:$0xff]   ;;  %2161 = vmatpush1.bf16.msra.mxu0 %v3107_v43  ;;  %v3113_v47 = vld [vmem:[%s4139_s6 + $0xc0] ss:$16 sps:$4 sm:$0xff]  }
  0xbe   : > { %2204 = vmatpush1.bf16.msra.mxu1 %v3108_v44  ;;  %v3111_v46 = vld [vmem:[%s4139_s6 + $0x2c4] ss:$16 sps:$4 sm:$0xff]   ;;  %2162 = vmatprep.subr.bf16.mxu0 %v3109_v45  ;;  %v3114_v48 = vld [vmem:[%s4139_s6 + $0x2c0] ss:$16 sps:$4 sm:$0xff]  }
  0xbf   : > { %2205 = vmatprep.subr.bf16.mxu1 %v3111_v46  ;;  %v3115_v49 = vld [vmem:[%s4139_s6 + $0xa4] ss:$16 sps:$4 sm:$0xff]   ;;  %v3119_v51 = vld [vmem:[%s4139_s6 + $0xa0] ss:$16 sps:$4 sm:$0xff]  }
  0xc0   : > { %v3117_v50 = vld [vmem:[%s4139_s6 + $0x2a4] ss:$16 sps:$4 sm:$0xff]   ;;  %v3120_v52 = vld [vmem:[%s4139_s6 + $0x2a0] ss:$16 sps:$4 sm:$0xff]  }
  0xc1   : > { %2163 = vmatpush1.bf16.msra.mxu0 %v3113_v47  ;;  %v3121_v53 = vld [vmem:[%s4139_s6 + $0x84] ss:$16 sps:$4 sm:$0xff]   ;;  %v3125_v55 = vld [vmem:[%s4139_s6 + $0x80] ss:$16 sps:$4 sm:$0xff]  }
  0xc2   : > { %2206 = vmatpush1.bf16.msra.mxu1 %v3114_v48  ;;  %2164 = vmatprep.subr.bf16.mxu0 %v3115_v49  ;;  %v3123_v54 = vld [vmem:[%s4139_s6 + $0x284] ss:$16 sps:$4 sm:$0xff]   ;;  %v3126_v56 = vld [vmem:[%s4139_s6 + $0x280] ss:$16 sps:$4 sm:$0xff]  }
  0xc3   : > { %2207 = vmatprep.subr.bf16.mxu1 %v3117_v50  ;;  %v3127_v57 = vld [vmem:[%s4139_s6 + $0x64] ss:$16 sps:$4 sm:$0xff]   ;;  %v3131_v59 = vld [vmem:[%s4139_s6 + $0x60] ss:$16 sps:$4 sm:$0xff]  }
  0xc4   : > { %v3129_v58 = vld [vmem:[%s4139_s6 + $0x264] ss:$16 sps:$4 sm:$0xff]   ;;  %v3132_v60 = vld [vmem:[%s4139_s6 + $0x260] ss:$16 sps:$4 sm:$0xff]  }
  0xc5   : > { %2165 = vmatpush1.bf16.msra.mxu0 %v3119_v51  ;;  %v3133_v61 = vld [vmem:[%s4139_s6 + $0x44] ss:$16 sps:$4 sm:$0xff]   ;;  %v3137_v63 = vld [vmem:[%s4139_s6 + $0x40] ss:$16 sps:$4 sm:$0xff]  }
  0xc6   : > { %2208 = vmatpush1.bf16.msra.mxu1 %v3120_v52  ;;  %2166 = vmatprep.subr.bf16.mxu0 %v3121_v53  ;;  %v3135_v62 = vld [vmem:[%s4139_s6 + $0x244] ss:$16 sps:$4 sm:$0xff]   ;;  %v3138_v0 = vld [vmem:[%s4139_s6 + $0x240] ss:$16 sps:$4 sm:$0xff]  }
  0xc7   : > { %2209 = vmatprep.subr.bf16.mxu1 %v3123_v54  ;;  %v3139_v1 = vld [vmem:[%s4139_s6 + $0x24] ss:$16 sps:$4 sm:$0xff]   ;;  %v3143_v3 = vld [vmem:[%s4139_s6 + $0x20] ss:$16 sps:$4 sm:$0xff]  }
  0xc8   : > { %v3141_v2 = vld [vmem:[%s4139_s6 + $0x224] ss:$16 sps:$4 sm:$0xff]   ;;  %v3144_v4 = vld [vmem:[%s4139_s6 + $0x220] ss:$16 sps:$4 sm:$0xff]  }
  0xc9   : > { %2167 = vmatpush1.bf16.msra.mxu0 %v3125_v55  ;;  %v3145_v5 = vld [vmem:[%s4139_s6 + $0x4] ss:$16 sps:$4 sm:$0xff]   ;;  %v3149_v7 = vld [vmem:[%s4139_s6] ss:$16 sps:$4 sm:$0xff]   ;;  %v3538_v55 = vmov 0  }
  0xca   : > { %2210 = vmatpush1.bf16.msra.mxu1 %v3126_v56  ;;  %2168 = vmatprep.subr.bf16.mxu0 %v3127_v57  ;;  %v3147_v6 = vld [vmem:[%s4139_s6 + $0x204] ss:$16 sps:$4 sm:$0xff]   ;;  %v3150_v8 = vld [vmem:[%s4139_s6 + $0x200] ss:$16 sps:$4 sm:$0xff]  }
  0xcb   : > { %2211 = vmatprep.subr.bf16.mxu1 %v3129_v58  ;;  %v3151_v9 = vld [vmem:[%s4139_s6 + $0x1e4] ss:$16 sps:$4 sm:$0xff]   ;;  %v3155_v11 = vld [vmem:[%s4139_s6 + $0x1e0] ss:$16 sps:$4 sm:$0xff]  }
  0xcc   : > { %v3153_v10 = vld [vmem:[%s4139_s6 + $0x3e4] ss:$16 sps:$4 sm:$0xff]   ;;  %v3156_v12 = vld [vmem:[%s4139_s6 + $0x3e0] ss:$16 sps:$4 sm:$0xff]  }
  0xcd   : > { %2169 = vmatpush1.bf16.msra.mxu0 %v3131_v59  ;;  %v3157_v13 = vld [vmem:[%s4139_s6 + $0x1c4] ss:$16 sps:$4 sm:$0xff]   ;;  %v3161_v15 = vld [vmem:[%s4139_s6 + $0x1c0] ss:$16 sps:$4 sm:$0xff]  }
  0xce   : > { %2212 = vmatpush1.bf16.msra.mxu1 %v3132_v60  ;;  %2170 = vmatprep.subr.bf16.mxu0 %v3133_v61  ;;  %v3159_v14 = vld [vmem:[%s4139_s6 + $0x3c4] ss:$16 sps:$4 sm:$0xff]   ;;  %v3162_v16 = vld [vmem:[%s4139_s6 + $0x3c0] ss:$16 sps:$4 sm:$0xff]  }
  0xcf   : > { %2213 = vmatprep.subr.bf16.mxu1 %v3135_v62  ;;  %v3163_v17 = vld [vmem:[%s4139_s6 + $0x1a4] ss:$16 sps:$4 sm:$0xff]   ;;  %v3167_v19 = vld [vmem:[%s4139_s6 + $0x1a0] ss:$16 sps:$4 sm:$0xff]  }
  0xd0   : > { %v3165_v18 = vld [vmem:[%s4139_s6 + $0x3a4] ss:$16 sps:$4 sm:$0xff]   ;;  %v3168_v20 = vld [vmem:[%s4139_s6 + $0x3a0] ss:$16 sps:$4 sm:$0xff]  }
  0xd1   : > { %2171 = vmatpush1.bf16.msra.mxu0 %v3137_v63  ;;  %v3169_v21 = vld [vmem:[%s4139_s6 + $0x184] ss:$16 sps:$4 sm:$0xff]   ;;  %v3173_v23 = vld [vmem:[%s4139_s6 + $0x180] ss:$16 sps:$4 sm:$0xff]  }
  0xd2   : > { %2214 = vmatpush1.bf16.msra.mxu1 %v3138_v0  ;;  %2172 = vmatprep.subr.bf16.mxu0 %v3139_v1  ;;  %v3171_v22 = vld [vmem:[%s4139_s6 + $0x384] ss:$16 sps:$4 sm:$0xff]   ;;  %v3174_v24 = vld [vmem:[%s4139_s6 + $0x380] ss:$16 sps:$4 sm:$0xff]  }
  0xd3   : > { %2215 = vmatprep.subr.bf16.mxu1 %v3141_v2  ;;  %v3175_v25 = vld [vmem:[%s4139_s6 + $0x164] ss:$16 sps:$4 sm:$0xff]   ;;  %v3179_v29 = vld [vmem:[%s4139_s6 + $0x160] ss:$16 sps:$4 sm:$0xff]  }
  0xd4   : > { %v4194_v26 = vld [vmem:[%s4137_s4 + $0x4] ss:$28 sps:$4 sm:$0xff]   ;;  %v4198_v28 = vld [vmem:[%s4137_s4 + $0xc] ss:$28 sps:$4 sm:$0xff]  }
  0xd5   : > { %2173 = vmatpush1.bf16.msra.mxu0 %v3143_v3  ;;  %v3177_v27 = vld [vmem:[%s4139_s6 + $0x364] ss:$16 sps:$4 sm:$0xff]   ;;  %2192 = vmatprep.mubr.bf16.mxu0 %v4194_v26  ;;  %v3180_v30 = vld [vmem:[%s4139_s6 + $0x360] ss:$16 sps:$4 sm:$0xff]  }
  0xd6   : > { %2216 = vmatpush1.bf16.msra.mxu1 %v3144_v4  ;;  %2174 = vmatprep.subr.bf16.mxu0 %v3145_v5  ;;  %v3181_v31 = vld [vmem:[%s4139_s6 + $0x144] ss:$16 sps:$4 sm:$0xff]   ;;  %v3185_v33 = vld [vmem:[%s4139_s6 + $0x140] ss:$16 sps:$4 sm:$0xff]  }
  0xd7   : > { %2217 = vmatprep.subr.bf16.mxu1 %v3147_v6  ;;  %2235 = vmatprep.mubr.bf16.mxu1 %v4198_v28  ;;  %v3183_v32 = vld [vmem:[%s4139_s6 + $0x344] ss:$16 sps:$4 sm:$0xff]   ;;  %v3186_v34 = vld [vmem:[%s4139_s6 + $0x340] ss:$16 sps:$4 sm:$0xff]  }
  0xd8   : > { %v3187_v35 = vld [vmem:[%s4139_s6 + $0x124] ss:$16 sps:$4 sm:$0xff]   ;;  %v3191_v37 = vld [vmem:[%s4139_s6 + $0x120] ss:$16 sps:$4 sm:$0xff]  }
  0xd9   : > { %2175 = vmatpush1.bf16.msra.mxu0 %v3149_v7  ;;  %v3189_v36 = vld [vmem:[%s4139_s6 + $0x324] ss:$16 sps:$4 sm:$0xff]   ;;  %v3192_v38 = vld [vmem:[%s4139_s6 + $0x320] ss:$16 sps:$4 sm:$0xff]  }
  0xda   : > { %2218 = vmatpush1.bf16.msra.mxu1 %v3150_v8  ;;  %2176 = vmatprep.subr.bf16.mxu0 %v3151_v9  ;;  %v3193_v39 = vld [vmem:[%s4139_s6 + $0x104] ss:$16 sps:$4 sm:$0xff]   ;;  %v3197_v41 = vld [vmem:[%s4139_s6 + $0x100] ss:$16 sps:$4 sm:$0xff]  }
  0xdb   : > { %2219 = vmatprep.subr.bf16.mxu1 %v3153_v10  ;;  %v3195_v40 = vld [vmem:[%s4139_s6 + $0x304] ss:$16 sps:$4 sm:$0xff]   ;;  %v3198_v42 = vld [vmem:[%s4139_s6 + $0x300] ss:$16 sps:$4 sm:$0xff]  }
  0xdc   : > { %v3207_v43 = vld [vmem:[%s4139_s6 + $0x4e4] ss:$16 sps:$4 sm:$0xff]   ;;  %v3205_v47 = vld [vmem:[%s4139_s6 + $0x4e0] ss:$16 sps:$4 sm:$0xff]  }
  0xdd   : > { %2177 = vmatpush2.bf16.msra.mxu0 %v3155_v11  ;;  %v3210_v44 = vld [vmem:[%s4139_s6 + $0x6e4] ss:$16 sps:$4 sm:$0xff]   ;;  %v3208_v48 = vld [vmem:[%s4139_s6 + $0x6e0] ss:$16 sps:$4 sm:$0xff]  }
  0xde   : > { %2220 = vmatpush2.bf16.msra.mxu1 %v3156_v12  ;;  %2178 = vmatprep.subr.bf16.mxu0 %v3157_v13  ;;  %v4219_v45 = vld [vmem:[%s4137_s4] ss:$28 sps:$4 sm:$0xff]   ;;  %v4222_v46 = vld [vmem:[%s4137_s4 + $0x8] ss:$28 sps:$4 sm:$0xff]   ;;  %v4256_v12 = vld [vmem:[%s4137_s4 + $0x14] ss:$28 sps:$4 sm:$0xff]  }
  0xdf   : > { %2221 = vmatprep.subr.bf16.mxu1 %v3159_v14  ;;  %v3213_v49 = vld [vmem:[%s4139_s6 + $0x4c4] ss:$16 sps:$4 sm:$0xff]   ;;  %v3211_v51 = vld [vmem:[%s4139_s6 + $0x4c0] ss:$16 sps:$4 sm:$0xff]  }
  0xe0   : > { %v3216_v50 = vld [vmem:[%s4139_s6 + $0x6c4] ss:$16 sps:$4 sm:$0xff]   ;;  %v3214_v52 = vld [vmem:[%s4139_s6 + $0x6c0] ss:$16 sps:$4 sm:$0xff]  }
  0xe1   : > { %2179 = vmatpush2.bf16.msra.mxu0 %v3161_v15  ;;  %v3219_v53 = vld [vmem:[%s4139_s6 + $0x4a4] ss:$16 sps:$4 sm:$0xff]   ;;  %v3217_v56 = vld [vmem:[%s4139_s6 + $0x4a0] ss:$16 sps:$4 sm:$0xff]  }
  0xe2   : > { %2222 = vmatpush2.bf16.msra.mxu1 %v3162_v16  ;;  %2180 = vmatprep.subr.bf16.mxu0 %v3163_v17  ;;  %v3222_v54 = vld [vmem:[%s4139_s6 + $0x6a4] ss:$16 sps:$4 sm:$0xff]   ;;  %v3220_v57 = vld [vmem:[%s4139_s6 + $0x6a0] ss:$16 sps:$4 sm:$0xff]   ;;  %v3259_v16 = vld [vmem:[%s4139_s6 + $0xec] ss:$16 sps:$4 sm:$0xff]  }
  0xe3   : > { %2223 = vmatprep.subr.bf16.mxu1 %v3165_v18  ;;  %v3225_v58 = vld [vmem:[%s4139_s6 + $0x484] ss:$16 sps:$4 sm:$0xff]   ;;  %v3223_v60 = vld [vmem:[%s4139_s6 + $0x480] ss:$16 sps:$4 sm:$0xff]  }
  0xe4   : > { %v3228_v59 = vld [vmem:[%s4139_s6 + $0x684] ss:$16 sps:$4 sm:$0xff]   ;;  %v3226_v61 = vld [vmem:[%s4139_s6 + $0x680] ss:$16 sps:$4 sm:$0xff]  }
  0xe5   : > { %2181 = vmatpush2.bf16.msra.mxu0 %v3167_v19  ;;  %v3231_v62 = vld [vmem:[%s4139_s6 + $0x464] ss:$16 sps:$4 sm:$0xff]   ;;  %v3229_v0 = vld [vmem:[%s4139_s6 + $0x460] ss:$16 sps:$4 sm:$0xff]   ;;  %v3257_v19 = vld [vmem:[%s4139_s6 + $0xe8] ss:$16 sps:$4 sm:$0xff]  }
  0xe6   : > { %2224 = vmatpush2.bf16.msra.mxu1 %v3168_v20  ;;  %2182 = vmatprep.subr.bf16.mxu0 %v3169_v21  ;;  %v3234_v63 = vld [vmem:[%s4139_s6 + $0x664] ss:$16 sps:$4 sm:$0xff]   ;;  %v3232_v1 = vld [vmem:[%s4139_s6 + $0x660] ss:$16 sps:$4 sm:$0xff]   ;;  %v3265_v21 = vld [vmem:[%s4139_s6 + $0xcc] ss:$16 sps:$4 sm:$0xff]  }
  0xe7   : > { %2225 = vmatprep.subr.bf16.mxu1 %v3171_v22  ;;  %v3237_v2 = vld [vmem:[%s4139_s6 + $0x444] ss:$16 sps:$4 sm:$0xff]   ;;  %v3235_v4 = vld [vmem:[%s4139_s6 + $0x440] ss:$16 sps:$4 sm:$0xff]  }
  0xe8   : > { %v3240_v3 = vld [vmem:[%s4139_s6 + $0x644] ss:$16 sps:$4 sm:$0xff]   ;;  %v3238_v5 = vld [vmem:[%s4139_s6 + $0x640] ss:$16 sps:$4 sm:$0xff]  }
  0xe9   : > { %2183 = vmatpush2.bf16.msra.mxu0 %v3173_v23  ;;  %v3243_v6 = vld [vmem:[%s4139_s6 + $0x424] ss:$16 sps:$4 sm:$0xff]   ;;  %v3241_v8 = vld [vmem:[%s4139_s6 + $0x420] ss:$16 sps:$4 sm:$0xff]   ;;  %v3263_v23 = vld [vmem:[%s4139_s6 + $0xc8] ss:$16 sps:$4 sm:$0xff]  }
  0xea   : > { %2226 = vmatpush2.bf16.msra.mxu1 %v3174_v24  ;;  %2184 = vmatprep.subr.bf16.mxu0 %v3175_v25  ;;  %v3246_v7 = vld [vmem:[%s4139_s6 + $0x624] ss:$16 sps:$4 sm:$0xff]   ;;  %v3244_v9 = vld [vmem:[%s4139_s6 + $0x620] ss:$16 sps:$4 sm:$0xff]   ;;  %v3271_v25 = vld [vmem:[%s4139_s6 + $0xac] ss:$16 sps:$4 sm:$0xff]  }
  0xeb   : > { %2227 = vmatprep.subr.bf16.mxu1 %v3177_v27  ;;  %v3249_v10 = vld [vmem:[%s4139_s6 + $0x404] ss:$16 sps:$4 sm:$0xff]   ;;  %v3247_v13 = vld [vmem:[%s4139_s6 + $0x400] ss:$16 sps:$4 sm:$0xff]  }
  0xec   : > { %v3252_v11 = vld [vmem:[%s4139_s6 + $0x604] ss:$16 sps:$4 sm:$0xff]   ;;  %v3250_v14 = vld [vmem:[%s4139_s6 + $0x600] ss:$16 sps:$4 sm:$0xff]  }
  0xed   : > { %2185 = vmatpush2.bf16.msra.mxu0 %v3179_v29  ;;  %v3255_v15 = vld [vmem:[%s4139_s6 + $0x5e4] ss:$16 sps:$4 sm:$0xff]   ;;  %v3253_v17 = vld [vmem:[%s4139_s6 + $0x5e0] ss:$16 sps:$4 sm:$0xff]   ;;  %v3269_v29 = vld [vmem:[%s4139_s6 + $0xa8] ss:$16 sps:$4 sm:$0xff]  }
  0xee   : > { %2228 = vmatpush2.bf16.msra.mxu1 %v3180_v30  ;;  %2186 = vmatprep.subr.bf16.mxu0 %v3181_v31  ;;  %v4265_v18 = vld [vmem:[%s4137_s4 + $0x18] ss:$28 sps:$4 sm:$0xff]  }
  0xef   : > { %2229 = vmatprep.subr.bf16.mxu1 %v3183_v32  ;;  %v3262_v20 = vld [vmem:[%s4139_s6 + $0x5c4] ss:$16 sps:$4 sm:$0xff]   ;;  %v3260_v22 = vld [vmem:[%s4139_s6 + $0x5c0] ss:$16 sps:$4 sm:$0xff]   ;;  %v3277_v31 = vld [vmem:[%s4139_s6 + $0x8c] ss:$16 sps:$4 sm:$0xff]  }
  0xf0   : > { %v3268_v24 = vld [vmem:[%s4139_s6 + $0x5a4] ss:$16 sps:$4 sm:$0xff]   ;;  %v3266_v27 = vld [vmem:[%s4139_s6 + $0x5a0] ss:$16 sps:$4 sm:$0xff]  }
  0xf1   : > { %2187 = vmatpush2.bf16.msra.mxu0 %v3185_v33  ;;  %v3274_v30 = vld [vmem:[%s4139_s6 + $0x584] ss:$16 sps:$4 sm:$0xff]   ;;  %v3272_v32 = vld [vmem:[%s4139_s6 + $0x580] ss:$16 sps:$4 sm:$0xff]   ;;  %v3275_v33 = vld [vmem:[%s4139_s6 + $0x88] ss:$16 sps:$4 sm:$0xff]  }
  0xf2   : > { %2230 = vmatpush2.bf16.msra.mxu1 %v3186_v34  ;;  %2188 = vmatprep.subr.bf16.mxu0 %v3187_v35  ;;  %v3283_v34 = vld [vmem:[%s4139_s6 + $0x6c] ss:$16 sps:$4 sm:$0xff]   ;;  %v3278_v35 = vld [vmem:[%s4139_s6 + $0x560] ss:$16 sps:$4 sm:$0xff]  }
  0xf3   : > { %2231 = vmatprep.subr.bf16.mxu1 %v3189_v36  ;;  %v3281_v36 = vld [vmem:[%s4139_s6 + $0x68] ss:$16 sps:$4 sm:$0xff]  }
  0xf5   : > { %2189 = vmatpush2.bf16.msra.mxu0 %v3191_v37  ;;  %v3286_v37 = vld [vmem:[%s4139_s6 + $0x544] ss:$16 sps:$4 sm:$0xff]  }
  0xf6   : > { %2232 = vmatpush2.bf16.msra.mxu1 %v3192_v38  ;;  %2190 = vmatprep.subr.bf16.mxu0 %v3193_v39  ;;  %v3289_v38 = vld [vmem:[%s4139_s6 + $0x4c] ss:$16 sps:$4 sm:$0xff]   ;;  %v3284_v39 = vld [vmem:[%s4139_s6 + $0x540] ss:$16 sps:$4 sm:$0xff]  }
  0xf7   : > { %2233 = vmatprep.subr.bf16.mxu1 %v3195_v40  ;;  %v3287_v40 = vld [vmem:[%s4139_s6 + $0x48] ss:$16 sps:$4 sm:$0xff]  }
  0xf9   : > { %2191 = vmatpush2.bf16.msra.mxu0 %v3197_v41  ;;  %v3292_v41 = vld [vmem:[%s4139_s6 + $0x524] ss:$16 sps:$4 sm:$0xff]  }
  0xfa   : > { %2234 = vmatpush2.bf16.msra.mxu1 %v3198_v42  ;;  %2246 = vmatprep.subr.bf16.mxu0 %v3207_v43  ;;  %v3295_v42 = vld [vmem:[%s4139_s6 + $0x2c] ss:$16 sps:$4 sm:$0xff]   ;;  %v3290_v43 = vld [vmem:[%s4139_s6 + $0x520] ss:$16 sps:$4 sm:$0xff]  }
  0xfb   : > { %2289 = vmatprep.subr.bf16.mxu1 %v3210_v44  ;;  %v3293_v44 = vld [vmem:[%s4139_s6 + $0x28] ss:$16 sps:$4 sm:$0xff]  }
  0xfc   : > { %2193 = vmatmul.mubr.bf16.vlgmr.msra.gmra.mxu0 %v4219_v45 }
  0xfd   : > { %2236 = vmatmul.mubr.bf16.vlgmr.msra.gmra.mxu1 %v4222_v46  ;;  %2247 = vmatpush1.bf16.msra.mxu0 %v3205_v47  ;;  %v3298_v47 = vld [vmem:[%s4139_s6 + $0x504] ss:$16 sps:$4 sm:$0xff]  }
  0xfe   : > { %2290 = vmatpush1.bf16.msra.mxu1 %v3208_v48  ;;  %2248 = vmatprep.subr.bf16.mxu0 %v3213_v49  ;;  %v3301_v48 = vld [vmem:[%s4139_s6 + $0xc] ss:$16 sps:$4 sm:$0xff]   ;;  %v3296_v49 = vld [vmem:[%s4139_s6 + $0x500] ss:$16 sps:$4 sm:$0xff]  }
  0xff   : > { %2291 = vmatprep.subr.bf16.mxu1 %v3216_v50  ;;  %2321 = vmatprep.mubr.bf16.mxu1 %v3538_v55  ;;  %v3299_v50 = vld [vmem:[%s4139_s6 + $0x8] ss:$16 sps:$4 sm:$0xff]  }
 0x100   : > { %2278 = vmatprep.mubr.bf16.mxu0 %v4256_v12 }
 0x101   : > { %2249 = vmatpush1.bf16.msra.mxu0 %v3211_v51  ;;  %v3307_v51 = vld [vmem:[%s4139_s6 + $0x1ec] ss:$16 sps:$4 sm:$0xff]  }
 0x102   : > { %2292 = vmatpush1.bf16.msra.mxu1 %v3214_v52  ;;  %2250 = vmatprep.subr.bf16.mxu0 %v3219_v53  ;;  %v3310_v52 = vld [vmem:[%s4139_s6 + $0x2ec] ss:$16 sps:$4 sm:$0xff]  }
 0x103   : > { %2293 = vmatprep.subr.bf16.mxu1 %v3222_v54  ;;  %v4301_v53 = vld [vmem:[%s4137_s4 + $0x10] ss:$28 sps:$4 sm:$0xff]  }
 0x104   : > { %v3305_v54 = vld [vmem:[%s4139_s6 + $0x1e8] ss:$16 sps:$4 sm:$0xff]  }
 0x105   : > { %2251 = vmatpush1.bf16.msra.mxu0 %v3217_v56  ;;  %v3308_v56 = vld [vmem:[%s4139_s6 + $0x2e8] ss:$16 sps:$4 sm:$0xff]  }
 0x106   : > { %2294 = vmatpush1.bf16.msra.mxu1 %v3220_v57  ;;  %2252 = vmatprep.subr.bf16.mxu0 %v3225_v58  ;;  %v3313_v57 = vld [vmem:[%s4139_s6 + $0x1cc] ss:$16 sps:$4 sm:$0xff]  }
 0x107   : > { %2295 = vmatprep.subr.bf16.mxu1 %v3228_v59  ;;  %v3316_v58 = vld [vmem:[%s4139_s6 + $0x2cc] ss:$16 sps:$4 sm:$0xff]   ;;  %v3311_v59 = vld [vmem:[%s4139_s6 + $0x1c8] ss:$16 sps:$4 sm:$0xff]  }
 0x109   : > { %2253 = vmatpush1.bf16.msra.mxu0 %v3223_v60  ;;  %v3314_v60 = vld [vmem:[%s4139_s6 + $0x2c8] ss:$16 sps:$4 sm:$0xff]  }
 0x10a   : > { %2296 = vmatpush1.bf16.msra.mxu1 %v3226_v61  ;;  %2254 = vmatprep.subr.bf16.mxu0 %v3231_v62  ;;  %v3319_v61 = vld [vmem:[%s4139_s6 + $0x1ac] ss:$16 sps:$4 sm:$0xff]  }
 0x10b   : > { %2297 = vmatprep.subr.bf16.mxu1 %v3234_v63  ;;  %v3322_v62 = vld [vmem:[%s4139_s6 + $0x2ac] ss:$16 sps:$4 sm:$0xff]   ;;  %v3317_v63 = vld [vmem:[%s4139_s6 + $0x1a8] ss:$16 sps:$4 sm:$0xff]  }
 0x10d   : > { %2255 = vmatpush1.bf16.msra.mxu0 %v3229_v0  ;;  %v3320_v0 = vld [vmem:[%s4139_s6 + $0x2a8] ss:$16 sps:$4 sm:$0xff]  }
 0x10e   : > { %2298 = vmatpush1.bf16.msra.mxu1 %v3232_v1  ;;  %2256 = vmatprep.subr.bf16.mxu0 %v3237_v2  ;;  %v3325_v1 = vld [vmem:[%s4139_s6 + $0x18c] ss:$16 sps:$4 sm:$0xff]  }
 0x10f   : > { %2299 = vmatprep.subr.bf16.mxu1 %v3240_v3  ;;  %v3328_v2 = vld [vmem:[%s4139_s6 + $0x28c] ss:$16 sps:$4 sm:$0xff]   ;;  %v3323_v3 = vld [vmem:[%s4139_s6 + $0x188] ss:$16 sps:$4 sm:$0xff]  }
 0x111   : > { %2257 = vmatpush1.bf16.msra.mxu0 %v3235_v4  ;;  %v3326_v4 = vld [vmem:[%s4139_s6 + $0x288] ss:$16 sps:$4 sm:$0xff]  }
 0x112   : > { %2300 = vmatpush1.bf16.msra.mxu1 %v3238_v5  ;;  %2258 = vmatprep.subr.bf16.mxu0 %v3243_v6  ;;  %v3334_v5 = vld [vmem:[%s4139_s6 + $0x26c] ss:$16 sps:$4 sm:$0xff]   ;;  %v3329_v6 = vld [vmem:[%s4139_s6 + $0x168] ss:$16 sps:$4 sm:$0xff]  }
 0x113   : > { %2301 = vmatprep.subr.bf16.mxu1 %v3246_v7  ;;  %v3332_v7 = vld [vmem:[%s4139_s6 + $0x268] ss:$16 sps:$4 sm:$0xff]  }
 0x115   : > { %2259 = vmatpush1.bf16.msra.mxu0 %v3241_v8  ;;  %v3337_v8 = vld [vmem:[%s4139_s6 + $0x14c] ss:$16 sps:$4 sm:$0xff]  }
 0x116   : > { %2302 = vmatpush1.bf16.msra.mxu1 %v3244_v9  ;;  %2260 = vmatprep.subr.bf16.mxu0 %v3249_v10  ;;  %v3340_v9 = vld [vmem:[%s4139_s6 + $0x24c] ss:$16 sps:$4 sm:$0xff]   ;;  %v3335_v10 = vld [vmem:[%s4139_s6 + $0x148] ss:$16 sps:$4 sm:$0xff]  }
 0x117   : > { %2303 = vmatprep.subr.bf16.mxu1 %v3252_v11  ;;  %v3338_v11 = vld [vmem:[%s4139_s6 + $0x248] ss:$16 sps:$4 sm:$0xff]  }
 0x119   : > { %2261 = vmatpush1.bf16.msra.mxu0 %v3247_v13  ;;  %v3343_v13 = vld [vmem:[%s4139_s6 + $0x12c] ss:$16 sps:$4 sm:$0xff]  }
 0x11a   : > { %2304 = vmatpush1.bf16.msra.mxu1 %v3250_v14  ;;  %2262 = vmatprep.subr.bf16.mxu0 %v3255_v15  ;;  %v3346_v14 = vld [vmem:[%s4139_s6 + $0x22c] ss:$16 sps:$4 sm:$0xff]   ;;  %v3341_v15 = vld [vmem:[%s4139_s6 + $0x128] ss:$16 sps:$4 sm:$0xff]  }
 0x11b   : > { %2332 = vmatprep.subr.bf16.mxu1 %v3259_v16  ;;  %v3344_v16 = vld [vmem:[%s4139_s6 + $0x228] ss:$16 sps:$4 sm:$0xff]  }
 0x11d   : > { %2322 = vmatmul.mubr.bf16.vlgmr.msra.gmra.mxu1 %v4265_v18  ;;  %2263 = vmatpush2.bf16.msra.mxu0 %v3253_v17  ;;  %v3349_v17 = vld [vmem:[%s4139_s6 + $0x10c] ss:$16 sps:$4 sm:$0xff]  }
 0x11e   : > { %2333 = vmatpush1.bf16.msra.mxu1 %v3257_v19  ;;  %2264 = vmatprep.subr.bf16.mxu0 %v3262_v20  ;;  %v3352_v19 = vld [vmem:[%s4139_s6 + $0x20c] ss:$16 sps:$4 sm:$0xff]   ;;  %v3347_v20 = vld [vmem:[%s4139_s6 + $0x108] ss:$16 sps:$4 sm:$0xff]  }
 0x11f   : > { %2334 = vmatprep.subr.bf16.mxu1 %v3265_v21  ;;  %2364 = vmatprep.mubr.bf16.mxu1 %v4194_v26  ;;  %v3280_v26 = vld [vmem:[%s4139_s6 + $0x564] ss:$16 sps:$4 sm:$0xff]   ;;  %v3350_v21 = vld [vmem:[%s4139_s6 + $0x208] ss:$16 sps:$4 sm:$0xff]  }
 0x121   : > { %2265 = vmatpush2.bf16.msra.mxu0 %v3260_v22  ;;  %v3355_v22 = vld [vmem:[%s4139_s6 + $0x3ec] ss:$16 sps:$4 sm:$0xff]  }
 0x122   : > { %2335 = vmatpush1.bf16.msra.mxu1 %v3263_v23  ;;  %2266 = vmatprep.subr.bf16.mxu0 %v3268_v24  ;;  %v3358_v23 = vld [vmem:[%s4139_s6 + $0x4ec] ss:$16 sps:$4 sm:$0xff]   ;;  %v3353_v24 = vld [vmem:[%s4139_s6 + $0x3e8] ss:$16 sps:$4 sm:$0xff]  }
 0x123   : > { %2336 = vmatprep.subr.bf16.mxu1 %v3271_v25  ;;  %v3356_v25 = vld [vmem:[%s4139_s6 + $0x4e8] ss:$16 sps:$4 sm:$0xff]  }
 0x125   : > { %2267 = vmatpush2.bf16.msra.mxu0 %v3266_v27  ;;  %v3361_v27 = vld [vmem:[%s4139_s6 + $0x3cc] ss:$16 sps:$4 sm:$0xff]  }
 0x126   : > { %2337 = vmatpush1.bf16.msra.mxu1 %v3269_v29  ;;  %2268 = vmatprep.subr.bf16.mxu0 %v3274_v30  ;;  %v3364_v29 = vld [vmem:[%s4139_s6 + $0x4cc] ss:$16 sps:$4 sm:$0xff]   ;;  %v3359_v30 = vld [vmem:[%s4139_s6 + $0x3c8] ss:$16 sps:$4 sm:$0xff]  }
 0x127   : > { %2338 = vmatprep.subr.bf16.mxu1 %v3277_v31  ;;  %v3362_v31 = vld [vmem:[%s4139_s6 + $0x4c8] ss:$16 sps:$4 sm:$0xff]  }
 0x129   : > { %2269 = vmatpush2.bf16.msra.mxu0 %v3272_v32  ;;  %v3367_v32 = vld [vmem:[%s4139_s6 + $0x3ac] ss:$16 sps:$4 sm:$0xff]  }
 0x12a   : > { %2339 = vmatpush1.bf16.msra.mxu1 %v3275_v33  ;;  %2270 = vmatprep.subr.bf16.mxu0 %v3280_v26  ;;  %v3370_v33 = vld [vmem:[%s4139_s6 + $0x4ac] ss:$16 sps:$4 sm:$0xff]   ;;  %v3365_v26 = vld [vmem:[%s4139_s6 + $0x3a8] ss:$16 sps:$4 sm:$0xff]  }
 0x12b   : > { %2340 = vmatprep.subr.bf16.mxu1 %v3283_v34  ;;  %v3373_v34 = vld [vmem:[%s4139_s6 + $0x38c] ss:$16 sps:$4 sm:$0xff]  }
 0x12d   : > { %2271 = vmatpush2.bf16.msra.mxu0 %v3278_v35  ;;  %v3376_v35 = vld [vmem:[%s4139_s6 + $0x48c] ss:$16 sps:$4 sm:$0xff]  }
 0x12e   : > { %2341 = vmatpush1.bf16.msra.mxu1 %v3281_v36  ;;  %2272 = vmatprep.subr.bf16.mxu0 %v3286_v37  ;;  %v3371_v36 = vld [vmem:[%s4139_s6 + $0x388] ss:$16 sps:$4 sm:$0xff]  }
 0x12f   : > { %2342 = vmatprep.subr.bf16.mxu1 %v3289_v38  ;;  %v3374_v37 = vld [vmem:[%s4139_s6 + $0x488] ss:$16 sps:$4 sm:$0xff]   ;;  %v3382_v38 = vld [vmem:[%s4139_s6 + $0x46c] ss:$16 sps:$4 sm:$0xff]  }
 0x131   : > { %2273 = vmatpush2.bf16.msra.mxu0 %v3284_v39  ;;  %v3377_v39 = vld [vmem:[%s4139_s6 + $0x368] ss:$16 sps:$4 sm:$0xff]  }
 0x132   : > { %2343 = vmatpush1.bf16.msra.mxu1 %v3287_v40  ;;  %2274 = vmatprep.subr.bf16.mxu0 %v3292_v41  ;;  %v3380_v40 = vld [vmem:[%s4139_s6 + $0x468] ss:$16 sps:$4 sm:$0xff]   ;;  %v3385_v41 = vld [vmem:[%s4139_s6 + $0x34c] ss:$16 sps:$4 sm:$0xff]  }
 0x133   : > { %2344 = vmatprep.subr.bf16.mxu1 %v3295_v42  ;;  %v3388_v42 = vld [vmem:[%s4139_s6 + $0x44c] ss:$16 sps:$4 sm:$0xff]  }
 0x135   : > { %2275 = vmatpush2.bf16.msra.mxu0 %v3290_v43  ;;  %v3383_v43 = vld [vmem:[%s4139_s6 + $0x348] ss:$16 sps:$4 sm:$0xff]  }
 0x136   : > { %2345 = vmatpush1.bf16.msra.mxu1 %v3293_v44  ;;  %2276 = vmatprep.subr.bf16.mxu0 %v3298_v47  ;;  %v3386_v44 = vld [vmem:[%s4139_s6 + $0x448] ss:$16 sps:$4 sm:$0xff]   ;;  %v3391_v47 = vld [vmem:[%s4139_s6 + $0x32c] ss:$16 sps:$4 sm:$0xff]  }
 0x137   : > { %2346 = vmatprep.subr.bf16.mxu1 %v3301_v48  ;;  %v3394_v48 = vld [vmem:[%s4139_s6 + $0x42c] ss:$16 sps:$4 sm:$0xff]  }
 0x139   : > { %2277 = vmatpush2.bf16.msra.mxu0 %v3296_v49  ;;  %v3389_v49 = vld [vmem:[%s4139_s6 + $0x328] ss:$16 sps:$4 sm:$0xff]  }
 0x13a   : > { %2347 = vmatpush1.bf16.msra.mxu1 %v3299_v50  ;;  %2375 = vmatprep.subr.bf16.mxu0 %v3310_v52  ;;  %v3392_v50 = vld [vmem:[%s4139_s6 + $0x428] ss:$16 sps:$4 sm:$0xff]   ;;  %v3400_v52 = vld [vmem:[%s4139_s6 + $0x40c] ss:$16 sps:$4 sm:$0xff]  }
 0x13b   : > { %2348 = vmatprep.subr.bf16.mxu1 %v3307_v51  ;;  %v3397_v51 = vld [vmem:[%s4139_s6 + $0x30c] ss:$16 sps:$4 sm:$0xff]  }
 0x13c   : > { %2279 = vmatmul.mubr.bf16.vlgmr.msra.gmra.mxu0 %v4301_v53 }
 0x13d   : > { %2376 = vmatpush1.bf16.msra.mxu0 %v3308_v56  ;;  %2407 = vmatprep.mubr.bf16.mxu0 %v4198_v28  ;;  %v3331_v28 = vld [vmem:[%s4139_s6 + $0x16c] ss:$16 sps:$4 sm:$0xff]   ;;  %v3398_v56 = vld [vmem:[%s4139_s6 + $0x408] ss:$16 sps:$4 sm:$0xff]  }
 0x13e   : > { %2349 = vmatpush2.bf16.msra.mxu1 %v3305_v54  ;;  %2377 = vmatprep.subr.bf16.mxu0 %v3316_v58  ;;  %v3395_v54 = vld [vmem:[%s4139_s6 + $0x308] ss:$16 sps:$4 sm:$0xff]   ;;  %v3406_v58 = vld [vmem:[%s4139_s6 + $0x6ec] ss:$16 sps:$4 sm:$0xff]  }
 0x13f   : > { %2350 = vmatprep.subr.bf16.mxu1 %v3313_v57  ;;  %v3403_v57 = vld [vmem:[%s4139_s6 + $0x5ec] ss:$16 sps:$4 sm:$0xff]  }
 0x141   : > { %2378 = vmatpush1.bf16.msra.mxu0 %v3314_v60  ;;  %v3404_v60 = vld [vmem:[%s4139_s6 + $0x6e8] ss:$16 sps:$4 sm:$0xff]  }
 0x142   : > { %2351 = vmatpush2.bf16.msra.mxu1 %v3311_v59  ;;  %2379 = vmatprep.subr.bf16.mxu0 %v3322_v62  ;;  %v3401_v59 = vld [vmem:[%s4139_s6 + $0x5e8] ss:$16 sps:$4 sm:$0xff]   ;;  %v3412_v62 = vld [vmem:[%s4139_s6 + $0x6cc] ss:$16 sps:$4 sm:$0xff]  }
 0x143   : > { %2352 = vmatprep.subr.bf16.mxu1 %v3319_v61  ;;  %v3409_v61 = vld [vmem:[%s4139_s6 + $0x5cc] ss:$16 sps:$4 sm:$0xff]  }
 0x145   : > { %2380 = vmatpush1.bf16.msra.mxu0 %v3320_v0  ;;  %v3410_v0 = vld [vmem:[%s4139_s6 + $0x6c8] ss:$16 sps:$4 sm:$0xff]  }
 0x146   : > { %2353 = vmatpush2.bf16.msra.mxu1 %v3317_v63  ;;  %2381 = vmatprep.subr.bf16.mxu0 %v3328_v2  ;;  %v3407_v63 = vld [vmem:[%s4139_s6 + $0x5c8] ss:$16 sps:$4 sm:$0xff]   ;;  %v3418_v2 = vld [vmem:[%s4139_s6 + $0x6ac] ss:$16 sps:$4 sm:$0xff]  }
 0x147   : > { %2354 = vmatprep.subr.bf16.mxu1 %v3325_v1  ;;  %v3415_v1 = vld [vmem:[%s4139_s6 + $0x5ac] ss:$16 sps:$4 sm:$0xff]  }
 0x149   : > { %2382 = vmatpush1.bf16.msra.mxu0 %v3326_v4  ;;  %v3421_v4 = vld [vmem:[%s4139_s6 + $0x58c] ss:$16 sps:$4 sm:$0xff]  }
 0x14a   : > { %2355 = vmatpush2.bf16.msra.mxu1 %v3323_v3  ;;  %2383 = vmatprep.subr.bf16.mxu0 %v3334_v5  ;;  %v3413_v3 = vld [vmem:[%s4139_s6 + $0x5a8] ss:$16 sps:$4 sm:$0xff]  }
 0x14b   : > { %2356 = vmatprep.subr.bf16.mxu1 %v3331_v28  ;;  %v3424_v28 = vld [vmem:[%s4139_s6 + $0x68c] ss:$16 sps:$4 sm:$0xff]   ;;  %v3419_v5 = vld [vmem:[%s4139_s6 + $0x588] ss:$16 sps:$4 sm:$0xff]  }
 0x14d   : > { %2384 = vmatpush1.bf16.msra.mxu0 %v3332_v7  ;;  %v3430_v7 = vld [vmem:[%s4139_s6 + $0x66c] ss:$16 sps:$4 sm:$0xff]  }
 0x14e   : > { %2357 = vmatpush2.bf16.msra.mxu1 %v3329_v6  ;;  %2385 = vmatprep.subr.bf16.mxu0 %v3340_v9  ;;  %v3422_v6 = vld [vmem:[%s4139_s6 + $0x688] ss:$16 sps:$4 sm:$0xff]  }
 0x14f   : > { %2358 = vmatprep.subr.bf16.mxu1 %v3337_v8  ;;  %v3425_v8 = vld [vmem:[%s4139_s6 + $0x568] ss:$16 sps:$4 sm:$0xff]  }
 0x150   : > { %v3428_v9 = vld [vmem:[%s4139_s6 + $0x668] ss:$16 sps:$4 sm:$0xff]  }
 0x151   : > { %2386 = vmatpush1.bf16.msra.mxu0 %v3338_v11  ;;  %v3436_v11 = vld [vmem:[%s4139_s6 + $0x64c] ss:$16 sps:$4 sm:$0xff]  }
 0x152   : > { %2359 = vmatpush2.bf16.msra.mxu1 %v3335_v10  ;;  %2387 = vmatprep.subr.bf16.mxu0 %v3346_v14  ;;  %v3433_v10 = vld [vmem:[%s4139_s6 + $0x54c] ss:$16 sps:$4 sm:$0xff]   ;;  %v3434_v14 = vld [vmem:[%s4139_s6 + $0x648] ss:$16 sps:$4 sm:$0xff]  }
 0x153   : > { %2360 = vmatprep.subr.bf16.mxu1 %v3343_v13  ;;  %v3431_v13 = vld [vmem:[%s4139_s6 + $0x548] ss:$16 sps:$4 sm:$0xff]  }
 0x155   : > { %2388 = vmatpush1.bf16.msra.mxu0 %v3344_v16  ;;  %v3442_v16 = vld [vmem:[%s4139_s6 + $0x62c] ss:$16 sps:$4 sm:$0xff]  }
 0x156   : > { %2361 = vmatpush2.bf16.msra.mxu1 %v3341_v15  ;;  %2389 = vmatprep.subr.bf16.mxu0 %v3352_v19  ;;  %v3439_v15 = vld [vmem:[%s4139_s6 + $0x52c] ss:$16 sps:$4 sm:$0xff]   ;;  %v3440_v19 = vld [vmem:[%s4139_s6 + $0x628] ss:$16 sps:$4 sm:$0xff]  }
 0x157   : > { %2362 = vmatprep.subr.bf16.mxu1 %v3349_v17  ;;  %v3437_v17 = vld [vmem:[%s4139_s6 + $0x528] ss:$16 sps:$4 sm:$0xff]  }
 0x159   : > { %2390 = vmatpush1.bf16.msra.mxu0 %v3350_v21  ;;  %v3448_v21 = vld [vmem:[%s4139_s6 + $0x60c] ss:$16 sps:$4 sm:$0xff]  }
 0x15a   : > { %2363 = vmatpush2.bf16.msra.mxu1 %v3347_v20  ;;  %2391 = vmatprep.subr.bf16.mxu0 %v3355_v22  ;;  %v3445_v20 = vld [vmem:[%s4139_s6 + $0x50c] ss:$16 sps:$4 sm:$0xff]   ;;  %v3443_v22 = vld [vmem:[%s4139_s6 + $0x508] ss:$16 sps:$4 sm:$0xff]  }
 0x15b   : > { %2418 = vmatprep.subr.bf16.mxu1 %v3358_v23  ;;  %v3446_v23 = vld [vmem:[%s4139_s6 + $0x608] ss:$16 sps:$4 sm:$0xff]  }
 0x15d   : > { %2365 = vmatmul.mubr.bf16.vlgmr.msra.gmra.mxu1 %v4219_v45  ;;  %2392 = vmatpush2.bf16.msra.mxu0 %v3353_v24  ;;  %v3368_v45 = vld [vmem:[%s4139_s6 + $0x4a8] ss:$16 sps:$4 sm:$0xff]  }
 0x15e   : > { %2419 = vmatpush1.bf16.msra.mxu1 %v3356_v25  ;;  %2393 = vmatprep.subr.bf16.mxu0 %v3361_v27 }
 0x15f   : > { %2420 = vmatprep.subr.bf16.mxu1 %v3364_v29  ;;  %2450 = vmatprep.mubr.bf16.mxu1 %v4256_v12  ;;  %v3379_v12 = vld [vmem:[%s4139_s6 + $0x36c] ss:$16 sps:$4 sm:$0xff]  }
 0x161   : > { %2394 = vmatpush2.bf16.msra.mxu0 %v3359_v30 }
 0x162   : > { %2421 = vmatpush1.bf16.msra.mxu1 %v3362_v31  ;;  %2395 = vmatprep.subr.bf16.mxu0 %v3367_v32 }
 0x163   : > { %2422 = vmatprep.subr.bf16.mxu1 %v3370_v33 }
 0x165   : > { %2396 = vmatpush2.bf16.msra.mxu0 %v3365_v26 }
 0x166   : > { %2423 = vmatpush1.bf16.msra.mxu1 %v3368_v45  ;;  %2397 = vmatprep.subr.bf16.mxu0 %v3373_v34 }
 0x167   : > { %2424 = vmatprep.subr.bf16.mxu1 %v3376_v35 }
 0x169   : > { %2398 = vmatpush2.bf16.msra.mxu0 %v3371_v36 }
 0x16a   : > { %2425 = vmatpush1.bf16.msra.mxu1 %v3374_v37  ;;  %2399 = vmatprep.subr.bf16.mxu0 %v3379_v12  ;;  %v764_v12 = vld [vmem:[#allocation2 + $0x30] sm:$0xff] }
 0x16b   : > { %2426 = vmatprep.subr.bf16.mxu1 %v3382_v38 }
 0x16d   : > { %2400 = vmatpush2.bf16.msra.mxu0 %v3377_v39 }
 0x16e   : > { %2427 = vmatpush1.bf16.msra.mxu1 %v3380_v40  ;;  %2401 = vmatprep.subr.bf16.mxu0 %v3385_v41  ;;  %v765_v41 = vld [vmem:[#allocation2] sm:$0xff] }
 0x16f   : > { %2428 = vmatprep.subr.bf16.mxu1 %v3388_v42 }
 0x171   : > { %2402 = vmatpush2.bf16.msra.mxu0 %v3383_v43 }
 0x172   : > { %2429 = vmatpush1.bf16.msra.mxu1 %v3386_v44  ;;  %2403 = vmatprep.subr.bf16.mxu0 %v3391_v47 }
 0x173   : > { %2430 = vmatprep.subr.bf16.mxu1 %v3394_v48 }
 0x175   : > { %2404 = vmatpush2.bf16.msra.mxu0 %v3389_v49  ;;  %v768_v49 = vld [vmem:[#allocation2 + $0x8] sm:$0xff] }
 0x176   : > { %2431 = vmatpush1.bf16.msra.mxu1 %v3392_v50  ;;  %2405 = vmatprep.subr.bf16.mxu0 %v3397_v51 }
 0x177   : > { %2432 = vmatprep.subr.bf16.mxu1 %v3400_v52 }
 0x179   : > { %2406 = vmatpush2.bf16.msra.mxu0 %v3395_v54 }
 0x17a   : > { %2433 = vmatpush1.bf16.msra.mxu1 %v3398_v56  ;;  %2461 = vmatprep.subr.bf16.mxu0 %v3406_v58 }
 0x17b   : > { %2434 = vmatprep.subr.bf16.mxu1 %v3403_v57  ;;  %v769_v57 = vld [vmem:[#allocation2 + $0x20] sm:$0xff] }
 0x17c   : > { %2408 = vmatmul.mubr.bf16.vlgmr.msra.gmra.mxu0 %v4222_v46  ;;  %v3416_v46 = vld [vmem:[%s4139_s6 + $0x6a8] ss:$16 sps:$4 sm:$0xff]  }
 0x17d   : > { %2462 = vmatpush1.bf16.msra.mxu0 %v3404_v60  ;;  %2493 = vmatprep.mubr.bf16.mxu0 %v3538_v55  ;;  %v3427_v55 = vld [vmem:[%s4139_s6 + $0x56c] ss:$16 sps:$4 sm:$0xff]  }
 0x17e   : > { %2435 = vmatpush2.bf16.msra.mxu1 %v3401_v59  ;;  %2463 = vmatprep.subr.bf16.mxu0 %v3412_v62 }
 0x17f   : > { %2436 = vmatprep.subr.bf16.mxu1 %v3409_v61 }
 0x181   : > { %2464 = vmatpush1.bf16.msra.mxu0 %v3410_v0 }
 0x182   : > { %2437 = vmatpush2.bf16.msra.mxu1 %v3407_v63  ;;  %2465 = vmatprep.subr.bf16.mxu0 %v3418_v2 }
 0x183   : > { %2438 = vmatprep.subr.bf16.mxu1 %v3415_v1 }
 0x185   : > { %2466 = vmatpush1.bf16.msra.mxu0 %v3416_v46 }
 0x186   : > { %2439 = vmatpush2.bf16.msra.mxu1 %v3413_v3  ;;  %2467 = vmatprep.subr.bf16.mxu0 %v3424_v28 }
 0x187   : > { %2440 = vmatprep.subr.bf16.mxu1 %v3421_v4 }
 0x189   : > { %2468 = vmatpush1.bf16.msra.mxu0 %v3422_v6 }
 0x18a   : > { %2441 = vmatpush2.bf16.msra.mxu1 %v3419_v5  ;;  %2469 = vmatprep.subr.bf16.mxu0 %v3430_v7  ;;  %v766_v7 = vld [vmem:[#allocation2 + $0x18] sm:$0xff] }
 0x18b   : > { %2442 = vmatprep.subr.bf16.mxu1 %v3427_v55 }
 0x18d   : > { %2470 = vmatpush1.bf16.msra.mxu0 %v3428_v9 }
 0x18e   : > { %2443 = vmatpush2.bf16.msra.mxu1 %v3425_v8  ;;  %2471 = vmatprep.subr.bf16.mxu0 %v3436_v11 }
 0x18f   : > { %2444 = vmatprep.subr.bf16.mxu1 %v3433_v10 }
 0x191   : > { %2472 = vmatpush1.bf16.msra.mxu0 %v3434_v14  ;;  %v767_v14 = vld [vmem:[#allocation2 + $0x10] sm:$0xff] }
 0x192   : > { %2445 = vmatpush2.bf16.msra.mxu1 %v3431_v13  ;;  %2473 = vmatprep.subr.bf16.mxu0 %v3442_v16 }
 0x193   : > { %2446 = vmatprep.subr.bf16.mxu1 %v3439_v15 }
 0x195   : > { %2474 = vmatpush1.bf16.msra.mxu0 %v3440_v19 }
 0x196   : > { %2447 = vmatpush2.bf16.msra.mxu1 %v3437_v17  ;;  %2475 = vmatprep.subr.bf16.mxu0 %v3448_v21 }
 0x197   : > { %2448 = vmatprep.subr.bf16.mxu1 %v3445_v20 }
 0x199   : > { %2476 = vmatpush1.bf16.msra.mxu0 %v3446_v23 }
 0x19a   : > { %2449 = vmatpush2.bf16.msra.mxu1 %v3443_v22  ;;  %v770_v22 = vld [vmem:[#allocation2 + $0x28] sm:$0xff] }
 0x19c   : > { %2494 = vmatmul.mubr.bf16.vlgmr.msra.gmra.mxu0 %v4265_v18 }
 0x19d   : > { %2451 = vmatmul.mubr.bf16.vlgmr.msra.gmra.mxu1 %v4301_v53 }
 0x1bc   : > { %v2194_v25 = vpop.f32.mrf.mxu0 }
 0x1bd   : > { %v2237_v24 = vpop.f32.mrf.mxu1 }
 0x1be   : > { %v2196_v29 = vpop.f32.mrf.mxu0  ;;  %v2238_v45 = vadd.f32 %v2237_v24, %v2194_v25 }
 0x1bf   : > { %v2239_v27 = vpop.f32.mrf.mxu1 }
 0x1c0   : > { %v2198_v31 = vpop.f32.mrf.mxu0  ;;  %v2240_v36 = vadd.f32 %v2239_v27, %v2196_v29  ;;  %v771_v29 = vld [vmem:[#allocation2 + $0x38] sm:$0xff] }
 0x1c1   : > { %v2241_v30 = vpop.f32.mrf.mxu1 }
 0x1c2   : > { %v2200_v26 = vpop.f32.mrf.mxu0  ;;  %v2242_v39 = vadd.f32 %v2241_v30, %v2198_v31 }
 0x1c3   : > { %v2243_v32 = vpop.f32.mrf.mxu1 }
 0x1c4   : > { %v2244_v43 = vadd.f32 %v2243_v32, %v2200_v26 }
 0x1dd   : > { %v2323_v33 = vpop.f32.mrf.mxu1 }
 0x1df   : > { %v2325_v34 = vpop.f32.mrf.mxu1 }
 0x1e1   : > { %v2327_v18 = vpop.f32.mrf.mxu1 }
 0x1e3   : > { %v2329_v56 = vpop.f32.mrf.mxu1 }
 0x1fc   : > { %v2280_v35 = vpop.f32.mrf.mxu0 }
 0x1fd   : > { %v2281_v37 = vadd.f32 %v2280_v35, %v2238_v45 }
 0x1fe   : > { %v2282_v38 = vpop.f32.mrf.mxu0 }
 0x1ff   : > { %v2324_v53 = vadd.f32 %v2323_v33, %v2281_v37  ;;  %v2283_v40 = vadd.f32 %v2282_v38, %v2240_v36 }
 0x200   : > { %v2284_v42 = vpop.f32.mrf.mxu0 }
 0x201   : > { %v2504_v44 = vadd.f32 %v2324_v53, %v764_v12  ;;  %v2326_v47 = vadd.f32 %v2325_v34, %v2283_v40  ;;  %v2285_v48 = vadd.f32 %v2284_v42, %v2242_v39 }
 0x202   : > { %v2286_v50 = vpop.f32.mrf.mxu0 }
 0x203   : > { %2512 = vst [vmem:[#allocation2 + $0x30] sm:$0xff] %v2504_v44  ;;  %v2505_v51 = vadd.f32 %v2326_v47, %v765_v41  ;;  %v2328_v52 = vadd.f32 %v2327_v18, %v2285_v48  ;;  %v2287_v54 = vadd.f32 %v2286_v50, %v2244_v43 }
 0x205   : > { %2513 = vst [vmem:[#allocation2] sm:$0xff] %v2505_v51  ;;  %v2508_v58 = vadd.f32 %v2328_v52, %v768_v49  ;;  %v2330_v59 = vadd.f32 %v2329_v56, %v2287_v54 }
 0x207   : > { %2516 = vst [vmem:[#allocation2 + $0x8] sm:$0xff] %v2508_v58  ;;  %v2509_v60 = vadd.f32 %v2330_v59, %v769_v57 }
 0x209   : > { %2517 = vst [vmem:[#allocation2 + $0x20] sm:$0xff] %v2509_v60 }
 0x21d   : > { %v2366_v61 = vpop.f32.mrf.mxu1 }
 0x21f   : > { %v2368_v63 = vpop.f32.mrf.mxu1 }
 0x221   : > { %v2370_v1 = vpop.f32.mrf.mxu1 }
 0x223   : > { %v2372_v3 = vpop.f32.mrf.mxu1 }
 0x23c   : > { %v2409_v62 = vpop.f32.mrf.mxu0 }
 0x23d   : > { %v2410_v4 = vadd.f32 %v2409_v62, %v2366_v61 }
 0x23e   : > { %v2411_v0 = vpop.f32.mrf.mxu0 }
 0x23f   : > { %v2412_v6 = vadd.f32 %v2411_v0, %v2368_v63 }
 0x240   : > { %v2413_v2 = vpop.f32.mrf.mxu0 }
 0x241   : > { %v2414_v10 = vadd.f32 %v2413_v2, %v2370_v1 }
 0x242   : > { %v2415_v46 = vpop.f32.mrf.mxu0 }
 0x243   : > { %v2416_v17 = vadd.f32 %v2415_v46, %v2372_v3 }
 0x25c   : > { %v2495_v5 = vpop.f32.mrf.mxu0 }
 0x25d   : > { %v2452_v28 = vpop.f32.mrf.mxu1 }
 0x25e   : > { %v2453_v55 = vadd.f32 %v2452_v28, %v2410_v4  ;;  %v2497_v9 = vpop.f32.mrf.mxu0 }
 0x25f   : > { %v2454_v8 = vpop.f32.mrf.mxu1 }
 0x260   : > { %v2496_v11 = vadd.f32 %v2495_v5, %v2453_v55  ;;  %v2455_v13 = vadd.f32 %v2454_v8, %v2412_v6  ;;  %v2499_v16 = vpop.f32.mrf.mxu0 }
 0x261   : > { %v2456_v15 = vpop.f32.mrf.mxu1 }
 0x262   : > { %v2506_v19 = vadd.f32 %v2496_v11, %v766_v7  ;;  %v2498_v20 = vadd.f32 %v2497_v9, %v2455_v13  ;;  %v2457_v21 = vadd.f32 %v2456_v15, %v2414_v10  ;;  %v2501_v30 = vpop.f32.mrf.mxu0 }
 0x263   : > { %v2458_v23 = vpop.f32.mrf.mxu1 }
 0x264   : > { %2514 = vst [vmem:[#allocation2 + $0x18] sm:$0xff] %v2506_v19  ;;  %v2507_v24 = vadd.f32 %v2498_v20, %v767_v14  ;;  %v2500_v25 = vadd.f32 %v2499_v16, %v2457_v21  ;;  %v2459_v27 = vadd.f32 %v2458_v23, %v2416_v17 }
 0x266   : > { %2515 = vst [vmem:[#allocation2 + $0x10] sm:$0xff] %v2507_v24  ;;  %v2510_v31 = vadd.f32 %v2500_v25, %v770_v22  ;;  %v2502_v32 = vadd.f32 %v2501_v30, %v2459_v27  ;;  %2523 = sbr.rel (%p2992_p5) target bundleno = 635 (0x27b), region = 89 }
 0x268   : > { %2518 = vst [vmem:[#allocation2 + $0x28] sm:$0xff] %v2510_v31  ;;  %v2511_v33 = vadd.f32 %v2502_v32, %v771_v29 }
 0x26a   : > { %2519 = vst [vmem:[#allocation2 + $0x38] sm:$0xff] %v2511_v33 }
 0x26b   : > { %v2534_v26 = vlaneseq  ;;  %v2532_v34 = vld [vmem:[%s747_s29] sm:$0xf]  ;;  %v2524_v35 = vld [vmem:[#allocation2 + $0x30] sm:$0xff]  ;;  %v2526_v53 = vld [vmem:[#allocation2 + $0x18] sm:$0xff] }
 0x26c   : > { %v2525_v36 = vld [vmem:[#allocation2] sm:$0xff]  ;;  %v2528_v18 = vld [vmem:[#allocation2 + $0x8] sm:$0xff] }
 0x26d   : > { %v2535_v45 = vshrl.u32 %v2534_v26, 7  ;;  %v2527_v40 = vld [vmem:[#allocation2 + $0x10] sm:$0xff]  ;;  %v2529_v47 = vld [vmem:[#allocation2 + $0x20] sm:$0xff] }
 0x26f   : > { %v2536_v37 = vsub.s32 0, %v2535_v45  ;;  %v2540_v12 = vsub.s32 1, %v2535_v45  ;;  %v2544_v38 = vsub.s32 2, %v2535_v45  ;;  %v2548_v39 = vsub.s32 3, %v2535_v45  ;;  %v2530_v48 = vld [vmem:[#allocation2 + $0x28] sm:$0xff] }
 0x271   : > { %v2537_v41 = vrot.slane %v2532_v34, %v2536_v37  ;;  %v2541_v42 = vrot.slane %v2532_v34, %v2540_v12  ;;  %v2545_v43 = vrot.slane %v2532_v34, %v2544_v38  ;;  %v2549_v44 = vrot.slane %v2532_v34, %v2548_v39  ;;  %v2531_v49 = vld [vmem:[#allocation2 + $0x38] sm:$0xff] }
 0x273   : > { %v2554_v50 = vadd.f32 %v2537_v41, %v2524_v35  ;;  %v2555_v51 = vadd.f32 %v2541_v42, %v2525_v36  ;;  %v2556_v52 = vadd.f32 %v2545_v43, %v2526_v53  ;;  %v2557_v54 = vadd.f32 %v2549_v44, %v2527_v40 }
 0x274   : > { %v2558_v56 = vadd.f32 %v2537_v41, %v2528_v18  ;;  %v2559_v57 = vadd.f32 %v2541_v42, %v2529_v47  ;;  %v2560_v58 = vadd.f32 %v2545_v43, %v2530_v48  ;;  %v2561_v59 = vadd.f32 %v2549_v44, %v2531_v49 }
 0x275   : > { %v2562_v60 = vmax.f32 %v2554_v50, 0.0  ;;  %v2563_v61 = vmax.f32 %v2555_v51, 0.0  ;;  %v2564_v62 = vmax.f32 %v2556_v52, 0.0  ;;  %v2565_v63 = vmax.f32 %v2557_v54, 0.0 }
 0x276   : > { %v2566_v0 = vmax.f32 %v2558_v56, 0.0  ;;  %v2567_v1 = vmax.f32 %v2559_v57, 0.0  ;;  %v2568_v2 = vmax.f32 %v2560_v58, 0.0  ;;  %v2569_v3 = vmax.f32 %v2561_v59, 0.0 }
 0x277   : > { %v3004_v46 = vpack.c.bf16 %v2563_v61, %v2562_v60  ;;  %v3005_v4 = vpack.c.bf16 %v2565_v63, %v2564_v62 }
 0x278   : > { %v3006_v28 = vpack.c.bf16 %v2567_v1, %v2566_v0  ;;  %v3007_v5 = vpack.c.bf16 %v2569_v3, %v2568_v2 }
 0x279   : > { %2594 = vst [vmem:[%s4141_s1] sm:$0xff] %v3004_v46  ;;  %2595 = vst [vmem:[%s4141_s1 + $0x8] sm:$0xff] %v3005_v4 }
 0x27a   : > { %2596 = vst [vmem:[%s4141_s1 + $0x10] sm:$0xff] %v3006_v28  ;;  %2597 = vst [vmem:[%s4141_s1 + $0x18] sm:$0xff] %v3007_v5 }
 0x27b PF: > { %2604 = sbr.rel (!%p3653_p12) target bundleno = 643 (0x283), region = 93  ;;  %s3008_s16 = sshll.u32 (%p3653_p12), %s3523_s19, 4 }
 0x27c   : > { %s2610_s5 = scalar_lea.vmem (%p3653_p12), %s4461_s3, %s3008_s16 }
 0x280   : > { %v2623_v6 = vld [vmem:[%s4141_s1] sm:$0xff]  ;;  %v2625_v55 = vld [vmem:[%s4141_s1 + $0x8] sm:$0xff] }
 0x281   : > { %v2627_v7 = vld [vmem:[%s4141_s1 + $0x10] sm:$0xff]  ;;  %v2629_v8 = vld [vmem:[%s4141_s1 + $0x18] sm:$0xff]  ;;  %2624 = vst [vmem:[%s2610_s5] sm:$0xff] %v2623_v6  ;;  %2626 = vst [vmem:[%s2610_s5 + $0x8] sm:$0xff] %v2625_v55 }
 0x282   : > { %2628 = vst [vmem:[%s2610_s5 + $0x20] sm:$0xff] %v2627_v7  ;;  %2630 = vst [vmem:[%s2610_s5 + $0x28] sm:$0xff] %v2629_v8 }
 0x283 PF: > { %s13_s22 = sadd.s32 1, %s3535_s22   ;;  %s4471_s10 = sld [smem:[#allocation6_spill]] }
 0x284   : > { %p10_p6 = scmp.ge.s32.totalorder %s13_s22, 16   ;;  %s4472_s12 = smov %s3499_s13 }
 0x285   : > { %s4473_s13 = smov %s3651_s9  ;;  %s4474_s14 = smov %s3507_s15 }
 0x286   : > { %s4475_s15 = smov %s3648_s8  ;;  %s4476_s16 = smov %s3515_s17 }
 0x287   : > { %s4477_s17 = smov %s3634_s30  ;;  %s4478_s18 = smov %s3527_s20 }
 0x288   : > { %s4479_s19 = smov %s3531_s21  ;;  %s4480_s20 = smov %s4483_s24 }
 0x289   : > { %s4481_s21 = smov %s4471_s10  ;;  %12 = sbr.rel (!%p10_p6) target bundleno = 9 (0x9), region = 164 }

// kernel: forward.10
= control target key start
LH: loop header
LB: loop body
LE: loop exit
PB: predicated region body
PF: predicated region fallthrough
CT: control target
= control target key end

     0   :  { %s2453_s12 = smov 0   ;;  %s2455_s13 = smov 0   ;;  %s2985_s0 = inlined_call_operand.vmem [shape: bf16[16,1024], index: 0, kind: input, shape index: {}]   ;;  %s2986_s1 = inlined_call_operand.vmem [shape: bf16[1024,512], index: 1, kind: input, shape index: {}]   ;;  %s2987_s2 = inlined_call_operand.vmem [shape: f32[1,512], index: 2, kind: input, shape index: {}]   ;;  %s2988_s3 = inlined_call_operand.vmem [shape: bf16[16,512], index: 3, kind: output, shape index: {}]  }
   0x1   :  { %s2457_s14 = smov 0   ;;  %s2459_s15 = smov 0  }
   0x2   :  { %s2461_s16 = smov 0  }
   0x3 LB: > { %s28_s17 = sadd.s32 1, %s2427_s15  ;;  %s2002_s18 = sadd.s32 4294967295, %s2431_s16   ;;  %s2431_s16 = sphi %s2461_s16, %s13_s16   ;;  %s2427_s15 = sphi %s2459_s15, %s2993_s15   ;;  %s2423_s14 = sphi %s2457_s14, %s2992_s14   ;;  %s2419_s13 = sphi %s2455_s13, %s2991_s13   ;;  %s2415_s12 = sphi %s2453_s12, %s2990_s12  }
   0x4   : > { %p30_p0 = scmp.ge.s32.totalorder %s28_s17, 2  ;;  %p76_p1 = scmp.ne.s32.totalorder %s2419_s13, %s2415_s12 }
   0x5   : > { %p77_p2 = scmp.eq.s32.totalorder %s2431_s16, 0  ;;  %p134_p4 = scmp.eq.s32.totalorder %s2002_s18, 1 }
   0x6   : > { %s2995_s17 = smov (%p30_p0, %s28_s17), 0  ;;  %s69_s20 = sadd.s32 1, %s2419_s13 }
   0x7   : > { %p78_p3 = por %p77_p2, %p76_p1  ;;  %s65_s19 = ssub.s32 %s2427_s15, %s2995_s17 }
   0x8   : > { %p67_p5 = scmp.eq.s32.totalorder %s65_s19, 0  ;;  %p2488_p6 = por %p134_p4, %p76_p1 }
   0x9   : > { %p2006_p7 = scmp.ge.s32.totalorder %s2431_s16, 2 }
   0xa   : > { %s2493_s22 = scalar_select %p67_p5, %s2419_s13, %s69_s20  }
   0xb   : > { %171 = sbr.rel (%p2006_p7) target bundleno = 84 (0x54), region = 20 }
  0x10   : > { %174 = sbr.rel (!%p78_p3) target bundleno = 84 (0x54), region = 24  ;;  %s176_s23 = sand.u32 (%p78_p3), 1, %s2419_s13  }
  0x11   : > { %s2157_s24 = sshll.u32 (%p78_p3), %s2427_s15, 3  ;;  %s2007_s25 = sshll.u32 (%p78_p3), %s176_s23, 10 }
  0x12   : > { %s2501_s28 = scalar_lea.vmem (%p78_p3), %s2986_s1, %s2157_s24  ;;  %s2506_s29 = scalar_lea.vmem (%p78_p3), [#allocation3], %s2007_s25 }
  0x13   : > { %v467_v0 = vld [vmem:[%s2501_s28] sm:$0xff] (%p78_p3)  ;;  %v469_v1 = vld [vmem:[%s2501_s28 + $0x10] sm:$0xff] (%p78_p3) }
  0x14   : > { %v471_v2 = vld [vmem:[%s2501_s28 + $0x20] sm:$0xff] (%p78_p3)  ;;  %468 = vst [vmem:[%s2506_s29] sm:$0xff] (%p78_p3), %v467_v0  ;;  %470 = vst [vmem:[%s2506_s29 + $0x8] sm:$0xff] (%p78_p3), %v469_v1  ;;  %v473_v3 = vld [vmem:[%s2501_s28 + $0x30] sm:$0xff] (%p78_p3) }
  0x15   : > { %472 = vst [vmem:[%s2506_s29 + $0x10] sm:$0xff] %v471_v2  ;;  %v475_v4 = vld [vmem:[%s2501_s28 + $0x40] sm:$0xff]  ;;  %v477_v5 = vld [vmem:[%s2501_s28 + $0x50] sm:$0xff]  ;;  %474 = vst [vmem:[%s2506_s29 + $0x18] sm:$0xff] %v473_v3 }
  0x16   : > { %476 = vst [vmem:[%s2506_s29 + $0x20] sm:$0xff] %v475_v4  ;;  %478 = vst [vmem:[%s2506_s29 + $0x28] sm:$0xff] %v477_v5  ;;  %v479_v6 = vld [vmem:[%s2501_s28 + $0x60] sm:$0xff]  ;;  %v481_v7 = vld [vmem:[%s2501_s28 + $0x70] sm:$0xff] }
  0x17   : > { %v483_v8 = vld [vmem:[%s2501_s28 + $0x80] sm:$0xff]  ;;  %480 = vst [vmem:[%s2506_s29 + $0x30] sm:$0xff] %v479_v6  ;;  %482 = vst [vmem:[%s2506_s29 + $0x38] sm:$0xff] %v481_v7  ;;  %v485_v9 = vld [vmem:[%s2501_s28 + $0x90] sm:$0xff] }
  0x18   : > { %484 = vst [vmem:[%s2506_s29 + $0x40] sm:$0xff] %v483_v8  ;;  %v487_v10 = vld [vmem:[%s2501_s28 + $0xa0] sm:$0xff]  ;;  %v489_v11 = vld [vmem:[%s2501_s28 + $0xb0] sm:$0xff]  ;;  %486 = vst [vmem:[%s2506_s29 + $0x48] sm:$0xff] %v485_v9 }
  0x19   : > { %488 = vst [vmem:[%s2506_s29 + $0x50] sm:$0xff] %v487_v10  ;;  %490 = vst [vmem:[%s2506_s29 + $0x58] sm:$0xff] %v489_v11  ;;  %v491_v12 = vld [vmem:[%s2501_s28 + $0xc0] sm:$0xff]  ;;  %v493_v13 = vld [vmem:[%s2501_s28 + $0xd0] sm:$0xff] }
  0x1a   : > { %v495_v14 = vld [vmem:[%s2501_s28 + $0xe0] sm:$0xff]  ;;  %492 = vst [vmem:[%s2506_s29 + $0x60] sm:$0xff] %v491_v12  ;;  %494 = vst [vmem:[%s2506_s29 + $0x68] sm:$0xff] %v493_v13  ;;  %v497_v15 = vld [vmem:[%s2501_s28 + $0xf0] sm:$0xff] }
  0x1b   : > { %496 = vst [vmem:[%s2506_s29 + $0x70] sm:$0xff] %v495_v14  ;;  %v499_v16 = vld [vmem:[%s2501_s28 + $0x100] sm:$0xff]  ;;  %v501_v17 = vld [vmem:[%s2501_s28 + $0x110] sm:$0xff]  ;;  %498 = vst [vmem:[%s2506_s29 + $0x78] sm:$0xff] %v497_v15 }
  0x1c   : > { %500 = vst [vmem:[%s2506_s29 + $0x80] sm:$0xff] %v499_v16  ;;  %502 = vst [vmem:[%s2506_s29 + $0x88] sm:$0xff] %v501_v17  ;;  %v503_v18 = vld [vmem:[%s2501_s28 + $0x120] sm:$0xff]  ;;  %v505_v19 = vld [vmem:[%s2501_s28 + $0x130] sm:$0xff] }
  0x1d   : > { %v507_v20 = vld [vmem:[%s2501_s28 + $0x140] sm:$0xff]  ;;  %504 = vst [vmem:[%s2506_s29 + $0x90] sm:$0xff] %v503_v18  ;;  %506 = vst [vmem:[%s2506_s29 + $0x98] sm:$0xff] %v505_v19  ;;  %v509_v21 = vld [vmem:[%s2501_s28 + $0x150] sm:$0xff] }
  0x1e   : > { %508 = vst [vmem:[%s2506_s29 + $0xa0] sm:$0xff] %v507_v20  ;;  %v511_v22 = vld [vmem:[%s2501_s28 + $0x160] sm:$0xff]  ;;  %v513_v23 = vld [vmem:[%s2501_s28 + $0x170] sm:$0xff]  ;;  %510 = vst [vmem:[%s2506_s29 + $0xa8] sm:$0xff] %v509_v21 }
  0x1f   : > { %512 = vst [vmem:[%s2506_s29 + $0xb0] sm:$0xff] %v511_v22  ;;  %514 = vst [vmem:[%s2506_s29 + $0xb8] sm:$0xff] %v513_v23  ;;  %v515_v24 = vld [vmem:[%s2501_s28 + $0x180] sm:$0xff]  ;;  %v517_v25 = vld [vmem:[%s2501_s28 + $0x190] sm:$0xff] }
  0x20   : > { %v519_v26 = vld [vmem:[%s2501_s28 + $0x1a0] sm:$0xff]  ;;  %516 = vst [vmem:[%s2506_s29 + $0xc0] sm:$0xff] %v515_v24  ;;  %518 = vst [vmem:[%s2506_s29 + $0xc8] sm:$0xff] %v517_v25  ;;  %v521_v27 = vld [vmem:[%s2501_s28 + $0x1b0] sm:$0xff] }
  0x21   : > { %520 = vst [vmem:[%s2506_s29 + $0xd0] sm:$0xff] %v519_v26  ;;  %v523_v28 = vld [vmem:[%s2501_s28 + $0x1c0] sm:$0xff]  ;;  %v525_v29 = vld [vmem:[%s2501_s28 + $0x1d0] sm:$0xff]  ;;  %522 = vst [vmem:[%s2506_s29 + $0xd8] sm:$0xff] %v521_v27 }
  0x22   : > { %524 = vst [vmem:[%s2506_s29 + $0xe0] sm:$0xff] %v523_v28  ;;  %526 = vst [vmem:[%s2506_s29 + $0xe8] sm:$0xff] %v525_v29  ;;  %v527_v30 = vld [vmem:[%s2501_s28 + $0x1e0] sm:$0xff]  ;;  %v529_v31 = vld [vmem:[%s2501_s28 + $0x1f0] sm:$0xff] }
  0x23   : > { %v531_v32 = vld [vmem:[%s2501_s28 + $0x200] sm:$0xff]  ;;  %528 = vst [vmem:[%s2506_s29 + $0xf0] sm:$0xff] %v527_v30  ;;  %530 = vst [vmem:[%s2506_s29 + $0xf8] sm:$0xff] %v529_v31  ;;  %v533_v33 = vld [vmem:[%s2501_s28 + $0x210] sm:$0xff] }
  0x24   : > { %532 = vst [vmem:[%s2506_s29 + $0x100] sm:$0xff] %v531_v32  ;;  %v535_v34 = vld [vmem:[%s2501_s28 + $0x220] sm:$0xff]  ;;  %v537_v35 = vld [vmem:[%s2501_s28 + $0x230] sm:$0xff]  ;;  %534 = vst [vmem:[%s2506_s29 + $0x108] sm:$0xff] %v533_v33 }
  0x25   : > { %536 = vst [vmem:[%s2506_s29 + $0x110] sm:$0xff] %v535_v34  ;;  %538 = vst [vmem:[%s2506_s29 + $0x118] sm:$0xff] %v537_v35  ;;  %v539_v36 = vld [vmem:[%s2501_s28 + $0x240] sm:$0xff]  ;;  %v541_v37 = vld [vmem:[%s2501_s28 + $0x250] sm:$0xff] }
  0x26   : > { %v543_v38 = vld [vmem:[%s2501_s28 + $0x260] sm:$0xff]  ;;  %540 = vst [vmem:[%s2506_s29 + $0x120] sm:$0xff] %v539_v36  ;;  %542 = vst [vmem:[%s2506_s29 + $0x128] sm:$0xff] %v541_v37  ;;  %v545_v39 = vld [vmem:[%s2501_s28 + $0x270] sm:$0xff] }
  0x27   : > { %544 = vst [vmem:[%s2506_s29 + $0x130] sm:$0xff] %v543_v38  ;;  %v547_v40 = vld [vmem:[%s2501_s28 + $0x280] sm:$0xff]  ;;  %v549_v41 = vld [vmem:[%s2501_s28 + $0x290] sm:$0xff]  ;;  %546 = vst [vmem:[%s2506_s29 + $0x138] sm:$0xff] %v545_v39 }
  0x28   : > { %548 = vst [vmem:[%s2506_s29 + $0x140] sm:$0xff] %v547_v40  ;;  %550 = vst [vmem:[%s2506_s29 + $0x148] sm:$0xff] %v549_v41  ;;  %v551_v42 = vld [vmem:[%s2501_s28 + $0x2a0] sm:$0xff]  ;;  %v553_v43 = vld [vmem:[%s2501_s28 + $0x2b0] sm:$0xff] }
  0x29   : > { %v555_v44 = vld [vmem:[%s2501_s28 + $0x2c0] sm:$0xff]  ;;  %552 = vst [vmem:[%s2506_s29 + $0x150] sm:$0xff] %v551_v42  ;;  %554 = vst [vmem:[%s2506_s29 + $0x158] sm:$0xff] %v553_v43  ;;  %v557_v45 = vld [vmem:[%s2501_s28 + $0x2d0] sm:$0xff] }
  0x2a   : > { %556 = vst [vmem:[%s2506_s29 + $0x160] sm:$0xff] %v555_v44  ;;  %v559_v46 = vld [vmem:[%s2501_s28 + $0x2e0] sm:$0xff]  ;;  %v561_v47 = vld [vmem:[%s2501_s28 + $0x2f0] sm:$0xff]  ;;  %558 = vst [vmem:[%s2506_s29 + $0x168] sm:$0xff] %v557_v45 }
  0x2b   : > { %560 = vst [vmem:[%s2506_s29 + $0x170] sm:$0xff] %v559_v46  ;;  %562 = vst [vmem:[%s2506_s29 + $0x178] sm:$0xff] %v561_v47  ;;  %v563_v48 = vld [vmem:[%s2501_s28 + $0x300] sm:$0xff]  ;;  %v565_v49 = vld [vmem:[%s2501_s28 + $0x310] sm:$0xff] }
  0x2c   : > { %v567_v50 = vld [vmem:[%s2501_s28 + $0x320] sm:$0xff]  ;;  %564 = vst [vmem:[%s2506_s29 + $0x180] sm:$0xff] %v563_v48  ;;  %566 = vst [vmem:[%s2506_s29 + $0x188] sm:$0xff] %v565_v49  ;;  %v569_v51 = vld [vmem:[%s2501_s28 + $0x330] sm:$0xff] }
  0x2d   : > { %568 = vst [vmem:[%s2506_s29 + $0x190] sm:$0xff] %v567_v50  ;;  %v571_v52 = vld [vmem:[%s2501_s28 + $0x340] sm:$0xff]  ;;  %v573_v53 = vld [vmem:[%s2501_s28 + $0x350] sm:$0xff]  ;;  %570 = vst [vmem:[%s2506_s29 + $0x198] sm:$0xff] %v569_v51 }
  0x2e   : > { %572 = vst [vmem:[%s2506_s29 + $0x1a0] sm:$0xff] %v571_v52  ;;  %574 = vst [vmem:[%s2506_s29 + $0x1a8] sm:$0xff] %v573_v53  ;;  %v575_v54 = vld [vmem:[%s2501_s28 + $0x360] sm:$0xff]  ;;  %v577_v55 = vld [vmem:[%s2501_s28 + $0x370] sm:$0xff] }
  0x2f   : > { %v579_v56 = vld [vmem:[%s2501_s28 + $0x380] sm:$0xff]  ;;  %576 = vst [vmem:[%s2506_s29 + $0x1b0] sm:$0xff] %v575_v54  ;;  %578 = vst [vmem:[%s2506_s29 + $0x1b8] sm:$0xff] %v577_v55  ;;  %v581_v57 = vld [vmem:[%s2501_s28 + $0x390] sm:$0xff] }
  0x30   : > { %580 = vst [vmem:[%s2506_s29 + $0x1c0] sm:$0xff] %v579_v56  ;;  %v583_v58 = vld [vmem:[%s2501_s28 + $0x3a0] sm:$0xff]  ;;  %v585_v59 = vld [vmem:[%s2501_s28 + $0x3b0] sm:$0xff]  ;;  %582 = vst [vmem:[%s2506_s29 + $0x1c8] sm:$0xff] %v581_v57 }
  0x31   : > { %584 = vst [vmem:[%s2506_s29 + $0x1d0] sm:$0xff] %v583_v58  ;;  %586 = vst [vmem:[%s2506_s29 + $0x1d8] sm:$0xff] %v585_v59  ;;  %v587_v60 = vld [vmem:[%s2501_s28 + $0x3c0] sm:$0xff]  ;;  %v589_v61 = vld [vmem:[%s2501_s28 + $0x3d0] sm:$0xff] }
  0x32   : > { %v591_v62 = vld [vmem:[%s2501_s28 + $0x3e0] sm:$0xff]  ;;  %588 = vst [vmem:[%s2506_s29 + $0x1e0] sm:$0xff] %v587_v60  ;;  %590 = vst [vmem:[%s2506_s29 + $0x1e8] sm:$0xff] %v589_v61  ;;  %v593_v63 = vld [vmem:[%s2501_s28 + $0x3f0] sm:$0xff] }
  0x33   : > { %592 = vst [vmem:[%s2506_s29 + $0x1f0] sm:$0xff] %v591_v62  ;;  %v595_v0 = vld [vmem:[%s2501_s28 + $0x400] sm:$0xff]  ;;  %v597_v1 = vld [vmem:[%s2501_s28 + $0x410] sm:$0xff]  ;;  %594 = vst [vmem:[%s2506_s29 + $0x1f8] sm:$0xff] %v593_v63 }
  0x34   : > { %596 = vst [vmem:[%s2506_s29 + $0x200] sm:$0xff] %v595_v0  ;;  %598 = vst [vmem:[%s2506_s29 + $0x208] sm:$0xff] %v597_v1  ;;  %v599_v2 = vld [vmem:[%s2501_s28 + $0x420] sm:$0xff]  ;;  %v601_v3 = vld [vmem:[%s2501_s28 + $0x430] sm:$0xff] }
  0x35   : > { %v603_v4 = vld [vmem:[%s2501_s28 + $0x440] sm:$0xff]  ;;  %600 = vst [vmem:[%s2506_s29 + $0x210] sm:$0xff] %v599_v2  ;;  %602 = vst [vmem:[%s2506_s29 + $0x218] sm:$0xff] %v601_v3  ;;  %v605_v5 = vld [vmem:[%s2501_s28 + $0x450] sm:$0xff] }
  0x36   : > { %604 = vst [vmem:[%s2506_s29 + $0x220] sm:$0xff] %v603_v4  ;;  %v607_v6 = vld [vmem:[%s2501_s28 + $0x460] sm:$0xff]  ;;  %v609_v7 = vld [vmem:[%s2501_s28 + $0x470] sm:$0xff]  ;;  %606 = vst [vmem:[%s2506_s29 + $0x228] sm:$0xff] %v605_v5 }
  0x37   : > { %608 = vst [vmem:[%s2506_s29 + $0x230] sm:$0xff] %v607_v6  ;;  %610 = vst [vmem:[%s2506_s29 + $0x238] sm:$0xff] %v609_v7  ;;  %v611_v8 = vld [vmem:[%s2501_s28 + $0x480] sm:$0xff]  ;;  %v613_v9 = vld [vmem:[%s2501_s28 + $0x490] sm:$0xff] }
  0x38   : > { %v615_v10 = vld [vmem:[%s2501_s28 + $0x4a0] sm:$0xff]  ;;  %612 = vst [vmem:[%s2506_s29 + $0x240] sm:$0xff] %v611_v8  ;;  %614 = vst [vmem:[%s2506_s29 + $0x248] sm:$0xff] %v613_v9  ;;  %v617_v11 = vld [vmem:[%s2501_s28 + $0x4b0] sm:$0xff] }
  0x39   : > { %616 = vst [vmem:[%s2506_s29 + $0x250] sm:$0xff] %v615_v10  ;;  %v619_v12 = vld [vmem:[%s2501_s28 + $0x4c0] sm:$0xff]  ;;  %v621_v13 = vld [vmem:[%s2501_s28 + $0x4d0] sm:$0xff]  ;;  %618 = vst [vmem:[%s2506_s29 + $0x258] sm:$0xff] %v617_v11 }
  0x3a   : > { %620 = vst [vmem:[%s2506_s29 + $0x260] sm:$0xff] %v619_v12  ;;  %622 = vst [vmem:[%s2506_s29 + $0x268] sm:$0xff] %v621_v13  ;;  %v623_v14 = vld [vmem:[%s2501_s28 + $0x4e0] sm:$0xff]  ;;  %v625_v15 = vld [vmem:[%s2501_s28 + $0x4f0] sm:$0xff] }
  0x3b   : > { %v627_v16 = vld [vmem:[%s2501_s28 + $0x500] sm:$0xff]  ;;  %624 = vst [vmem:[%s2506_s29 + $0x270] sm:$0xff] %v623_v14  ;;  %626 = vst [vmem:[%s2506_s29 + $0x278] sm:$0xff] %v625_v15  ;;  %v629_v17 = vld [vmem:[%s2501_s28 + $0x510] sm:$0xff] }
  0x3c   : > { %628 = vst [vmem:[%s2506_s29 + $0x280] sm:$0xff] %v627_v16  ;;  %v631_v18 = vld [vmem:[%s2501_s28 + $0x520] sm:$0xff]  ;;  %v633_v19 = vld [vmem:[%s2501_s28 + $0x530] sm:$0xff]  ;;  %630 = vst [vmem:[%s2506_s29 + $0x288] sm:$0xff] %v629_v17 }
  0x3d   : > { %632 = vst [vmem:[%s2506_s29 + $0x290] sm:$0xff] %v631_v18  ;;  %634 = vst [vmem:[%s2506_s29 + $0x298] sm:$0xff] %v633_v19  ;;  %v635_v20 = vld [vmem:[%s2501_s28 + $0x540] sm:$0xff]  ;;  %v637_v21 = vld [vmem:[%s2501_s28 + $0x550] sm:$0xff] }
  0x3e   : > { %v639_v22 = vld [vmem:[%s2501_s28 + $0x560] sm:$0xff]  ;;  %636 = vst [vmem:[%s2506_s29 + $0x2a0] sm:$0xff] %v635_v20  ;;  %638 = vst [vmem:[%s2506_s29 + $0x2a8] sm:$0xff] %v637_v21  ;;  %v641_v23 = vld [vmem:[%s2501_s28 + $0x570] sm:$0xff] }
  0x3f   : > { %640 = vst [vmem:[%s2506_s29 + $0x2b0] sm:$0xff] %v639_v22  ;;  %v643_v24 = vld [vmem:[%s2501_s28 + $0x580] sm:$0xff]  ;;  %v645_v25 = vld [vmem:[%s2501_s28 + $0x590] sm:$0xff]  ;;  %642 = vst [vmem:[%s2506_s29 + $0x2b8] sm:$0xff] %v641_v23 }
  0x40   : > { %644 = vst [vmem:[%s2506_s29 + $0x2c0] sm:$0xff] %v643_v24  ;;  %646 = vst [vmem:[%s2506_s29 + $0x2c8] sm:$0xff] %v645_v25  ;;  %v647_v26 = vld [vmem:[%s2501_s28 + $0x5a0] sm:$0xff]  ;;  %v649_v27 = vld [vmem:[%s2501_s28 + $0x5b0] sm:$0xff] }
  0x41   : > { %v651_v28 = vld [vmem:[%s2501_s28 + $0x5c0] sm:$0xff]  ;;  %648 = vst [vmem:[%s2506_s29 + $0x2d0] sm:$0xff] %v647_v26  ;;  %650 = vst [vmem:[%s2506_s29 + $0x2d8] sm:$0xff] %v649_v27  ;;  %v653_v29 = vld [vmem:[%s2501_s28 + $0x5d0] sm:$0xff] }
  0x42   : > { %652 = vst [vmem:[%s2506_s29 + $0x2e0] sm:$0xff] %v651_v28  ;;  %v655_v30 = vld [vmem:[%s2501_s28 + $0x5e0] sm:$0xff]  ;;  %v657_v31 = vld [vmem:[%s2501_s28 + $0x5f0] sm:$0xff]  ;;  %654 = vst [vmem:[%s2506_s29 + $0x2e8] sm:$0xff] %v653_v29 }
  0x43   : > { %656 = vst [vmem:[%s2506_s29 + $0x2f0] sm:$0xff] %v655_v30  ;;  %658 = vst [vmem:[%s2506_s29 + $0x2f8] sm:$0xff] %v657_v31  ;;  %v659_v32 = vld [vmem:[%s2501_s28 + $0x600] sm:$0xff]  ;;  %v661_v33 = vld [vmem:[%s2501_s28 + $0x610] sm:$0xff] }
  0x44   : > { %v663_v34 = vld [vmem:[%s2501_s28 + $0x620] sm:$0xff]  ;;  %660 = vst [vmem:[%s2506_s29 + $0x300] sm:$0xff] %v659_v32  ;;  %662 = vst [vmem:[%s2506_s29 + $0x308] sm:$0xff] %v661_v33  ;;  %v665_v35 = vld [vmem:[%s2501_s28 + $0x630] sm:$0xff] }
  0x45   : > { %664 = vst [vmem:[%s2506_s29 + $0x310] sm:$0xff] %v663_v34  ;;  %v667_v36 = vld [vmem:[%s2501_s28 + $0x640] sm:$0xff]  ;;  %v669_v37 = vld [vmem:[%s2501_s28 + $0x650] sm:$0xff]  ;;  %666 = vst [vmem:[%s2506_s29 + $0x318] sm:$0xff] %v665_v35 }
  0x46   : > { %668 = vst [vmem:[%s2506_s29 + $0x320] sm:$0xff] %v667_v36  ;;  %670 = vst [vmem:[%s2506_s29 + $0x328] sm:$0xff] %v669_v37  ;;  %v671_v38 = vld [vmem:[%s2501_s28 + $0x660] sm:$0xff]  ;;  %v673_v39 = vld [vmem:[%s2501_s28 + $0x670] sm:$0xff] }
  0x47   : > { %v675_v40 = vld [vmem:[%s2501_s28 + $0x680] sm:$0xff]  ;;  %672 = vst [vmem:[%s2506_s29 + $0x330] sm:$0xff] %v671_v38  ;;  %674 = vst [vmem:[%s2506_s29 + $0x338] sm:$0xff] %v673_v39  ;;  %v677_v41 = vld [vmem:[%s2501_s28 + $0x690] sm:$0xff] }
  0x48   : > { %676 = vst [vmem:[%s2506_s29 + $0x340] sm:$0xff] %v675_v40  ;;  %v679_v42 = vld [vmem:[%s2501_s28 + $0x6a0] sm:$0xff]  ;;  %v681_v43 = vld [vmem:[%s2501_s28 + $0x6b0] sm:$0xff]  ;;  %678 = vst [vmem:[%s2506_s29 + $0x348] sm:$0xff] %v677_v41 }
  0x49   : > { %680 = vst [vmem:[%s2506_s29 + $0x350] sm:$0xff] %v679_v42  ;;  %682 = vst [vmem:[%s2506_s29 + $0x358] sm:$0xff] %v681_v43  ;;  %v683_v44 = vld [vmem:[%s2501_s28 + $0x6c0] sm:$0xff]  ;;  %v685_v45 = vld [vmem:[%s2501_s28 + $0x6d0] sm:$0xff] }
  0x4a   : > { %v687_v46 = vld [vmem:[%s2501_s28 + $0x6e0] sm:$0xff]  ;;  %684 = vst [vmem:[%s2506_s29 + $0x360] sm:$0xff] %v683_v44  ;;  %686 = vst [vmem:[%s2506_s29 + $0x368] sm:$0xff] %v685_v45  ;;  %v689_v47 = vld [vmem:[%s2501_s28 + $0x6f0] sm:$0xff] }
  0x4b   : > { %688 = vst [vmem:[%s2506_s29 + $0x370] sm:$0xff] %v687_v46  ;;  %v691_v48 = vld [vmem:[%s2501_s28 + $0x700] sm:$0xff]  ;;  %v693_v49 = vld [vmem:[%s2501_s28 + $0x710] sm:$0xff]  ;;  %690 = vst [vmem:[%s2506_s29 + $0x378] sm:$0xff] %v689_v47 }
  0x4c   : > { %692 = vst [vmem:[%s2506_s29 + $0x380] sm:$0xff] %v691_v48  ;;  %694 = vst [vmem:[%s2506_s29 + $0x388] sm:$0xff] %v693_v49  ;;  %v695_v50 = vld [vmem:[%s2501_s28 + $0x720] sm:$0xff]  ;;  %v697_v51 = vld [vmem:[%s2501_s28 + $0x730] sm:$0xff] }
  0x4d   : > { %v699_v52 = vld [vmem:[%s2501_s28 + $0x740] sm:$0xff]  ;;  %696 = vst [vmem:[%s2506_s29 + $0x390] sm:$0xff] %v695_v50  ;;  %698 = vst [vmem:[%s2506_s29 + $0x398] sm:$0xff] %v697_v51  ;;  %v701_v53 = vld [vmem:[%s2501_s28 + $0x750] sm:$0xff] }
  0x4e   : > { %700 = vst [vmem:[%s2506_s29 + $0x3a0] sm:$0xff] %v699_v52  ;;  %v703_v54 = vld [vmem:[%s2501_s28 + $0x760] sm:$0xff]  ;;  %v705_v55 = vld [vmem:[%s2501_s28 + $0x770] sm:$0xff]  ;;  %702 = vst [vmem:[%s2506_s29 + $0x3a8] sm:$0xff] %v701_v53 }
  0x4f   : > { %704 = vst [vmem:[%s2506_s29 + $0x3b0] sm:$0xff] %v703_v54  ;;  %706 = vst [vmem:[%s2506_s29 + $0x3b8] sm:$0xff] %v705_v55  ;;  %v707_v56 = vld [vmem:[%s2501_s28 + $0x780] sm:$0xff]  ;;  %v709_v57 = vld [vmem:[%s2501_s28 + $0x790] sm:$0xff] }
  0x50   : > { %v711_v58 = vld [vmem:[%s2501_s28 + $0x7a0] sm:$0xff]  ;;  %708 = vst [vmem:[%s2506_s29 + $0x3c0] sm:$0xff] %v707_v56  ;;  %710 = vst [vmem:[%s2506_s29 + $0x3c8] sm:$0xff] %v709_v57  ;;  %v713_v59 = vld [vmem:[%s2501_s28 + $0x7b0] sm:$0xff] }
  0x51   : > { %712 = vst [vmem:[%s2506_s29 + $0x3d0] sm:$0xff] %v711_v58  ;;  %v715_v60 = vld [vmem:[%s2501_s28 + $0x7c0] sm:$0xff]  ;;  %v717_v61 = vld [vmem:[%s2501_s28 + $0x7d0] sm:$0xff]  ;;  %714 = vst [vmem:[%s2506_s29 + $0x3d8] sm:$0xff] %v713_v59 }
  0x52   : > { %716 = vst [vmem:[%s2506_s29 + $0x3e0] sm:$0xff] %v715_v60  ;;  %718 = vst [vmem:[%s2506_s29 + $0x3e8] sm:$0xff] %v717_v61  ;;  %v719_v62 = vld [vmem:[%s2501_s28 + $0x7e0] sm:$0xff]  ;;  %v721_v63 = vld [vmem:[%s2501_s28 + $0x7f0] sm:$0xff] }
  0x53   : > { %720 = vst [vmem:[%s2506_s29 + $0x3f0] sm:$0xff] %v719_v62  ;;  %722 = vst [vmem:[%s2506_s29 + $0x3f8] sm:$0xff] %v721_v63 }
  0x54 PF: > { %p2010_p8 = scmp.ge.s32.totalorder %s2431_s16, 1  ;;  %p735_p9 = scmp.lt.s32.totalorder %s2431_s16, 3 }
  0x56   : > { %p736_p10 = pnand %p2010_p8, %p735_p9 }
  0x57   : > { %s742_s30 = sand.u32 (!%p736_p10), 1, %s2415_s12   ;;  %s2013_s4 = sshll.u32 (!%p736_p10), %s2423_s14, 1 }
  0x58   : > { %739 = sbr.rel (%p736_p10) target bundleno = 441 (0x1b9), region = 66  ;;  %s2011_s10 = sshll.u32 (!%p736_p10), %s742_s30, 10 }
  0x59   : > { %s2794_s19 = scalar_lea.vmem (!%p736_p10), [#allocation3], %s2011_s10  ;;  %p793_p11 = scmp.lt.s32.totalorder (!%p736_p10), %s2013_s4, 3 }
  0x5a   : > { %s2012_s8 = sshll.u32 (!%p736_p10), %s742_s30, 4 }
  0x5b   : > { %s777_s9 = scalar_lea.vmem (!%p736_p10), [#allocation4], %s2012_s8 }
  0x5d   : > { %v2767_v0 = vld [vmem:[%s2985_s0] sm:$0xff]  ;;  %v2777_v2 = vld [vmem:[%s2985_s0 + $0x8] sm:$0xff]  ;;  %v2201_v8 = vld [vmem:[%s2794_s19 + $0x74] ss:$8 sps:$4 sm:$0xff]   ;;  %s2997_s4 = smov (!%p793_p11, %s2013_s4), 3  ;;  %s2160_s12 = sshll.u32 (%p2488_p6), %s2423_s14, 3 }
  0x5e   : > { %v2772_v1 = vld [vmem:[%s2985_s0 + $0x20] sm:$0xff]  ;;  %v2788_v5 = vld [vmem:[%s2985_s0 + $0x28] sm:$0xff]  ;;  %v2203_v9 = vld [vmem:[%s2794_s19 + $0x174] ss:$8 sps:$4 sm:$0xff]   ;;  %1627 = vmatprep.subr.bf16.mxu0 %v2201_v8  ;;  %s795_s7 = scalar_lea.vmem %s2987_s2, %s2997_s4  ;;  %s1860_s11 = scalar_lea.vmem (%p2488_p6), %s2988_s3, %s2160_s12 }
  0x5f   : > { %v2014_v3 = vcombine.low %v2767_v0, %v2772_v1  ;;  %v2015_v4 = vcombine.high %v2767_v0, %v2772_v1  ;;  %v2016_v6 = vcombine.low %v2777_v2, %v2788_v5  ;;  %v2017_v7 = vcombine.high %v2777_v2, %v2788_v5  ;;  %v2205_v10 = vld [vmem:[%s2794_s19 + $0x70] ss:$8 sps:$4 sm:$0xff]   ;;  %1670 = vmatprep.subr.bf16.mxu1 %v2203_v9  ;;  %v2207_v12 = vld [vmem:[%s2794_s19 + $0x64] ss:$8 sps:$4 sm:$0xff]   ;;  %v2211_v14 = vld [vmem:[%s2794_s19 + $0x60] ss:$8 sps:$4 sm:$0xff]  }
  0x60   : > { %v2206_v11 = vld [vmem:[%s2794_s19 + $0x170] ss:$8 sps:$4 sm:$0xff]   ;;  %1628 = vmatpush1.bf16.msra.mxu0 %v2205_v10  ;;  %v2209_v13 = vld [vmem:[%s2794_s19 + $0x164] ss:$8 sps:$4 sm:$0xff]   ;;  %v2212_v15 = vld [vmem:[%s2794_s19 + $0x160] ss:$8 sps:$4 sm:$0xff]  }
  0x61   : > { %1659 = vmatprep.mubr.bf16.mxu0 %v2015_v4  ;;  %1702 = vmatprep.mubr.bf16.mxu1 %v2017_v7  ;;  %v2213_v16 = vld [vmem:[%s2794_s19 + $0x54] ss:$8 sps:$4 sm:$0xff]   ;;  %v2217_v18 = vld [vmem:[%s2794_s19 + $0x50] ss:$8 sps:$4 sm:$0xff]   ;;  %v2219_v20 = vld [vmem:[%s2794_s19 + $0x44] ss:$8 sps:$4 sm:$0xff]  }
  0x62   : > { %1671 = vmatpush1.bf16.msra.mxu1 %v2206_v11  ;;  %1629 = vmatprep.subr.bf16.mxu0 %v2207_v12  ;;  %v2215_v17 = vld [vmem:[%s2794_s19 + $0x154] ss:$8 sps:$4 sm:$0xff]   ;;  %v2218_v19 = vld [vmem:[%s2794_s19 + $0x150] ss:$8 sps:$4 sm:$0xff]   ;;  %v2221_v21 = vld [vmem:[%s2794_s19 + $0x144] ss:$8 sps:$4 sm:$0xff]  }
  0x63   : > { %1672 = vmatprep.subr.bf16.mxu1 %v2209_v13  ;;  %v2223_v22 = vld [vmem:[%s2794_s19 + $0x40] ss:$8 sps:$4 sm:$0xff]   ;;  %v2225_v24 = vld [vmem:[%s2794_s19 + $0x34] ss:$8 sps:$4 sm:$0xff]   ;;  %v2229_v26 = vld [vmem:[%s2794_s19 + $0x30] ss:$8 sps:$4 sm:$0xff]  }
  0x64   : > { %1630 = vmatpush1.bf16.msra.mxu0 %v2211_v14  ;;  %v2224_v23 = vld [vmem:[%s2794_s19 + $0x140] ss:$8 sps:$4 sm:$0xff]   ;;  %v2227_v25 = vld [vmem:[%s2794_s19 + $0x134] ss:$8 sps:$4 sm:$0xff]   ;;  %v2230_v27 = vld [vmem:[%s2794_s19 + $0x130] ss:$8 sps:$4 sm:$0xff]  }
  0x65   : > { %1631 = vmatprep.subr.bf16.mxu0 %v2213_v16  ;;  %v2231_v28 = vld [vmem:[%s2794_s19 + $0x24] ss:$8 sps:$4 sm:$0xff]   ;;  %v2235_v30 = vld [vmem:[%s2794_s19 + $0x20] ss:$8 sps:$4 sm:$0xff]   ;;  %v2237_v32 = vld [vmem:[%s2794_s19 + $0x14] ss:$8 sps:$4 sm:$0xff]  }
  0x66   : > { %1673 = vmatpush1.bf16.msra.mxu1 %v2212_v15  ;;  %v2233_v29 = vld [vmem:[%s2794_s19 + $0x124] ss:$8 sps:$4 sm:$0xff]   ;;  %v2236_v31 = vld [vmem:[%s2794_s19 + $0x120] ss:$8 sps:$4 sm:$0xff]   ;;  %v2239_v33 = vld [vmem:[%s2794_s19 + $0x114] ss:$8 sps:$4 sm:$0xff]  }
  0x67   : > { %1674 = vmatprep.subr.bf16.mxu1 %v2215_v17  ;;  %v2241_v34 = vld [vmem:[%s2794_s19 + $0x10] ss:$8 sps:$4 sm:$0xff]   ;;  %v2243_v36 = vld [vmem:[%s2794_s19 + $0x4] ss:$8 sps:$4 sm:$0xff]   ;;  %v2247_v38 = vld [vmem:[%s2794_s19] ss:$8 sps:$4 sm:$0xff]  }
  0x68   : > { %1632 = vmatpush1.bf16.msra.mxu0 %v2217_v18  ;;  %v2242_v35 = vld [vmem:[%s2794_s19 + $0x110] ss:$8 sps:$4 sm:$0xff]   ;;  %v2245_v37 = vld [vmem:[%s2794_s19 + $0x104] ss:$8 sps:$4 sm:$0xff]   ;;  %v2248_v39 = vld [vmem:[%s2794_s19 + $0x100] ss:$8 sps:$4 sm:$0xff]  }
  0x69   : > { %1633 = vmatprep.subr.bf16.mxu0 %v2219_v20  ;;  %v2249_v40 = vld [vmem:[%s2794_s19 + $0xf4] ss:$8 sps:$4 sm:$0xff]   ;;  %v2253_v42 = vld [vmem:[%s2794_s19 + $0xf0] ss:$8 sps:$4 sm:$0xff]   ;;  %v2255_v44 = vld [vmem:[%s2794_s19 + $0xe4] ss:$8 sps:$4 sm:$0xff]  }
  0x6a   : > { %1675 = vmatpush1.bf16.msra.mxu1 %v2218_v19  ;;  %v2251_v41 = vld [vmem:[%s2794_s19 + $0x1f4] ss:$8 sps:$4 sm:$0xff]   ;;  %v2254_v43 = vld [vmem:[%s2794_s19 + $0x1f0] ss:$8 sps:$4 sm:$0xff]   ;;  %v2257_v45 = vld [vmem:[%s2794_s19 + $0x1e4] ss:$8 sps:$4 sm:$0xff]  }
  0x6b   : > { %1676 = vmatprep.subr.bf16.mxu1 %v2221_v21  ;;  %v2259_v46 = vld [vmem:[%s2794_s19 + $0xe0] ss:$8 sps:$4 sm:$0xff]   ;;  %v2261_v48 = vld [vmem:[%s2794_s19 + $0xd4] ss:$8 sps:$4 sm:$0xff]   ;;  %v2265_v50 = vld [vmem:[%s2794_s19 + $0xd0] ss:$8 sps:$4 sm:$0xff]  }
  0x6c   : > { %1634 = vmatpush1.bf16.msra.mxu0 %v2223_v22  ;;  %v2260_v47 = vld [vmem:[%s2794_s19 + $0x1e0] ss:$8 sps:$4 sm:$0xff]   ;;  %v2263_v49 = vld [vmem:[%s2794_s19 + $0x1d4] ss:$8 sps:$4 sm:$0xff]   ;;  %v2266_v51 = vld [vmem:[%s2794_s19 + $0x1d0] ss:$8 sps:$4 sm:$0xff]  }
  0x6d   : > { %1635 = vmatprep.subr.bf16.mxu0 %v2225_v24  ;;  %v2267_v52 = vld [vmem:[%s2794_s19 + $0xc4] ss:$8 sps:$4 sm:$0xff]   ;;  %v2271_v54 = vld [vmem:[%s2794_s19 + $0xc0] ss:$8 sps:$4 sm:$0xff]   ;;  %v2273_v56 = vld [vmem:[%s2794_s19 + $0xb4] ss:$8 sps:$4 sm:$0xff]  }
  0x6e   : > { %1677 = vmatpush1.bf16.msra.mxu1 %v2224_v23  ;;  %v2269_v53 = vld [vmem:[%s2794_s19 + $0x1c4] ss:$8 sps:$4 sm:$0xff]   ;;  %v2272_v55 = vld [vmem:[%s2794_s19 + $0x1c0] ss:$8 sps:$4 sm:$0xff]   ;;  %v2275_v57 = vld [vmem:[%s2794_s19 + $0x1b4] ss:$8 sps:$4 sm:$0xff]  }
  0x6f   : > { %1678 = vmatprep.subr.bf16.mxu1 %v2227_v25  ;;  %v2277_v58 = vld [vmem:[%s2794_s19 + $0xb0] ss:$8 sps:$4 sm:$0xff]   ;;  %v2279_v60 = vld [vmem:[%s2794_s19 + $0xa4] ss:$8 sps:$4 sm:$0xff]   ;;  %v2283_v62 = vld [vmem:[%s2794_s19 + $0xa0] ss:$8 sps:$4 sm:$0xff]  }
  0x70   : > { %1636 = vmatpush1.bf16.msra.mxu0 %v2229_v26  ;;  %v2278_v59 = vld [vmem:[%s2794_s19 + $0x1b0] ss:$8 sps:$4 sm:$0xff]   ;;  %v2281_v61 = vld [vmem:[%s2794_s19 + $0x1a4] ss:$8 sps:$4 sm:$0xff]   ;;  %v2284_v63 = vld [vmem:[%s2794_s19 + $0x1a0] ss:$8 sps:$4 sm:$0xff]  }
  0x71   : > { %1637 = vmatprep.subr.bf16.mxu0 %v2231_v28  ;;  %v2285_v4 = vld [vmem:[%s2794_s19 + $0x94] ss:$8 sps:$4 sm:$0xff]   ;;  %v2289_v8 = vld [vmem:[%s2794_s19 + $0x90] ss:$8 sps:$4 sm:$0xff]   ;;  %v2291_v10 = vld [vmem:[%s2794_s19 + $0x84] ss:$8 sps:$4 sm:$0xff]  }
  0x72   : > { %1679 = vmatpush1.bf16.msra.mxu1 %v2230_v27  ;;  %v2287_v7 = vld [vmem:[%s2794_s19 + $0x194] ss:$8 sps:$4 sm:$0xff]   ;;  %v2290_v9 = vld [vmem:[%s2794_s19 + $0x190] ss:$8 sps:$4 sm:$0xff]   ;;  %v2293_v11 = vld [vmem:[%s2794_s19 + $0x184] ss:$8 sps:$4 sm:$0xff]  }
  0x73   : > { %1680 = vmatprep.subr.bf16.mxu1 %v2233_v29  ;;  %v2295_v12 = vld [vmem:[%s2794_s19 + $0x80] ss:$8 sps:$4 sm:$0xff]   ;;  %v2299_v14 = vld [vmem:[%s2794_s19 + $0x274] ss:$8 sps:$4 sm:$0xff]   ;;  %v2297_v18 = vld [vmem:[%s2794_s19 + $0x270] ss:$8 sps:$4 sm:$0xff]  }
  0x74   : > { %1638 = vmatpush1.bf16.msra.mxu0 %v2235_v30  ;;  %v2296_v13 = vld [vmem:[%s2794_s19 + $0x180] ss:$8 sps:$4 sm:$0xff]   ;;  %v2302_v15 = vld [vmem:[%s2794_s19 + $0x374] ss:$8 sps:$4 sm:$0xff]   ;;  %v2300_v19 = vld [vmem:[%s2794_s19 + $0x370] ss:$8 sps:$4 sm:$0xff]  }
  0x75   : > { %1639 = vmatprep.subr.bf16.mxu0 %v2237_v32  ;;  %v2865_v16 = vld [vmem:[%s2985_s0 + $0x10] sm:$0xff]  ;;  %v2305_v20 = vld [vmem:[%s2794_s19 + $0x264] ss:$8 sps:$4 sm:$0xff]   ;;  %v2303_v23 = vld [vmem:[%s2794_s19 + $0x260] ss:$8 sps:$4 sm:$0xff]  }
  0x76   : > { %1681 = vmatpush1.bf16.msra.mxu1 %v2236_v31  ;;  %v2870_v17 = vld [vmem:[%s2985_s0 + $0x30] sm:$0xff]  ;;  %v2308_v21 = vld [vmem:[%s2794_s19 + $0x364] ss:$8 sps:$4 sm:$0xff]   ;;  %v2306_v24 = vld [vmem:[%s2794_s19 + $0x360] ss:$8 sps:$4 sm:$0xff]  }
  0x77   : > { %1682 = vmatprep.subr.bf16.mxu1 %v2239_v33  ;;  %v2019_v22 = vcombine.high %v2865_v16, %v2870_v17  ;;  %v2311_v25 = vld [vmem:[%s2794_s19 + $0x254] ss:$8 sps:$4 sm:$0xff]   ;;  %v2309_v0 = vld [vmem:[%s2794_s19 + $0x250] ss:$8 sps:$4 sm:$0xff]   ;;  %v2317_v2 = vld [vmem:[%s2794_s19 + $0x244] ss:$8 sps:$4 sm:$0xff]  }
  0x78   : > { %1640 = vmatpush1.bf16.msra.mxu0 %v2241_v34  ;;  %v2314_v26 = vld [vmem:[%s2794_s19 + $0x354] ss:$8 sps:$4 sm:$0xff]   ;;  %v2312_v1 = vld [vmem:[%s2794_s19 + $0x350] ss:$8 sps:$4 sm:$0xff]   ;;  %v2315_v5 = vld [vmem:[%s2794_s19 + $0x240] ss:$8 sps:$4 sm:$0xff]  }
  0x79   : > { %1641 = vmatprep.subr.bf16.mxu0 %v2243_v36  ;;  %v2323_v27 = vld [vmem:[%s2794_s19 + $0x234] ss:$8 sps:$4 sm:$0xff]   ;;  %v2321_v29 = vld [vmem:[%s2794_s19 + $0x230] ss:$8 sps:$4 sm:$0xff]   ;;  %v2329_v31 = vld [vmem:[%s2794_s19 + $0x224] ss:$8 sps:$4 sm:$0xff]  }
  0x7a   : > { %1683 = vmatpush1.bf16.msra.mxu1 %v2242_v35  ;;  %v2326_v28 = vld [vmem:[%s2794_s19 + $0x334] ss:$8 sps:$4 sm:$0xff]   ;;  %v2324_v30 = vld [vmem:[%s2794_s19 + $0x330] ss:$8 sps:$4 sm:$0xff]   ;;  %v2332_v32 = vld [vmem:[%s2794_s19 + $0x324] ss:$8 sps:$4 sm:$0xff]  }
  0x7b   : > { %1684 = vmatprep.subr.bf16.mxu1 %v2245_v37  ;;  %v2327_v33 = vld [vmem:[%s2794_s19 + $0x220] ss:$8 sps:$4 sm:$0xff]   ;;  %v2904_v34 = vld [vmem:[%s2985_s0 + $0x18] sm:$0xff] }
  0x7c   : > { %1642 = vmatpush1.bf16.msra.mxu0 %v2247_v38  ;;  %v2330_v35 = vld [vmem:[%s2794_s19 + $0x320] ss:$8 sps:$4 sm:$0xff]   ;;  %v2335_v36 = vld [vmem:[%s2794_s19 + $0x214] ss:$8 sps:$4 sm:$0xff]  }
  0x7d   : > { %1643 = vmatprep.subr.bf16.mxu0 %v2249_v40  ;;  %v2338_v37 = vld [vmem:[%s2794_s19 + $0x314] ss:$8 sps:$4 sm:$0xff]   ;;  %v2333_v40 = vld [vmem:[%s2794_s19 + $0x210] ss:$8 sps:$4 sm:$0xff]  }
  0x7e   : > { %1685 = vmatpush1.bf16.msra.mxu1 %v2248_v39  ;;  %v2912_v38 = vld [vmem:[%s2985_s0 + $0x38] sm:$0xff] }
  0x7f   : > { %1686 = vmatprep.subr.bf16.mxu1 %v2251_v41  ;;  %v2021_v39 = vcombine.high %v2904_v34, %v2912_v38  ;;  %v2336_v41 = vld [vmem:[%s2794_s19 + $0x310] ss:$8 sps:$4 sm:$0xff]  }
  0x80   : > { %1644 = vmatpush2.bf16.msra.mxu0 %v2253_v42  ;;  %v2341_v42 = vld [vmem:[%s2794_s19 + $0x204] ss:$8 sps:$4 sm:$0xff]  }
  0x81   : > { %1645 = vmatprep.subr.bf16.mxu0 %v2255_v44  ;;  %v2339_v44 = vld [vmem:[%s2794_s19 + $0x200] ss:$8 sps:$4 sm:$0xff]  }
  0x82   : > { %1687 = vmatpush2.bf16.msra.mxu1 %v2254_v43  ;;  %v2344_v43 = vld [vmem:[%s2794_s19 + $0x304] ss:$8 sps:$4 sm:$0xff]  }
  0x83   : > { %1688 = vmatprep.subr.bf16.mxu1 %v2257_v45  ;;  %v2342_v45 = vld [vmem:[%s2794_s19 + $0x300] ss:$8 sps:$4 sm:$0xff]  }
  0x84   : > { %1646 = vmatpush2.bf16.msra.mxu0 %v2259_v46  ;;  %v2347_v46 = vld [vmem:[%s2794_s19 + $0x2f4] ss:$8 sps:$4 sm:$0xff]  }
  0x85   : > { %1647 = vmatprep.subr.bf16.mxu0 %v2261_v48  ;;  %v2345_v48 = vld [vmem:[%s2794_s19 + $0x2f0] ss:$8 sps:$4 sm:$0xff]  }
  0x86   : > { %1689 = vmatpush2.bf16.msra.mxu1 %v2260_v47  ;;  %v2350_v47 = vld [vmem:[%s2794_s19 + $0x3f4] ss:$8 sps:$4 sm:$0xff]  }
  0x87   : > { %1690 = vmatprep.subr.bf16.mxu1 %v2263_v49  ;;  %v2348_v49 = vld [vmem:[%s2794_s19 + $0x3f0] ss:$8 sps:$4 sm:$0xff]  }
  0x88   : > { %1648 = vmatpush2.bf16.msra.mxu0 %v2265_v50  ;;  %v2353_v50 = vld [vmem:[%s2794_s19 + $0x2e4] ss:$8 sps:$4 sm:$0xff]  }
  0x89   : > { %1649 = vmatprep.subr.bf16.mxu0 %v2267_v52  ;;  %v2351_v52 = vld [vmem:[%s2794_s19 + $0x2e0] ss:$8 sps:$4 sm:$0xff]  }
  0x8a   : > { %1691 = vmatpush2.bf16.msra.mxu1 %v2266_v51  ;;  %v2356_v51 = vld [vmem:[%s2794_s19 + $0x3e4] ss:$8 sps:$4 sm:$0xff]  }
  0x8b   : > { %1692 = vmatprep.subr.bf16.mxu1 %v2269_v53  ;;  %v2354_v53 = vld [vmem:[%s2794_s19 + $0x3e0] ss:$8 sps:$4 sm:$0xff]  }
  0x8c   : > { %1650 = vmatpush2.bf16.msra.mxu0 %v2271_v54  ;;  %v2359_v54 = vld [vmem:[%s2794_s19 + $0x2d4] ss:$8 sps:$4 sm:$0xff]  }
  0x8d   : > { %1651 = vmatprep.subr.bf16.mxu0 %v2273_v56  ;;  %v2357_v56 = vld [vmem:[%s2794_s19 + $0x2d0] ss:$8 sps:$4 sm:$0xff]  }
  0x8e   : > { %1693 = vmatpush2.bf16.msra.mxu1 %v2272_v55  ;;  %v2362_v55 = vld [vmem:[%s2794_s19 + $0x3d4] ss:$8 sps:$4 sm:$0xff]  }
  0x8f   : > { %1694 = vmatprep.subr.bf16.mxu1 %v2275_v57  ;;  %v2360_v57 = vld [vmem:[%s2794_s19 + $0x3d0] ss:$8 sps:$4 sm:$0xff]  }
  0x90   : > { %1652 = vmatpush2.bf16.msra.mxu0 %v2277_v58  ;;  %v2365_v58 = vld [vmem:[%s2794_s19 + $0x2c4] ss:$8 sps:$4 sm:$0xff]  }
  0x91   : > { %1653 = vmatprep.subr.bf16.mxu0 %v2279_v60  ;;  %v2363_v60 = vld [vmem:[%s2794_s19 + $0x2c0] ss:$8 sps:$4 sm:$0xff]  }
  0x92   : > { %1695 = vmatpush2.bf16.msra.mxu1 %v2278_v59  ;;  %v2368_v59 = vld [vmem:[%s2794_s19 + $0x3c4] ss:$8 sps:$4 sm:$0xff]  }
  0x93   : > { %1696 = vmatprep.subr.bf16.mxu1 %v2281_v61  ;;  %v2366_v61 = vld [vmem:[%s2794_s19 + $0x3c0] ss:$8 sps:$4 sm:$0xff]  }
  0x94   : > { %1654 = vmatpush2.bf16.msra.mxu0 %v2283_v62  ;;  %v2371_v62 = vld [vmem:[%s2794_s19 + $0x2b4] ss:$8 sps:$4 sm:$0xff]  }
  0x95   : > { %1655 = vmatprep.subr.bf16.mxu0 %v2285_v4  ;;  %v2369_v4 = vld [vmem:[%s2794_s19 + $0x2b0] ss:$8 sps:$4 sm:$0xff]  }
  0x96   : > { %1697 = vmatpush2.bf16.msra.mxu1 %v2284_v63  ;;  %v2374_v63 = vld [vmem:[%s2794_s19 + $0x3b4] ss:$8 sps:$4 sm:$0xff]  }
  0x97   : > { %1698 = vmatprep.subr.bf16.mxu1 %v2287_v7  ;;  %v2372_v7 = vld [vmem:[%s2794_s19 + $0x3b0] ss:$8 sps:$4 sm:$0xff]  }
  0x98   : > { %1656 = vmatpush2.bf16.msra.mxu0 %v2289_v8  ;;  %v2377_v8 = vld [vmem:[%s2794_s19 + $0x2a4] ss:$8 sps:$4 sm:$0xff]  }
  0x99   : > { %1657 = vmatprep.subr.bf16.mxu0 %v2291_v10  ;;  %v2375_v10 = vld [vmem:[%s2794_s19 + $0x2a0] ss:$8 sps:$4 sm:$0xff]  }
  0x9a   : > { %1699 = vmatpush2.bf16.msra.mxu1 %v2290_v9  ;;  %v2380_v9 = vld [vmem:[%s2794_s19 + $0x3a4] ss:$8 sps:$4 sm:$0xff]  }
  0x9b   : > { %1700 = vmatprep.subr.bf16.mxu1 %v2293_v11  ;;  %v2378_v11 = vld [vmem:[%s2794_s19 + $0x3a0] ss:$8 sps:$4 sm:$0xff]  }
  0x9c   : > { %1658 = vmatpush2.bf16.msra.mxu0 %v2295_v12  ;;  %v2383_v12 = vld [vmem:[%s2794_s19 + $0x294] ss:$8 sps:$4 sm:$0xff]  }
  0x9d   : > { %1713 = vmatprep.subr.bf16.mxu0 %v2299_v14  ;;  %v2381_v14 = vld [vmem:[%s2794_s19 + $0x290] ss:$8 sps:$4 sm:$0xff]  }
  0x9e   : > { %1701 = vmatpush2.bf16.msra.mxu1 %v2296_v13  ;;  %v2386_v13 = vld [vmem:[%s2794_s19 + $0x394] ss:$8 sps:$4 sm:$0xff]  }
  0x9f   : > { %1756 = vmatprep.subr.bf16.mxu1 %v2302_v15  ;;  %1660 = vmatmul.mubr.bf16.vlgmr.msra.gmra.mxu0 %v2014_v3  ;;  %v2320_v3 = vld [vmem:[%s2794_s19 + $0x344] ss:$8 sps:$4 sm:$0xff]   ;;  %v2384_v15 = vld [vmem:[%s2794_s19 + $0x390] ss:$8 sps:$4 sm:$0xff]  }
  0xa0   : > { %1714 = vmatpush1.bf16.msra.mxu0 %v2297_v18  ;;  %1745 = vmatprep.mubr.bf16.mxu0 %v2019_v22  ;;  %v2389_v18 = vld [vmem:[%s2794_s19 + $0x284] ss:$8 sps:$4 sm:$0xff]   ;;  %v2018_v22 = vcombine.low %v2865_v16, %v2870_v17 }
  0xa1   : > { %1703 = vmatmul.mubr.bf16.vlgmr.msra.gmra.mxu1 %v2016_v6  ;;  %1715 = vmatprep.subr.bf16.mxu0 %v2305_v20  ;;  %v2318_v6 = vld [vmem:[%s2794_s19 + $0x340] ss:$8 sps:$4 sm:$0xff]  }
  0xa2   : > { %1757 = vmatpush1.bf16.msra.mxu1 %v2300_v19  ;;  %1788 = vmatprep.mubr.bf16.mxu1 %v2021_v39  ;;  %v2392_v19 = vld [vmem:[%s2794_s19 + $0x384] ss:$8 sps:$4 sm:$0xff]   ;;  %v2387_v20 = vld [vmem:[%s2794_s19 + $0x280] ss:$8 sps:$4 sm:$0xff]  }
  0xa3   : > { %1758 = vmatprep.subr.bf16.mxu1 %v2308_v21  ;;  %v2390_v21 = vld [vmem:[%s2794_s19 + $0x380] ss:$8 sps:$4 sm:$0xff]  }
  0xa4   : > { %1716 = vmatpush1.bf16.msra.mxu0 %v2303_v23  ;;  %v2020_v23 = vcombine.low %v2904_v34, %v2912_v38 }
  0xa5   : > { %1717 = vmatprep.subr.bf16.mxu0 %v2311_v25 }
  0xa6   : > { %1759 = vmatpush1.bf16.msra.mxu1 %v2306_v24 }
  0xa7   : > { %1760 = vmatprep.subr.bf16.mxu1 %v2314_v26  ;;  %v1816_v26 = vlaneseq }
  0xa8   : > { %1718 = vmatpush1.bf16.msra.mxu0 %v2309_v0 }
  0xa9   : > { %1719 = vmatprep.subr.bf16.mxu0 %v2317_v2  ;;  %v1817_v2 = vshrl.u32 %v1816_v26, 7 }
  0xaa   : > { %1761 = vmatpush1.bf16.msra.mxu1 %v2312_v1 }
  0xab   : > { %1762 = vmatprep.subr.bf16.mxu1 %v2320_v3  ;;  %v1818_v16 = vsub.s32 0, %v1817_v2 }
  0xac   : > { %1720 = vmatpush1.bf16.msra.mxu0 %v2315_v5 }
  0xad   : > { %1721 = vmatprep.subr.bf16.mxu0 %v2323_v27  ;;  %v1814_v27 = vld [vmem:[%s795_s7] sm:$0x3] }
  0xae   : > { %1763 = vmatpush1.bf16.msra.mxu1 %v2318_v6  ;;  %v1819_v34 = vrot.slane %v1814_v27, %v1818_v16 }
  0xaf   : > { %1764 = vmatprep.subr.bf16.mxu1 %v2326_v28 }
  0xb0   : > { %1722 = vmatpush1.bf16.msra.mxu0 %v2321_v29  ;;  %v1822_v29 = vsub.s32 1, %v1817_v2 }
  0xb1   : > { %1723 = vmatprep.subr.bf16.mxu0 %v2329_v31 }
  0xb2   : > { %1765 = vmatpush1.bf16.msra.mxu1 %v2324_v30 }
  0xb3   : > { %1766 = vmatprep.subr.bf16.mxu1 %v2332_v32 }
  0xb4   : > { %1724 = vmatpush1.bf16.msra.mxu0 %v2327_v33 }
  0xb5   : > { %1725 = vmatprep.subr.bf16.mxu0 %v2335_v36 }
  0xb6   : > { %1767 = vmatpush1.bf16.msra.mxu1 %v2330_v35 }
  0xb7   : > { %1768 = vmatprep.subr.bf16.mxu1 %v2338_v37 }
  0xb8   : > { %1726 = vmatpush1.bf16.msra.mxu0 %v2333_v40  ;;  %v1823_v40 = vrot.slane %v1814_v27, %v1822_v29 }
  0xb9   : > { %1727 = vmatprep.subr.bf16.mxu0 %v2341_v42 }
  0xba   : > { %1769 = vmatpush1.bf16.msra.mxu1 %v2336_v41 }
  0xbb   : > { %1770 = vmatprep.subr.bf16.mxu1 %v2344_v43 }
  0xbc   : > { %1728 = vmatpush1.bf16.msra.mxu0 %v2339_v44 }
  0xbd   : > { %1729 = vmatprep.subr.bf16.mxu0 %v2347_v46 }
  0xbe   : > { %1771 = vmatpush1.bf16.msra.mxu1 %v2342_v45 }
  0xbf   : > { %1772 = vmatprep.subr.bf16.mxu1 %v2350_v47 }
  0xc0   : > { %1730 = vmatpush2.bf16.msra.mxu0 %v2345_v48 }
  0xc1   : > { %1731 = vmatprep.subr.bf16.mxu0 %v2353_v50 }
  0xc2   : > { %1773 = vmatpush2.bf16.msra.mxu1 %v2348_v49 }
  0xc3   : > { %1774 = vmatprep.subr.bf16.mxu1 %v2356_v51 }
  0xc4   : > { %1732 = vmatpush2.bf16.msra.mxu0 %v2351_v52 }
  0xc5   : > { %1733 = vmatprep.subr.bf16.mxu0 %v2359_v54 }
  0xc6   : > { %1775 = vmatpush2.bf16.msra.mxu1 %v2354_v53 }
  0xc7   : > { %1776 = vmatprep.subr.bf16.mxu1 %v2362_v55 }
  0xc8   : > { %1734 = vmatpush2.bf16.msra.mxu0 %v2357_v56 }
  0xc9   : > { %1735 = vmatprep.subr.bf16.mxu0 %v2365_v58 }
  0xca   : > { %1777 = vmatpush2.bf16.msra.mxu1 %v2360_v57 }
  0xcb   : > { %1778 = vmatprep.subr.bf16.mxu1 %v2368_v59 }
  0xcc   : > { %1736 = vmatpush2.bf16.msra.mxu0 %v2363_v60 }
  0xcd   : > { %1737 = vmatprep.subr.bf16.mxu0 %v2371_v62 }
  0xce   : > { %1779 = vmatpush2.bf16.msra.mxu1 %v2366_v61 }
  0xcf   : > { %1780 = vmatprep.subr.bf16.mxu1 %v2374_v63 }
  0xd0   : > { %1738 = vmatpush2.bf16.msra.mxu0 %v2369_v4 }
  0xd1   : > { %1739 = vmatprep.subr.bf16.mxu0 %v2377_v8 }
  0xd2   : > { %1781 = vmatpush2.bf16.msra.mxu1 %v2372_v7 }
  0xd3   : > { %1782 = vmatprep.subr.bf16.mxu1 %v2380_v9 }
  0xd4   : > { %1740 = vmatpush2.bf16.msra.mxu0 %v2375_v10 }
  0xd5   : > { %1741 = vmatprep.subr.bf16.mxu0 %v2383_v12 }
  0xd6   : > { %1783 = vmatpush2.bf16.msra.mxu1 %v2378_v11 }
  0xd7   : > { %1784 = vmatprep.subr.bf16.mxu1 %v2386_v13 }
  0xd8   : > { %1742 = vmatpush2.bf16.msra.mxu0 %v2381_v14 }
  0xd9   : > { %1743 = vmatprep.subr.bf16.mxu0 %v2389_v18 }
  0xda   : > { %1785 = vmatpush2.bf16.msra.mxu1 %v2384_v15 }
  0xdb   : > { %1786 = vmatprep.subr.bf16.mxu1 %v2392_v19 }
  0xdc   : > { %1744 = vmatpush2.bf16.msra.mxu0 %v2387_v20 }
  0xde   : > { %1787 = vmatpush2.bf16.msra.mxu1 %v2390_v21 }
  0xdf   : > { %1746 = vmatmul.mubr.bf16.vlgmr.msra.gmra.mxu0 %v2018_v22 }
  0xe1   : > { %1789 = vmatmul.mubr.bf16.vlgmr.msra.gmra.mxu1 %v2020_v23 }
 0x15f   : > { %v1661_v24 = vpop.f32.mrf.mxu0 }
 0x161   : > { %v1704_v25 = vpop.f32.mrf.mxu1  ;;  %v1663_v0 = vpop.f32.mrf.mxu0 }
 0x162   : > { %v1705_v28 = vadd.f32 %v1704_v25, %v1661_v24 }
 0x163   : > { %v1706_v1 = vpop.f32.mrf.mxu1  ;;  %v1665_v3 = vpop.f32.mrf.mxu0 }
 0x164   : > { %v1707_v32 = vadd.f32 %v1706_v1, %v1663_v0 }
 0x165   : > { %v1708_v5 = vpop.f32.mrf.mxu1  ;;  %v1667_v17 = vpop.f32.mrf.mxu0 }
 0x166   : > { %v1709_v37 = vadd.f32 %v1708_v5, %v1665_v3 }
 0x167   : > { %v1710_v6 = vpop.f32.mrf.mxu1 }
 0x168   : > { %v1711_v43 = vadd.f32 %v1710_v6, %v1667_v17 }
 0x19f   : > { %v1747_v30 = vpop.f32.mrf.mxu0 }
 0x1a0   : > { %v1748_v33 = vadd.f32 %v1747_v30, %v1705_v28 }
 0x1a1   : > { %v1790_v31 = vpop.f32.mrf.mxu1  ;;  %v1749_v35 = vpop.f32.mrf.mxu0 }
 0x1a2   : > { %v1791_v38 = vadd.f32 %v1790_v31, %v1748_v33  ;;  %v1750_v39 = vadd.f32 %v1749_v35, %v1707_v32 }
 0x1a3   : > { %v1792_v36 = vpop.f32.mrf.mxu1  ;;  %v1751_v41 = vpop.f32.mrf.mxu0 }
 0x1a4   : > { %v1826_v44 = vadd.f32 %v1819_v34, %v1791_v38  ;;  %v1793_v45 = vadd.f32 %v1792_v36, %v1750_v39  ;;  %v1752_v46 = vadd.f32 %v1751_v41, %v1709_v37 }
 0x1a5   : > { %v1794_v42 = vpop.f32.mrf.mxu1  ;;  %v1753_v47 = vpop.f32.mrf.mxu0 }
 0x1a6   : > { %v1827_v48 = vadd.f32 %v1823_v40, %v1793_v45  ;;  %v1795_v49 = vadd.f32 %v1794_v42, %v1752_v46  ;;  %v1754_v50 = vadd.f32 %v1753_v47, %v1711_v43  ;;  %v1830_v52 = vmax.f32 %v1826_v44, 0.0 }
 0x1a7   : > { %v1796_v51 = vpop.f32.mrf.mxu1 }
 0x1a8   : > { %v1831_v53 = vmax.f32 %v1827_v48, 0.0  ;;  %v1828_v54 = vadd.f32 %v1819_v34, %v1795_v49  ;;  %v1797_v55 = vadd.f32 %v1796_v51, %v1754_v50 }
 0x1aa   : > { %v2158_v56 = vpack.c.bf16 %v1831_v53, %v1830_v52  ;;  %v1829_v57 = vadd.f32 %v1823_v40, %v1797_v55  ;;  %v1832_v58 = vmax.f32 %v1828_v54, 0.0 }
 0x1ac   : > { %1846 = vst [vmem:[%s777_s9] sm:$0xff] %v2158_v56  ;;  %v1833_v59 = vmax.f32 %v1829_v57, 0.0  ;;  %1854 = sbr.rel (!%p2488_p6) target bundleno = 441 (0x1b9), region = 82 }
 0x1ae   : > { %v2159_v60 = vpack.c.bf16 %v1833_v59, %v1832_v58 }
 0x1b0   : > { %1847 = vst [vmem:[%s777_s9 + $0x8] sm:$0xff] %v2159_v60 }
 0x1b3   : > { %v1891_v61 = vld [vmem:[%s777_s9] sm:$0xff] }
 0x1b4   : > { %1892 = vst [vmem:[%s1860_s11] sm:$0xff] %v1891_v61 }
 0x1b7   : > { %v1893_v62 = vld [vmem:[%s777_s9 + $0x8] sm:$0xff] }
 0x1b8   : > { %1894 = vst [vmem:[%s1860_s11 + $0x10] sm:$0xff] %v1893_v62 }
 0x1b9 PF: > { %s13_s16 = sadd.s32 1, %s2431_s16   ;;  %s2990_s12 = smov %s2419_s13 }
 0x1ba   : > { %p10_p12 = scmp.ge.s32.totalorder %s13_s16, 4   ;;  %s2991_s13 = smov %s2493_s22 }
 0x1bb   : > { %s2992_s14 = smov %s2427_s15  ;;  %s2993_s15 = smov %s2995_s17 }
 0x1bc   :  { %12 = sbr.rel (!%p10_p12) target bundleno = 3 (0x3), region = 157 }

// kernel: forward.11
= control target key start
LH: loop header
LB: loop body
LE: loop exit
PB: predicated region body
PF: predicated region fallthrough
CT: control target
= control target key end

     0   :  { %s665_s1 = inlined_call_operand.vmem [shape: bf16[512,128], index: 1, kind: input, shape index: {}]   ;;  %s666_s0 = inlined_call_operand.vmem [shape: bf16[16,512], index: 0, kind: input, shape index: {}]   ;;  %s667_s2 = inlined_call_operand.vmem [shape: f32[1,128], index: 2, kind: input, shape index: {}]   ;;  %s668_s3 = inlined_call_operand.vmem [shape: f32[16,128], index: 3, kind: output, shape index: {}]  }
   0x1   :  { %v490_v0 = vld [vmem:[%s665_s1 + $0x78] sm:$0xff]   ;;  %v494_v4 = vld [vmem:[%s665_s1 + $0x70] sm:$0xff]   ;;  %v498_v8 = vld [vmem:[%s665_s1 + $0x68] sm:$0xff]  }
   0x2   :  { %v491_v1 = vld [vmem:[%s665_s1 + $0xf8] sm:$0xff]   ;;  %446 = vmatprep.subr.bf16.mxu0 %v490_v0  ;;  %v495_v5 = vld [vmem:[%s665_s1 + $0xf0] sm:$0xff]   ;;  %v499_v9 = vld [vmem:[%s665_s1 + $0xe8] sm:$0xff]  }
   0x3   :  { %v492_v2 = vld [vmem:[%s665_s1 + $0x38] sm:$0xff]   ;;  %468 = vmatprep.subr.bf16.mxu1 %v491_v1  ;;  %v496_v6 = vld [vmem:[%s665_s1 + $0x30] sm:$0xff]   ;;  %v500_v10 = vld [vmem:[%s665_s1 + $0x28] sm:$0xff]  }
   0x4   :  { %v493_v3 = vld [vmem:[%s665_s1 + $0xb8] sm:$0xff]   ;;  %447 = vmatpush3.bf16.msra.mxu0 %v492_v2  ;;  %v497_v7 = vld [vmem:[%s665_s1 + $0xb0] sm:$0xff]   ;;  %v501_v11 = vld [vmem:[%s665_s1 + $0xa8] sm:$0xff]  }
   0x5   :  { %469 = vmatpush3.bf16.msra.mxu1 %v493_v3  ;;  %448 = vmatprep.subr.bf16.mxu0 %v494_v4  ;;  %v502_v12 = vld [vmem:[%s665_s1 + $0x60] sm:$0xff]   ;;  %v506_v16 = vld [vmem:[%s665_s1 + $0x58] sm:$0xff]   ;;  %v510_v20 = vld [vmem:[%s665_s1 + $0x50] sm:$0xff]  }
   0x6   :  { %470 = vmatprep.subr.bf16.mxu1 %v495_v5  ;;  %v503_v13 = vld [vmem:[%s665_s1 + $0xe0] sm:$0xff]   ;;  %v507_v17 = vld [vmem:[%s665_s1 + $0xd8] sm:$0xff]   ;;  %v511_v21 = vld [vmem:[%s665_s1 + $0xd0] sm:$0xff]  }
   0x7   :  { %v504_v14 = vld [vmem:[%s665_s1 + $0x20] sm:$0xff]   ;;  %v508_v18 = vld [vmem:[%s665_s1 + $0x18] sm:$0xff]   ;;  %v512_v22 = vld [vmem:[%s665_s1 + $0x10] sm:$0xff]  }
   0x8   :  { %449 = vmatpush3.bf16.msra.mxu0 %v496_v6  ;;  %v505_v15 = vld [vmem:[%s665_s1 + $0xa0] sm:$0xff]   ;;  %v509_v19 = vld [vmem:[%s665_s1 + $0x98] sm:$0xff]   ;;  %v513_v23 = vld [vmem:[%s665_s1 + $0x90] sm:$0xff]  }
   0x9   :  { %471 = vmatpush3.bf16.msra.mxu1 %v497_v7  ;;  %450 = vmatprep.subr.bf16.mxu0 %v498_v8  ;;  %v514_v24 = vld [vmem:[%s665_s1 + $0x48] sm:$0xff]   ;;  %v518_v28 = vld [vmem:[%s665_s1 + $0x40] sm:$0xff]  }
   0xa   :  { %472 = vmatprep.subr.bf16.mxu1 %v499_v9  ;;  %v515_v25 = vld [vmem:[%s665_s1 + $0xc8] sm:$0xff]   ;;  %v519_v29 = vld [vmem:[%s665_s1 + $0xc0] sm:$0xff]  }
   0xb   :  { %v516_v26 = vld [vmem:[%s665_s1 + $0x8] sm:$0xff]   ;;  %v520_v30 = vld [vmem:[%s665_s1] sm:$0xff]  }
   0xc   :  { %451 = vmatpush3.bf16.msra.mxu0 %v500_v10  ;;  %v517_v27 = vld [vmem:[%s665_s1 + $0x88] sm:$0xff]   ;;  %v521_v31 = vld [vmem:[%s665_s1 + $0x80] sm:$0xff]  }
   0xd   :  { %473 = vmatpush3.bf16.msra.mxu1 %v501_v11  ;;  %452 = vmatprep.subr.bf16.mxu0 %v502_v12  ;;  %v522_v32 = vld [vmem:[%s666_s0] ss:$16 sps:$4 sm:$0xff]   ;;  %v524_v33 = vld [vmem:[%s666_s0 + $0x4] ss:$16 sps:$4 sm:$0xff]   ;;  %v525_v34 = vld [vmem:[%s666_s0 + $0x8] ss:$16 sps:$4 sm:$0xff]  }
   0xe   :  { %474 = vmatprep.subr.bf16.mxu1 %v503_v13  ;;  %v527_v35 = vld [vmem:[%s666_s0 + $0xc] ss:$16 sps:$4 sm:$0xff]   ;;  %335 = vmatprep.mubr.bf16.mxu0 %v524_v33  ;;  %v445_v43 = vld [vmem:[%s667_s2] ss:$0 sm:$0xff] }
   0xf   :  { %376 = vmatprep.mubr.bf16.mxu1 %v527_v35 }
  0x10   :  { %453 = vmatpush3.bf16.msra.mxu0 %v504_v14 }
  0x11   :  { %475 = vmatpush3.bf16.msra.mxu1 %v505_v15  ;;  %454 = vmatprep.subr.bf16.mxu0 %v506_v16 }
  0x12   :  { %476 = vmatprep.subr.bf16.mxu1 %v507_v17 }
  0x14   :  { %455 = vmatpush3.bf16.msra.mxu0 %v508_v18 }
  0x15   :  { %477 = vmatpush3.bf16.msra.mxu1 %v509_v19  ;;  %456 = vmatprep.subr.bf16.mxu0 %v510_v20 }
  0x16   :  { %478 = vmatprep.subr.bf16.mxu1 %v511_v21 }
  0x18   :  { %457 = vmatpush3.bf16.msra.mxu0 %v512_v22 }
  0x19   :  { %479 = vmatpush3.bf16.msra.mxu1 %v513_v23  ;;  %458 = vmatprep.subr.bf16.mxu0 %v514_v24 }
  0x1a   :  { %480 = vmatprep.subr.bf16.mxu1 %v515_v25 }
  0x1c   :  { %459 = vmatpush3.bf16.msra.mxu0 %v516_v26 }
  0x1d   :  { %481 = vmatpush3.bf16.msra.mxu1 %v517_v27  ;;  %460 = vmatprep.subr.bf16.mxu0 %v518_v28 }
  0x1e   :  { %482 = vmatprep.subr.bf16.mxu1 %v519_v29 }
  0x20   :  { %461 = vmatpush3.bf16.msra.mxu0 %v520_v30 }
  0x21   :  { %483 = vmatpush3.bf16.msra.mxu1 %v521_v31 }
  0x23   :  { %336 = vmatmul.mubr.bf16.vlgmr.msra.gmra.mxu0 %v522_v32 }
  0x24   :  { %377 = vmatmul.mubr.bf16.vlgmr.msra.gmra.mxu1 %v525_v34 }
  0xe3   :  { %v462_v36 = vpop.f32.mrf.mxu0 }
  0xe4   :  { %v484_v37 = vpop.f32.mrf.mxu1 }
  0xe5   :  { %v463_v38 = vpop.f32.mrf.mxu0 }
  0xe6   :  { %v464_v39 = vadd.f32 %v463_v38, %v462_v36  ;;  %v485_v40 = vpop.f32.mrf.mxu1 }
  0xe7   :  { %v486_v41 = vadd.f32 %v485_v40, %v484_v37  ;;  %v465_v42 = vpop.f32.mrf.mxu0 }
  0xe8   :  { %v487_v44 = vpop.f32.mrf.mxu1 }
  0xe9   :  { %v379_v45 = vadd.f32 %v486_v41, %v464_v39  ;;  %v466_v46 = vpop.f32.mrf.mxu0 }
  0xea   :  { %v467_v47 = vadd.f32 %v466_v46, %v465_v42  ;;  %v488_v48 = vpop.f32.mrf.mxu1 }
  0xeb   :  { %v401_v49 = vadd.f32 %v445_v43, %v379_v45  ;;  %v489_v50 = vadd.f32 %v488_v48, %v487_v44 }
  0xed   :  { %403 = vst [vmem:[%s668_s3] sm:$0xff] %v401_v49  ;;  %v382_v51 = vadd.f32 %v489_v50, %v467_v47 }
  0xef   :  { %v402_v52 = vadd.f32 %v445_v43, %v382_v51 }
  0xf1   :  { %404 = vst [vmem:[%s668_s3 + $0x8] sm:$0xff] %v402_v52 }

</bundles_post_ra>
